<compile_context>
chip_gen: v6e
topology: v6e:2x2x1
jax: 0.10.0
libtpu: 0.0.40
codegen_flags: <defaults>
</compile_context>

<pallas_src>
import functools
import math

import jax
import jax.numpy as jnp
from jax import lax
from jax.experimental import pallas as pl
from jax.experimental.pallas import tpu as pltpu


# ----------------------------- helpers --------------------------------------

def _pick_spatial_tile(hw: int, cap: int = 2048) -> int:
    """Largest multiple-of-8 divisor of hw that is <= cap, else hw (single block)."""
    if hw <= cap:
        return hw
    best = None
    for d in range(8, cap + 1, 8):
        if hw % d == 0:
            best = d
    return best if best is not None else hw


def _sigmoid(v):
    # explicit form; exp lowers to the EUP
    return 1.0 / (1.0 + jnp.exp(-v))


# ----------------------- K1: channel attention -------------------------------

def _channel_attn_kernel(x_ref, w1_ref, w2_ref, ca_ref, max_acc, sum_acc, *, inv_hw):
    t = pl.program_id(1)

    @pl.when(t == 0)
    def _():
        max_acc[...] = jnp.full_like(max_acc, -jnp.inf)
        sum_acc[...] = jnp.zeros_like(sum_acc)

    tile = x_ref[0]                                                    # (ts, C)
    max_acc[...] = jnp.maximum(max_acc[...],
                               jnp.max(tile, axis=0, keepdims=True))
    sum_acc[...] = sum_acc[...] + jnp.sum(tile, axis=0, keepdims=True)

    @pl.when(t == pl.num_programs(1) - 1)
    def _():
        avg = sum_acc[...] * inv_hw                                    # (1, C)
        pooled = jnp.concatenate([max_acc[...], avg], axis=0)          # (2, C)
        hid = jnp.maximum(
            jnp.dot(pooled, w1_ref[...], preferred_element_type=jnp.float32), 0.0)
        logits = jnp.dot(hid, w2_ref[...],
                         preferred_element_type=jnp.float32)           # (2, C)
        ca_ref[0] = _sigmoid(logits[0:1] + logits[1:2])                # (1, C)


def channel_attention(x3, w1t, w2t):
    N, HW, C = x3.shape
    Cr = w1t.shape[1]
    ts = _pick_spatial_tile(HW)
    return pl.pallas_call(
        functools.partial(_channel_attn_kernel, inv_hw=1.0 / HW),
        out_shape=jax.ShapeDtypeStruct((N, 1, C), jnp.float32),
        grid=(N, HW // ts),
        in_specs=[
            pl.BlockSpec((1, ts, C), lambda n, t: (n, t, 0)),
            pl.BlockSpec((C, Cr), lambda n, t: (0, 0)),     # resident SE weights
            pl.BlockSpec((Cr, C), lambda n, t: (0, 0)),
        ],
        out_specs=pl.BlockSpec((1, 1, C), lambda n, t: (n, 0, 0)),
        scratch_shapes=[pltpu.VMEM((1, C), jnp.float32),
                        pltpu.VMEM((1, C), jnp.float32)],
        compiler_params=pltpu.CompilerParams(
            dimension_semantics=("parallel", "arbitrary")),
    )(x3, w1t, w2t)


# ------------- K2: channel-wise max / mean of (x * ca), fused ---------------

def _spatial_pool_kernel(x_ref, ca_ref, o_ref, *, inv_c):
    tile = x_ref[0] * ca_ref[0]                                        # (ts, C)
    cmax = jnp.max(tile, axis=1, keepdims=True)                        # (ts, 1)
    cavg = jnp.sum(tile, axis=1, keepdims=True) * inv_c                # (ts, 1)
    o_ref[0] = jnp.concatenate([cmax, cavg], axis=1)                   # (ts, 2)


def spatial_pool(x3, ca):
    N, HW, C = x3.shape
    ts = _pick_spatial_tile(HW)
    return pl.pallas_call(
        functools.partial(_spatial_pool_kernel, inv_c=1.0 / C),
        out_shape=jax.ShapeDtypeStruct((N, HW, 2), jnp.float32),
        grid=(N, HW // ts),
        in_specs=[pl.BlockSpec((1, ts, C), lambda n, t: (n, t, 0)),
                  pl.BlockSpec((1, 1, C), lambda n, t: (n, 0, 0))],
        out_specs=pl.BlockSpec((1, ts, 2), lambda n, t: (n, t, 0)),
        compiler_params=pltpu.CompilerParams(
            dimension_semantics=("parallel", "parallel")),
    )(x3, ca)


# ------------- K3: 7x7 conv (2 -> 1 channel) + sigmoid -----------------------

def _spatial_conv_kernel(cmax_ref, cavg_ref, w_ref, b_ref, o_ref, *, k, h, w):
    m0 = cmax_ref[0]                              # (h+k-1, w+k-1), W on lanes
    m1 = cavg_ref[0]
    acc = jnp.zeros((h, w), jnp.float32)
    for kh in range(k):                           # static unrolled 49-tap conv
        for kw in range(k):
            t = kh * k + kw
            acc = acc + m0[kh:kh + h, kw:kw + w] * w_ref[0, t] \
                      + m1[kh:kh + h, kw:kw + w] * w_ref[1, t]
    o_ref[0] = _sigmoid(acc + b_ref[0, 0])


def spatial_attention(cmax_p, cavg_p, w_sp, b_sp, k, h, w):
    N, hp, wp = cmax_p.shape
    return pl.pallas_call(
        functools.partial(_spatial_conv_kernel, k=k, h=h, w=w),
        out_shape=jax.ShapeDtypeStruct((N, h, w), jnp.float32),
        grid=(N,),
        in_specs=[pl.BlockSpec((1, hp, wp), lambda n: (n, 0, 0)),
                  pl.BlockSpec((1, hp, wp), lambda n: (n, 0, 0)),
                  pl.BlockSpec(memory_space=pltpu.MemorySpace.SMEM),
                  pl.BlockSpec(memory_space=pltpu.MemorySpace.SMEM)],
        out_specs=pl.BlockSpec((1, h, w), lambda n: (n, 0, 0)),
        compiler_params=pltpu.CompilerParams(dimension_semantics=("parallel",)),
    )(cmax_p, cavg_p, w_sp, b_sp)


# ------------- K4: out = x * (ca*sa + 1)  == (x*ca)*sa + x -------------------

def _combine_kernel(x_ref, ca_ref, sa_ref, o_ref):
    o_ref[0] = x_ref[0] * (ca_ref[0] * sa_ref[0] + 1.0)


def cbam_combine(x3, ca, sa3):
    N, HW, C = x3.shape
    ts = _pick_spatial_tile(HW)
    return pl.pallas_call(
        _combine_kernel,
        out_shape=jax.ShapeDtypeStruct((N, HW, C), jnp.float32),
        grid=(N, HW // ts),
        in_specs=[pl.BlockSpec((1, ts, C), lambda n, t: (n, t, 0)),
                  pl.BlockSpec((1, 1, C), lambda n, t: (n, 0, 0)),
                  pl.BlockSpec((1, ts, 1), lambda n, t: (n, t, 0))],
        out_specs=pl.BlockSpec((1, ts, C), lambda n, t: (n, t, 0)),
        input_output_aliases={0: 0},          # reuse the x buffer for the output
        compiler_params=pltpu.CompilerParams(
            dimension_semantics=("parallel", "parallel")),
    )(x3, ca, sa3)


# ------------------------------ forward --------------------------------------

def cbam_forward(params, x_nchw, *, kernel_size=7):
    x = x_nchw.astype(jnp.float32)
    N, C, H, W = x.shape
    HW = H * W
    k = kernel_size
    p = k // 2

    x3 = jnp.transpose(x, (0, 2, 3, 1)).reshape(N, HW, C)          # rows x channels

    # channel attention: sigmoid(SE(maxpool) + SE(avgpool))
    ca = channel_attention(x3, params["ca_w1t"], params["ca_w2t"])  # (N, 1, C)

    # channel-wise max/mean of x*ca (x*ca recomputed in-register, never stored)
    pooled = spatial_pool(x3, ca)                                    # (N, HW, 2)
    pm = pooled.reshape(N, H, W, 2)
    cmax_p = jnp.pad(pm[..., 0], ((0, 0), (p, p), (p, p)))           # zero pad
    cavg_p = jnp.pad(pm[..., 1], ((0, 0), (p, p), (p, p)))

    # spatial attention map
    sa = spatial_attention(cmax_p, cavg_p, params["sa_w"], params["sa_b"], k, H, W)

    # out = (x*ca)*sa + x
    out3 = cbam_combine(x3, ca, sa.reshape(N, HW, 1))
    out = out3.reshape(N, H, W, C)
    return jnp.transpose(out, (0, 3, 1, 2))                          # back to NCHW


# ------------------------------ params ---------------------------------------

def init_params(key, channel, reduction=16, kernel_size=7):
    cr = channel // reduction
    k1, k2, k3, k4 = jax.random.split(key, 4)
    # ChannelAttention.se: Conv2d(C, Cr, 1, bias=False) then Conv2d(Cr, C, 1, bias=False)
    w1 = jax.random.normal(k1, (cr, channel), jnp.float32) * math.sqrt(2.0 / channel)
    w2 = jax.random.normal(k2, (channel, cr), jnp.float32) * math.sqrt(2.0 / cr)
    # SpatialAttention.conv: Conv2d(2, 1, k, padding=k//2), with bias
    w_sp = jax.random.normal(k3, (2, kernel_size * kernel_size), jnp.float32) \
        * math.sqrt(2.0 / (2.0 * kernel_size * kernel_size))
    b_sp = jax.random.normal(k4, (1, 1), jnp.float32) * 0.1
    return {
        "ca_w1t": jnp.transpose(w1),   # (C, Cr)
        "ca_w2t": jnp.transpose(w2),   # (Cr, C)
        "sa_w": w_sp,                  # (2, k*k): row 0 -> max map, row 1 -> avg map
        "sa_b": b_sp,                  # (1, 1)
    }


# ---------------------------- pure-JAX reference ------------------------------

def cbam_reference(params, x_nchw, kernel_size=7):
    x = x_nchw.astype(jnp.float32)
    N, C, H, W = x.shape
    k = kernel_size
    mx = jnp.max(x, axis=(2, 3))
    av = jnp.mean(x, axis=(2, 3))

    def se(v):
        h = jnp.maximum(v @ params["ca_w1t"], 0.0)
        return h @ params["ca_w2t"]

    ca = jax.nn.sigmoid(se(mx) + se(av))[:, :, None, None]
    out = x * ca
    cmax = jnp.max(out, axis=1, keepdims=True)
    cavg = jnp.mean(out, axis=1, keepdims=True)
    cat = jnp.concatenate([cmax, cavg], axis=1)                      # (N, 2, H, W)
    w = params["sa_w"].reshape(1, 2, k, k)                           # OIHW
    conv = lax.conv_general_dilated(
        cat, w, window_strides=(1, 1), padding=[(k // 2, k // 2)] * 2,
        dimension_numbers=("NCHW", "OIHW", "NCHW"))
    sa = jax.nn.sigmoid(conv + params["sa_b"][0, 0])
    return out * sa + x


# --------------------------------- main ---------------------------------------

if __name__ == "__main__":
    CHANNEL, REDUCTION, KSIZE = 128, 16, 7
    key = jax.random.PRNGKey(0)
    pkey, xkey = jax.random.split(key)
    params = init_params(pkey, CHANNEL, REDUCTION, KSIZE)
    x = jax.random.normal(xkey, (2, CHANNEL, 16, 16), jnp.float32)   # NCHW

    fwd = jax.jit(functools.partial(cbam_forward, kernel_size=KSIZE))
    out = jax.block_until_ready(fwd(params, x))

    assert out.shape == x.shape, out.shape
    assert bool(jnp.all(jnp.isfinite(out)))

    ref = jax.block_until_ready(cbam_reference(params, x, KSIZE))
    err = float(jnp.max(jnp.abs(out - ref)))
    assert jnp.allclose(out, ref, rtol=1e-3, atol=1e-3), err

    print("KERNEL_OK")
</pallas_src>

<mosaic_0001>
module attributes {stable_mosaic.version = 11 : i64} {
  func.func @_spatial_pool_kernel(%arg0: i32, %arg1: i32, %arg2: memref<1x256x128xf32, #tpu.memory_space<vmem>>, %arg3: memref<1x1x128xf32, #tpu.memory_space<vmem>>, %arg4: memref<1x256x2xf32, #tpu.memory_space<vmem>>) attributes {dimension_semantics = [#tpu.dimension_semantics<parallel>, #tpu.dimension_semantics<parallel>], iteration_bounds = array<i64: 2, 1>, scalar_prefetch = 0 : i64, scratch_operands = 0 : i64, tpu.core_type = #tpu.core_type<tc>, window_params = [{transform_indices = @transform_0, window_bounds = array<i64: 1, 256, 128>}, {transform_indices = @transform_1, window_bounds = array<i64: 1, 1, 128>}, {transform_indices = @transform_2, window_bounds = array<i64: 1, 256, 2>}]} {
    %c0 = arith.constant 0 : index
    %c0_0 = arith.constant 0 : index
    %c0_1 = arith.constant 0 : index
    %0 = vector.load %arg2[%c0, %c0_0, %c0_1] : memref<1x256x128xf32, #tpu.memory_space<vmem>>, vector<1x256x128xf32>
    %1 = vector.shape_cast %0 : vector<1x256x128xf32> to vector<256x128xf32>
    %c0_2 = arith.constant 0 : index
    %c0_3 = arith.constant 0 : index
    %c0_4 = arith.constant 0 : index
    %2 = vector.load %arg3[%c0_2, %c0_3, %c0_4] : memref<1x1x128xf32, #tpu.memory_space<vmem>>, vector<1x1x128xf32>
    %3 = vector.shape_cast %2 : vector<1x1x128xf32> to vector<1x128xf32>
    %4 = vector.broadcast %3 : vector<1x128xf32> to vector<256x128xf32>
    %5 = arith.mulf %1, %4 : vector<256x128xf32>
    %cst = arith.constant dense<0xFF800000> : vector<256xf32>
    %6 = vector.multi_reduction <maximumf>, %5, %cst [1] : vector<256x128xf32> to vector<256xf32>
    %7 = vector.shape_cast %6 : vector<256xf32> to vector<256x1xf32>
    %cst_5 = arith.constant dense<0.000000e+00> : vector<256xf32>
    %8 = vector.multi_reduction <add>, %5, %cst_5 [1] : vector<256x128xf32> to vector<256xf32>
    %9 = vector.shape_cast %8 : vector<256xf32> to vector<256x1xf32>
    %cst_6 = arith.constant 7.812500e-03 : f32
    %10 = vector.broadcast %cst_6 : f32 to vector<256x1xf32>
    %11 = arith.mulf %9, %10 : vector<256x1xf32>
    %12 = tpu.concatenate %7, %11 in 1 : vector<256x1xf32>, vector<256x1xf32> -> vector<256x2xf32>
    %c0_7 = arith.constant 0 : index
    %c0_8 = arith.constant 0 : index
    %c0_9 = arith.constant 0 : index
    %13 = vector.load %arg4[%c0_7, %c0_8, %c0_9] : memref<1x256x2xf32, #tpu.memory_space<vmem>>, vector<1x256x2xf32>
    %14 = vector.shape_cast %13 : vector<1x256x2xf32> to vector<256x2xf32>
    %15 = vector.shape_cast %12 : vector<256x2xf32> to vector<1x256x2xf32>
    tpu.vector_store %arg4[%c0_7, %c0_8, %c0_9], %15 {strides = array<i32>} : memref<1x256x2xf32, #tpu.memory_space<vmem>>, vector<1x256x2xf32>,
    return
  }
  func.func @transform_0(%arg0: i32, %arg1: i32) -> (i32, i32, i32) {
    %c0_i32 = arith.constant 0 : i32
    %c0_i32_0 = arith.constant 0 : i32
    return %arg0, %arg1, %c0_i32 : i32, i32, i32
  }
  func.func @transform_1(%arg0: i32, %arg1: i32) -> (i32, i32, i32) {
    %c0_i32 = arith.constant 0 : i32
    %c0_i32_0 = arith.constant 0 : i32
    %c0_i32_1 = arith.constant 0 : i32
    return %arg0, %c0_i32, %c0_i32_0 : i32, i32, i32
  }
  func.func @transform_2(%arg0: i32, %arg1: i32) -> (i32, i32, i32) {
    %c0_i32 = arith.constant 0 : i32
    %c0_i32_0 = arith.constant 0 : i32
    return %arg0, %arg1, %c0_i32 : i32, i32, i32
  }
}

module attributes {stable_mosaic.version = 11 : i64} {
  func.func @_channel_attn_kernel(%arg0: i32, %arg1: i32, %arg2: memref<1x256x128xf32, #tpu.memory_space<vmem>>, %arg3: memref<128x8xf32, #tpu.memory_space<vmem>>, %arg4: memref<8x128xf32, #tpu.memory_space<vmem>>, %arg5: memref<1x1x128xf32, #tpu.memory_space<vmem>>, %arg6: memref<1x128xf32, #tpu.memory_space<vmem>>, %arg7: memref<1x128xf32, #tpu.memory_space<vmem>>) attributes {dimension_semantics = [#tpu.dimension_semantics<parallel>, #tpu.dimension_semantics<arbitrary>], iteration_bounds = array<i64: 2, 1>, scalar_prefetch = 0 : i64, scratch_operands = 2 : i64, tpu.core_type = #tpu.core_type<tc>, window_params = [{transform_indices = @transform_0, window_bounds = array<i64: 1, 256, 128>}, {pipeline_mode = #tpu.pipeline_mode<synchronous>, transform_indices = @transform_1, window_bounds = array<i64: 128, 8>}, {pipeline_mode = #tpu.pipeline_mode<synchronous>, transform_indices = @transform_2, window_bounds = array<i64: 8, 128>}, {transform_indices = @transform_3, window_bounds = array<i64: 1, 1, 128>}]} {
    %c0_i32 = arith.constant 0 : i32
    %0 = arith.cmpi eq, %arg1, %c0_i32 : i32
    %1 = arith.extui %0 : i1 to i32
    %c0_i32_0 = arith.constant 0 : i32
    %2 = arith.cmpi ne, %1, %c0_i32_0 : i32
    scf.if %2 {
      %cst_14 = arith.constant 0xFF800000 : f32
      %18 = vector.broadcast %cst_14 : f32 to vector<1x128xf32>
      %c0_15 = arith.constant 0 : index
      %c0_16 = arith.constant 0 : index
      %19 = vector.load %arg6[%c0_15, %c0_16] : memref<1x128xf32, #tpu.memory_space<vmem>>, vector<1x128xf32>
      tpu.vector_store %arg6[%c0_15, %c0_16], %18 {strides = array<i32>} : memref<1x128xf32, #tpu.memory_space<vmem>>, vector<1x128xf32>,
      %cst_17 = arith.constant 0.000000e+00 : f32
      %20 = vector.broadcast %cst_17 : f32 to vector<1x128xf32>
      %c0_18 = arith.constant 0 : index
      %c0_19 = arith.constant 0 : index
      %21 = vector.load %arg7[%c0_18, %c0_19] : memref<1x128xf32, #tpu.memory_space<vmem>>, vector<1x128xf32>
      tpu.vector_store %arg7[%c0_18, %c0_19], %20 {strides = array<i32>} : memref<1x128xf32, #tpu.memory_space<vmem>>, vector<1x128xf32>,
    } else {
    }
    %c0 = arith.constant 0 : index
    %c0_1 = arith.constant 0 : index
    %c0_2 = arith.constant 0 : index
    %3 = vector.load %arg2[%c0, %c0_1, %c0_2] : memref<1x256x128xf32, #tpu.memory_space<vmem>>, vector<1x256x128xf32>
    %4 = vector.shape_cast %3 : vector<1x256x128xf32> to vector<256x128xf32>
    %c0_3 = arith.constant 0 : index
    %c0_4 = arith.constant 0 : index
    %5 = vector.load %arg6[%c0_3, %c0_4] : memref<1x128xf32, #tpu.memory_space<vmem>>, vector<1x128xf32>
    %cst = arith.constant dense<0xFF800000> : vector<128xf32>
    %6 = vector.multi_reduction <maximumf>, %4, %cst [0] : vector<256x128xf32> to vector<128xf32>
    %7 = vector.shape_cast %6 : vector<128xf32> to vector<1x128xf32>
    %8 = arith.maximumf %5, %7 : vector<1x128xf32>
    %c0_5 = arith.constant 0 : index
    %c0_6 = arith.constant 0 : index
    %9 = vector.load %arg6[%c0_5, %c0_6] : memref<1x128xf32, #tpu.memory_space<vmem>>, vector<1x128xf32>
    tpu.vector_store %arg6[%c0_5, %c0_6], %8 {strides = array<i32>} : memref<1x128xf32, #tpu.memory_space<vmem>>, vector<1x128xf32>,
    %c0_7 = arith.constant 0 : index
    %c0_8 = arith.constant 0 : index
    %10 = vector.load %arg7[%c0_7, %c0_8] : memref<1x128xf32, #tpu.memory_space<vmem>>, vector<1x128xf32>
    %cst_9 = arith.constant dense<0.000000e+00> : vector<128xf32>
    %11 = vector.multi_reduction <add>, %4, %cst_9 [0] : vector<256x128xf32> to vector<128xf32>
    %12 = vector.shape_cast %11 : vector<128xf32> to vector<1x128xf32>
    %13 = arith.addf %10, %12 : vector<1x128xf32>
    %c0_10 = arith.constant 0 : index
    %c0_11 = arith.constant 0 : index
    %14 = vector.load %arg7[%c0_10, %c0_11] : memref<1x128xf32, #tpu.memory_space<vmem>>, vector<1x128xf32>
    tpu.vector_store %arg7[%c0_10, %c0_11], %13 {strides = array<i32>} : memref<1x128xf32, #tpu.memory_space<vmem>>, vector<1x128xf32>,
    %c0_i32_12 = arith.constant 0 : i32
    %15 = arith.cmpi eq, %arg1, %c0_i32_12 : i32
    %16 = arith.extui %15 : i1 to i32
    %c0_i32_13 = arith.constant 0 : i32
    %17 = arith.cmpi ne, %16, %c0_i32_13 : i32
    scf.if %17 {
      %c0_14 = arith.constant 0 : index
      %c0_15 = arith.constant 0 : index
      %18 = vector.load %arg7[%c0_14, %c0_15] : memref<1x128xf32, #tpu.memory_space<vmem>>, vector<1x128xf32>
      %cst_16 = arith.constant 3.906250e-03 : f32
      %19 = vector.broadcast %cst_16 : f32 to vector<1x128xf32>
      %20 = arith.mulf %18, %19 : vector<1x128xf32>
      %c0_17 = arith.constant 0 : index
      %c0_18 = arith.constant 0 : index
      %21 = vector.load %arg6[%c0_17, %c0_18] : memref<1x128xf32, #tpu.memory_space<vmem>>, vector<1x128xf32>
      %22 = tpu.concatenate %21, %20 in 0 : vector<1x128xf32>, vector<1x128xf32> -> vector<2x128xf32>
      %c0_19 = arith.constant 0 : index
      %c0_20 = arith.constant 0 : index
      %23 = vector.load %arg3[%c0_19, %c0_20] : memref<128x8xf32, #tpu.memory_space<vmem>>, vector<128x8xf32>
      %cst_21 = arith.constant dense<0.000000e+00> : vector<2x8xf32>
      %24 = tpu.matmul %22, %23, %cst_21 {dimension_numbers = #tpu.dot_dimension_numbers<[1], [0], [0], [1], [0, 0, 1, 1], [], []>} : vector<2x128xf32>, vector<128x8xf32>, vector<2x8xf32> -> vector<2x8xf32>
      %cst_22 = arith.constant 0.000000e+00 : f32
      %25 = vector.broadcast %cst_22 : f32 to vector<2x8xf32>
      %26 = arith.maximumf %24, %25 : vector<2x8xf32>
      %c0_23 = arith.constant 0 : index
      %c0_24 = arith.constant 0 : index
      %27 = vector.load %arg4[%c0_23, %c0_24] : memref<8x128xf32, #tpu.memory_space<vmem>>, vector<8x128xf32>
      %cst_25 = arith.constant dense<0.000000e+00> : vector<2x128xf32>
      %28 = tpu.matmul %26, %27, %cst_25 {dimension_numbers = #tpu.dot_dimension_numbers<[1], [0], [0], [1], [0, 0, 1, 1], [], []>} : vector<2x8xf32>, vector<8x128xf32>, vector<2x128xf32> -> vector<2x128xf32>
      %29 = vector.extract_strided_slice %28 {offsets = [0, 0], sizes = [1, 128], strides = [1, 1]} : vector<2x128xf32> to vector<1x128xf32>
      %30 = vector.extract_strided_slice %28 {offsets = [1, 0], sizes = [1, 128], strides = [1, 1]} : vector<2x128xf32> to vector<1x128xf32>
      %31 = arith.addf %29, %30 : vector<1x128xf32>
      %cst_26 = arith.constant 0.000000e+00 : f32
      %32 = vector.broadcast %cst_26 : f32 to vector<1x128xf32>
      %33 = arith.subf %32, %31 : vector<1x128xf32>
      %34 = math.exp %33 : vector<1x128xf32>
      %cst_27 = arith.constant 1.000000e+00 : f32
      %35 = vector.broadcast %cst_27 : f32 to vector<1x128xf32>
      %36 = arith.addf %35, %34 : vector<1x128xf32>
      %cst_28 = arith.constant 1.000000e+00 : f32
      %37 = vector.broadcast %cst_28 : f32 to vector<1x128xf32>
      %38 = arith.divf %37, %36 : vector<1x128xf32>
      %c0_29 = arith.constant 0 : index
      %c0_30 = arith.constant 0 : index
      %c0_31 = arith.constant 0 : index
      %39 = vector.load %arg5[%c0_29, %c0_30, %c0_31] : memref<1x1x128xf32, #tpu.memory_space<vmem>>, vector<1x1x128xf32>
      %40 = vector.shape_cast %39 : vector<1x1x128xf32> to vector<1x128xf32>
      %41 = vector.shape_cast %38 : vector<1x128xf32> to vector<1x1x128xf32>
      tpu.vector_store %arg5[%c0_29, %c0_30, %c0_31], %41 {strides = array<i32>} : memref<1x1x128xf32, #tpu.memory_space<vmem>>, vector<1x1x128xf32>,
    } else {
    }
    return
  }
  func.func @transform_0(%arg0: i32, %arg1: i32) -> (i32, i32, i32) {
    %c0_i32 = arith.constant 0 : i32
    %c0_i32_0 = arith.constant 0 : i32
    return %arg0, %arg1, %c0_i32 : i32, i32, i32
  }
  func.func @transform_1(%arg0: i32, %arg1: i32) -> (i32, i32) {
    %c0_i32 = arith.constant 0 : i32
    %c0_i32_0 = arith.constant 0 : i32
    %c0_i32_1 = arith.constant 0 : i32
    return %c0_i32, %c0_i32_0 : i32, i32
  }
  func.func @transform_2(%arg0: i32, %arg1: i32) -> (i32, i32) {
    %c0_i32 = arith.constant 0 : i32
    %c0_i32_0 = arith.constant 0 : i32
    %c0_i32_1 = arith.constant 0 : i32
    return %c0_i32, %c0_i32_0 : i32, i32
  }
  func.func @transform_3(%arg0: i32, %arg1: i32) -> (i32, i32, i32) {
    %c0_i32 = arith.constant 0 : i32
    %c0_i32_0 = arith.constant 0 : i32
    %c0_i32_1 = arith.constant 0 : i32
    return %arg0, %c0_i32, %c0_i32_0 : i32, i32, i32
  }
}

module attributes {stable_mosaic.version = 11 : i64} {
  func.func @_combine_kernel(%arg0: i32, %arg1: i32, %arg2: memref<1x256x128xf32, #tpu.memory_space<vmem>>, %arg3: memref<1x1x128xf32, #tpu.memory_space<vmem>>, %arg4: memref<1x256x1xf32, #tpu.memory_space<vmem>>, %arg5: memref<1x256x128xf32, #tpu.memory_space<vmem>>) attributes {dimension_semantics = [#tpu.dimension_semantics<parallel>, #tpu.dimension_semantics<parallel>], iteration_bounds = array<i64: 2, 1>, scalar_prefetch = 0 : i64, scratch_operands = 0 : i64, tpu.core_type = #tpu.core_type<tc>, window_params = [{transform_indices = @transform_0, window_bounds = array<i64: 1, 256, 128>}, {transform_indices = @transform_1, window_bounds = array<i64: 1, 1, 128>}, {transform_indices = @transform_2, window_bounds = array<i64: 1, 256, 1>}, {transform_indices = @transform_3, window_bounds = array<i64: 1, 256, 128>}]} {
    %c0 = arith.constant 0 : index
    %c0_0 = arith.constant 0 : index
    %c0_1 = arith.constant 0 : index
    %0 = vector.load %arg2[%c0, %c0_0, %c0_1] : memref<1x256x128xf32, #tpu.memory_space<vmem>>, vector<1x256x128xf32>
    %1 = vector.shape_cast %0 : vector<1x256x128xf32> to vector<256x128xf32>
    %c0_2 = arith.constant 0 : index
    %c0_3 = arith.constant 0 : index
    %c0_4 = arith.constant 0 : index
    %2 = vector.load %arg3[%c0_2, %c0_3, %c0_4] : memref<1x1x128xf32, #tpu.memory_space<vmem>>, vector<1x1x128xf32>
    %3 = vector.shape_cast %2 : vector<1x1x128xf32> to vector<1x128xf32>
    %c0_5 = arith.constant 0 : index
    %c0_6 = arith.constant 0 : index
    %c0_7 = arith.constant 0 : index
    %4 = vector.load %arg4[%c0_5, %c0_6, %c0_7] : memref<1x256x1xf32, #tpu.memory_space<vmem>>, vector<1x256x1xf32>
    %5 = vector.shape_cast %4 : vector<1x256x1xf32> to vector<256x1xf32>
    %6 = vector.broadcast %3 : vector<1x128xf32> to vector<256x128xf32>
    %7 = vector.broadcast %5 : vector<256x1xf32> to vector<256x128xf32>
    %8 = arith.mulf %6, %7 : vector<256x128xf32>
    %cst = arith.constant 1.000000e+00 : f32
    %9 = vector.broadcast %cst : f32 to vector<256x128xf32>
    %10 = arith.addf %8, %9 : vector<256x128xf32>
    %11 = arith.mulf %1, %10 : vector<256x128xf32>
    %c0_8 = arith.constant 0 : index
    %c0_9 = arith.constant 0 : index
    %c0_10 = arith.constant 0 : index
    %12 = vector.load %arg5[%c0_8, %c0_9, %c0_10] : memref<1x256x128xf32, #tpu.memory_space<vmem>>, vector<1x256x128xf32>
    %13 = vector.shape_cast %12 : vector<1x256x128xf32> to vector<256x128xf32>
    %14 = vector.shape_cast %11 : vector<256x128xf32> to vector<1x256x128xf32>
    tpu.vector_store %arg5[%c0_8, %c0_9, %c0_10], %14 {strides = array<i32>} : memref<1x256x128xf32, #tpu.memory_space<vmem>>, vector<1x256x128xf32>,
    return
  }
  func.func @transform_0(%arg0: i32, %arg1: i32) -> (i32, i32, i32) {
    %c0_i32 = arith.constant 0 : i32
    %c0_i32_0 = arith.constant 0 : i32
    return %arg0, %arg1, %c0_i32 : i32, i32, i32
  }
  func.func @transform_1(%arg0: i32, %arg1: i32) -> (i32, i32, i32) {
    %c0_i32 = arith.constant 0 : i32
    %c0_i32_0 = arith.constant 0 : i32
    %c0_i32_1 = arith.constant 0 : i32
    return %arg0, %c0_i32, %c0_i32_0 : i32, i32, i32
  }
  func.func @transform_2(%arg0: i32, %arg1: i32) -> (i32, i32, i32) {
    %c0_i32 = arith.constant 0 : i32
    %c0_i32_0 = arith.constant 0 : i32
    return %arg0, %arg1, %c0_i32 : i32, i32, i32
  }
  func.func @transform_3(%arg0: i32, %arg1: i32) -> (i32, i32, i32) {
    %c0_i32 = arith.constant 0 : i32
    %c0_i32_0 = arith.constant 0 : i32
    return %arg0, %arg1, %c0_i32 : i32, i32, i32
  }
}

module attributes {stable_mosaic.version = 11 : i64} {
  func.func @_spatial_conv_kernel(%arg0: i32, %arg1: memref<1x22x22xf32, #tpu.memory_space<vmem>>, %arg2: memref<1x22x22xf32, #tpu.memory_space<vmem>>, %arg3: memref<2x49xf32, #tpu.memory_space<smem>>, %arg4: memref<1x1xf32, #tpu.memory_space<smem>>, %arg5: memref<1x16x16xf32, #tpu.memory_space<vmem>>) attributes {dimension_semantics = [#tpu.dimension_semantics<parallel>], iteration_bounds = array<i64: 2>, scalar_prefetch = 0 : i64, scratch_operands = 0 : i64, tpu.core_type = #tpu.core_type<tc>, window_params = [{transform_indices = @transform_0, window_bounds = array<i64: 1, 22, 22>}, {transform_indices = @transform_1, window_bounds = array<i64: 1, 22, 22>}, {transform_indices = @transform_2, window_bounds = array<i64: 2, 49>}, {transform_indices = @transform_3, window_bounds = array<i64: 1, 1>}, {transform_indices = @transform_4, window_bounds = array<i64: 1, 16, 16>}]} {
    %c0 = arith.constant 0 : index
    %c0_0 = arith.constant 0 : index
    %c0_1 = arith.constant 0 : index
    %0 = vector.load %arg1[%c0, %c0_0, %c0_1] : memref<1x22x22xf32, #tpu.memory_space<vmem>>, vector<1x22x22xf32>
    %1 = vector.shape_cast %0 : vector<1x22x22xf32> to vector<22x22xf32>
    %c0_2 = arith.constant 0 : index
    %c0_3 = arith.constant 0 : index
    %c0_4 = arith.constant 0 : index
    %2 = vector.load %arg2[%c0_2, %c0_3, %c0_4] : memref<1x22x22xf32, #tpu.memory_space<vmem>>, vector<1x22x22xf32>
    %3 = vector.shape_cast %2 : vector<1x22x22xf32> to vector<22x22xf32>
    %cst = arith.constant 0.000000e+00 : f32
    %4 = vector.broadcast %cst : f32 to vector<16x16xf32>
    %5 = vector.extract_strided_slice %1 {offsets = [0, 0], sizes = [16, 16], strides = [1, 1]} : vector<22x22xf32> to vector<16x16xf32>
    %c0_5 = arith.constant 0 : index
    %c0_6 = arith.constant 0 : index
    %6 = memref.load %arg3[%c0_5, %c0_6] : memref<2x49xf32, #tpu.memory_space<smem>>
    %7 = vector.broadcast %6 : f32 to vector<16x16xf32>
    %8 = arith.mulf %5, %7 : vector<16x16xf32>
    %9 = arith.addf %4, %8 : vector<16x16xf32>
    %10 = vector.extract_strided_slice %3 {offsets = [0, 0], sizes = [16, 16], strides = [1, 1]} : vector<22x22xf32> to vector<16x16xf32>
    %c1 = arith.constant 1 : index
    %c0_7 = arith.constant 0 : index
    %11 = memref.load %arg3[%c1, %c0_7] : memref<2x49xf32, #tpu.memory_space<smem>>
    %12 = vector.broadcast %11 : f32 to vector<16x16xf32>
    %13 = arith.mulf %10, %12 : vector<16x16xf32>
    %14 = arith.addf %9, %13 : vector<16x16xf32>
    %15 = vector.extract_strided_slice %1 {offsets = [0, 1], sizes = [16, 16], strides = [1, 1]} : vector<22x22xf32> to vector<16x16xf32>
    %c0_8 = arith.constant 0 : index
    %c1_9 = arith.constant 1 : index
    %16 = memref.load %arg3[%c0_8, %c1_9] : memref<2x49xf32, #tpu.memory_space<smem>>
    %17 = vector.broadcast %16 : f32 to vector<16x16xf32>
    %18 = arith.mulf %15, %17 : vector<16x16xf32>
    %19 = arith.addf %14, %18 : vector<16x16xf32>
    %20 = vector.extract_strided_slice %3 {offsets = [0, 1], sizes = [16, 16], strides = [1, 1]} : vector<22x22xf32> to vector<16x16xf32>
    %c1_10 = arith.constant 1 : index
    %c1_11 = arith.constant 1 : index
    %21 = memref.load %arg3[%c1_10, %c1_11] : memref<2x49xf32, #tpu.memory_space<smem>>
    %22 = vector.broadcast %21 : f32 to vector<16x16xf32>
    %23 = arith.mulf %20, %22 : vector<16x16xf32>
    %24 = arith.addf %19, %23 : vector<16x16xf32>
    %25 = vector.extract_strided_slice %1 {offsets = [0, 2], sizes = [16, 16], strides = [1, 1]} : vector<22x22xf32> to vector<16x16xf32>
    %c0_12 = arith.constant 0 : index
    %c2 = arith.constant 2 : index
    %26 = memref.load %arg3[%c0_12, %c2] : memref<2x49xf32, #tpu.memory_space<smem>>
    %27 = vector.broadcast %26 : f32 to vector<16x16xf32>
    %28 = arith.mulf %25, %27 : vector<16x16xf32>
    %29 = arith.addf %24, %28 : vector<16x16xf32>
    %30 = vector.extract_strided_slice %3 {offsets = [0, 2], sizes = [16, 16], strides = [1, 1]} : vector<22x22xf32> to vector<16x16xf32>
    %c1_13 = arith.constant 1 : index
    %c2_14 = arith.constant 2 : index
    %31 = memref.load %arg3[%c1_13, %c2_14] : memref<2x49xf32, #tpu.memory_space<smem>>
    %32 = vector.broadcast %31 : f32 to vector<16x16xf32>
    %33 = arith.mulf %30, %32 : vector<16x16xf32>
    %34 = arith.addf %29, %33 : vector<16x16xf32>
    %35 = vector.extract_strided_slice %1 {offsets = [0, 3], sizes = [16, 16], strides = [1, 1]} : vector<22x22xf32> to vector<16x16xf32>
    %c0_15 = arith.constant 0 : index
    %c3 = arith.constant 3 : index
    %36 = memref.load %arg3[%c0_15, %c3] : memref<2x49xf32, #tpu.memory_space<smem>>
    %37 = vector.broadcast %36 : f32 to vector<16x16xf32>
    %38 = arith.mulf %35, %37 : vector<16x16xf32>
    %39 = arith.addf %34, %38 : vector<16x16xf32>
    %40 = vector.extract_strided_slice %3 {offsets = [0, 3], sizes = [16, 16], strides = [1, 1]} : vector<22x22xf32> to vector<16x16xf32>
    %c1_16 = arith.constant 1 : index
    %c3_17 = arith.constant 3 : index
    %41 = memref.load %arg3[%c1_16, %c3_17] : memref<2x49xf32, #tpu.memory_space<smem>>
    %42 = vector.broadcast %41 : f32 to vector<16x16xf32>
    %43 = arith.mulf %40, %42 : vector<16x16xf32>
    %44 = arith.addf %39, %43 : vector<16x16xf32>
    %45 = vector.extract_strided_slice %1 {offsets = [0, 4], sizes = [16, 16], strides = [1, 1]} : vector<22x22xf32> to vector<16x16xf32>
    %c0_18 = arith.constant 0 : index
    %c4 = arith.constant 4 : index
    %46 = memref.load %arg3[%c0_18, %c4] : memref<2x49xf32, #tpu.memory_space<smem>>
    %47 = vector.broadcast %46 : f32 to vector<16x16xf32>
    %48 = arith.mulf %45, %47 : vector<16x16xf32>
    %49 = arith.addf %44, %48 : vector<16x16xf32>
    %50 = vector.extract_strided_slice %3 {offsets = [0, 4], sizes = [16, 16], strides = [1, 1]} : vector<22x22xf32> to vector<16x16xf32>
    %c1_19 = arith.constant 1 : index
    %c4_20 = arith.constant 4 : index
    %51 = memref.load %arg3[%c1_19, %c4_20] : memref<2x49xf32, #tpu.memory_space<smem>>
    %52 = vector.broadcast %51 : f32 to vector<16x16xf32>
    %53 = arith.mulf %50, %52 : vector<16x16xf32>
    %54 = arith.addf %49, %53 : vector<16x16xf32>
    %55 = vector.extract_strided_slice %1 {offsets = [0, 5], sizes = [16, 16], strides = [1, 1]} : vector<22x22xf32> to vector<16x16xf32>
    %c0_21 = arith.constant 0 : index
    %c5 = arith.constant 5 : index
    %56 = memref.load %arg3[%c0_21, %c5] : memref<2x49xf32, #tpu.memory_space<smem>>
    %57 = vector.broadcast %56 : f32 to vector<16x16xf32>
    %58 = arith.mulf %55, %57 : vector<16x16xf32>
    %59 = arith.addf %54, %58 : vector<16x16xf32>
    %60 = vector.extract_strided_slice %3 {offsets = [0, 5], sizes = [16, 16], strides = [1, 1]} : vector<22x22xf32> to vector<16x16xf32>
    %c1_22 = arith.constant 1 : index
    %c5_23 = arith.constant 5 : index
    %61 = memref.load %arg3[%c1_22, %c5_23] : memref<2x49xf32, #tpu.memory_space<smem>>
    %62 = vector.broadcast %61 : f32 to vector<16x16xf32>
    %63 = arith.mulf %60, %62 : vector<16x16xf32>
    %64 = arith.addf %59, %63 : vector<16x16xf32>
    %65 = vector.extract_strided_slice %1 {offsets = [0, 6], sizes = [16, 16], strides = [1, 1]} : vector<22x22xf32> to vector<16x16xf32>
    %c0_24 = arith.constant 0 : index
    %c6 = arith.constant 6 : index
    %66 = memref.load %arg3[%c0_24, %c6] : memref<2x49xf32, #tpu.memory_space<smem>>
    %67 = vector.broadcast %66 : f32 to vector<16x16xf32>
    %68 = arith.mulf %65, %67 : vector<16x16xf32>
    %69 = arith.addf %64, %68 : vector<16x16xf32>
    %70 = vector.extract_strided_slice %3 {offsets = [0, 6], sizes = [16, 16], strides = [1, 1]} : vector<22x22xf32> to vector<16x16xf32>
    %c1_25 = arith.constant 1 : index
    %c6_26 = arith.constant 6 : index
    %71 = memref.load %arg3[%c1_25, %c6_26] : memref<2x49xf32, #tpu.memory_space<smem>>
    %72 = vector.broadcast %71 : f32 to vector<16x16xf32>
    %73 = arith.mulf %70, %72 : vector<16x16xf32>
    %74 = arith.addf %69, %73 : vector<16x16xf32>
    %75 = vector.extract_strided_slice %1 {offsets = [1, 0], sizes = [16, 16], strides = [1, 1]} : vector<22x22xf32> to vector<16x16xf32>
    %c0_27 = arith.constant 0 : index
    %c7 = arith.constant 7 : index
    %76 = memref.load %arg3[%c0_27, %c7] : memref<2x49xf32, #tpu.memory_space<smem>>
    %77 = vector.broadcast %76 : f32 to vector<16x16xf32>
    %78 = arith.mulf %75, %77 : vector<16x16xf32>
    %79 = arith.addf %74, %78 : vector<16x16xf32>
    %80 = vector.extract_strided_slice %3 {offsets = [1, 0], sizes = [16, 16], strides = [1, 1]} : vector<22x22xf32> to vector<16x16xf32>
    %c1_28 = arith.constant 1 : index
    %c7_29 = arith.constant 7 : index
    %81 = memref.load %arg3[%c1_28, %c7_29] : memref<2x49xf32, #tpu.memory_space<smem>>
    %82 = vector.broadcast %81 : f32 to vector<16x16xf32>
    %83 = arith.mulf %80, %82 : vector<16x16xf32>
    %84 = arith.addf %79, %83 : vector<16x16xf32>
    %85 = vector.extract_strided_slice %1 {offsets = [1, 1], sizes = [16, 16], strides = [1, 1]} : vector<22x22xf32> to vector<16x16xf32>
    %c0_30 = arith.constant 0 : index
    %c8 = arith.constant 8 : index
    %86 = memref.load %arg3[%c0_30, %c8] : memref<2x49xf32, #tpu.memory_space<smem>>
    %87 = vector.broadcast %86 : f32 to vector<16x16xf32>
    %88 = arith.mulf %85, %87 : vector<16x16xf32>
    %89 = arith.addf %84, %88 : vector<16x16xf32>
    %90 = vector.extract_strided_slice %3 {offsets = [1, 1], sizes = [16, 16], strides = [1, 1]} : vector<22x22xf32> to vector<16x16xf32>
    %c1_31 = arith.constant 1 : index
    %c8_32 = arith.constant 8 : index
    %91 = memref.load %arg3[%c1_31, %c8_32] : memref<2x49xf32, #tpu.memory_space<smem>>
    %92 = vector.broadcast %91 : f32 to vector<16x16xf32>
    %93 = arith.mulf %90, %92 : vector<16x16xf32>
    %94 = arith.addf %89, %93 : vector<16x16xf32>
    %95 = vector.extract_strided_slice %1 {offsets = [1, 2], sizes = [16, 16], strides = [1, 1]} : vector<22x22xf32> to vector<16x16xf32>
    %c0_33 = arith.constant 0 : index
    %c9 = arith.constant 9 : index
    %96 = memref.load %arg3[%c0_33, %c9] : memref<2x49xf32, #tpu.memory_space<smem>>
    %97 = vector.broadcast %96 : f32 to vector<16x16xf32>
    %98 = arith.mulf %95, %97 : vector<16x16xf32>
    %99 = arith.addf %94, %98 : vector<16x16xf32>
    %100 = vector.extract_strided_slice %3 {offsets = [1, 2], sizes = [16, 16], strides = [1, 1]} : vector<22x22xf32> to vector<16x16xf32>
    %c1_34 = arith.constant 1 : index
    %c9_35 = arith.constant 9 : index
    %101 = memref.load %arg3[%c1_34, %c9_35] : memref<2x49xf32, #tpu.memory_space<smem>>
    %102 = vector.broadcast %101 : f32 to vector<16x16xf32>
    %103 = arith.mulf %100, %102 : vector<16x16xf32>
    %104 = arith.addf %99, %103 : vector<16x16xf32>
    %105 = vector.extract_strided_slice %1 {offsets = [1, 3], sizes = [16, 16], strides = [1, 1]} : vector<22x22xf32> to vector<16x16xf32>
    %c0_36 = arith.constant 0 : index
    %c10 = arith.constant 10 : index
    %106 = memref.load %arg3[%c0_36, %c10] : memref<2x49xf32, #tpu.memory_space<smem>>
    %107 = vector.broadcast %106 : f32 to vector<16x16xf32>
    %108 = arith.mulf %105, %107 : vector<16x16xf32>
    %109 = arith.addf %104, %108 : vector<16x16xf32>
    %110 = vector.extract_strided_slice %3 {offsets = [1, 3], sizes = [16, 16], strides = [1, 1]} : vector<22x22xf32> to vector<16x16xf32>
    %c1_37 = arith.constant 1 : index
    %c10_38 = arith.constant 10 : index
    %111 = memref.load %arg3[%c1_37, %c10_38] : memref<2x49xf32, #tpu.memory_space<smem>>
    %112 = vector.broadcast %111 : f32 to vector<16x16xf32>
    %113 = arith.mulf %110, %112 : vector<16x16xf32>
    %114 = arith.addf %109, %113 : vector<16x16xf32>
    %115 = vector.extract_strided_slice %1 {offsets = [1, 4], sizes = [16, 16], strides = [1, 1]} : vector<22x22xf32> to vector<16x16xf32>
    %c0_39 = arith.constant 0 : index
    %c11 = arith.constant 11 : index
    %116 = memref.load %arg3[%c0_39, %c11] : memref<2x49xf32, #tpu.memory_space<smem>>
    %117 = vector.broadcast %116 : f32 to vector<16x16xf32>
    %118 = arith.mulf %115, %117 : vector<16x16xf32>
    %119 = arith.addf %114, %118 : vector<16x16xf32>
    %120 = vector.extract_strided_slice %3 {offsets = [1, 4], sizes = [16, 16], strides = [1, 1]} : vector<22x22xf32> to vector<16x16xf32>
    %c1_40 = arith.constant 1 : index
    %c11_41 = arith.constant 11 : index
    %121 = memref.load %arg3[%c1_40, %c11_41] : memref<2x49xf32, #tpu.memory_space<smem>>
    %122 = vector.broadcast %121 : f32 to vector<16x16xf32>
    %123 = arith.mulf %120, %122 : vector<16x16xf32>
    %124 = arith.addf %119, %123 : vector<16x16xf32>
    %125 = vector.extract_strided_slice %1 {offsets = [1, 5], sizes = [16, 16], strides = [1, 1]} : vector<22x22xf32> to vector<16x16xf32>
    %c0_42 = arith.constant 0 : index
    %c12 = arith.constant 12 : index
    %126 = memref.load %arg3[%c0_42, %c12] : memref<2x49xf32, #tpu.memory_space<smem>>
    %127 = vector.broadcast %126 : f32 to vector<16x16xf32>
    %128 = arith.mulf %125, %127 : vector<16x16xf32>
    %129 = arith.addf %124, %128 : vector<16x16xf32>
    %130 = vector.extract_strided_slice %3 {offsets = [1, 5], sizes = [16, 16], strides = [1, 1]} : vector<22x22xf32> to vector<16x16xf32>
    %c1_43 = arith.constant 1 : index
    %c12_44 = arith.constant 12 : index
    %131 = memref.load %arg3[%c1_43, %c12_44] : memref<2x49xf32, #tpu.memory_space<smem>>
    %132 = vector.broadcast %131 : f32 to vector<16x16xf32>
    %133 = arith.mulf %130, %132 : vector<16x16xf32>
    %134 = arith.addf %129, %133 : vector<16x16xf32>
    %135 = vector.extract_strided_slice %1 {offsets = [1, 6], sizes = [16, 16], strides = [1, 1]} : vector<22x22xf32> to vector<16x16xf32>
    %c0_45 = arith.constant 0 : index
    %c13 = arith.constant 13 : index
    %136 = memref.load %arg3[%c0_45, %c13] : memref<2x49xf32, #tpu.memory_space<smem>>
    %137 = vector.broadcast %136 : f32 to vector<16x16xf32>
    %138 = arith.mulf %135, %137 : vector<16x16xf32>
    %139 = arith.addf %134, %138 : vector<16x16xf32>
    %140 = vector.extract_strided_slice %3 {offsets = [1, 6], sizes = [16, 16], strides = [1, 1]} : vector<22x22xf32> to vector<16x16xf32>
    %c1_46 = arith.constant 1 : index
    %c13_47 = arith.constant 13 : index
    %141 = memref.load %arg3[%c1_46, %c13_47] : memref<2x49xf32, #tpu.memory_space<smem>>
    %142 = vector.broadcast %141 : f32 to vector<16x16xf32>
    %143 = arith.mulf %140, %142 : vector<16x16xf32>
    %144 = arith.addf %139, %143 : vector<16x16xf32>
    %145 = vector.extract_strided_slice %1 {offsets = [2, 0], sizes = [16, 16], strides = [1, 1]} : vector<22x22xf32> to vector<16x16xf32>
    %c0_48 = arith.constant 0 : index
    %c14 = arith.constant 14 : index
    %146 = memref.load %arg3[%c0_48, %c14] : memref<2x49xf32, #tpu.memory_space<smem>>
    %147 = vector.broadcast %146 : f32 to vector<16x16xf32>
    %148 = arith.mulf %145, %147 : vector<16x16xf32>
    %149 = arith.addf %144, %148 : vector<16x16xf32>
    %150 = vector.extract_strided_slice %3 {offsets = [2, 0], sizes = [16, 16], strides = [1, 1]} : vector<22x22xf32> to vector<16x16xf32>
    %c1_49 = arith.constant 1 : index
    %c14_50 = arith.constant 14 : index
    %151 = memref.load %arg3[%c1_49, %c14_50] : memref<2x49xf32, #tpu.memory_space<smem>>
    %152 = vector.broadcast %151 : f32 to vector<16x16xf32>
    %153 = arith.mulf %150, %152 : vector<16x16xf32>
    %154 = arith.addf %149, %153 : vector<16x16xf32>
    %155 = vector.extract_strided_slice %1 {offsets = [2, 1], sizes = [16, 16], strides = [1, 1]} : vector<22x22xf32> to vector<16x16xf32>
    %c0_51 = arith.constant 0 : index
    %c15 = arith.constant 15 : index
    %156 = memref.load %arg3[%c0_51, %c15] : memref<2x49xf32, #tpu.memory_space<smem>>
    %157 = vector.broadcast %156 : f32 to vector<16x16xf32>
    %158 = arith.mulf %155, %157 : vector<16x16xf32>
    %159 = arith.addf %154, %158 : vector<16x16xf32>
    %160 = vector.extract_strided_slice %3 {offsets = [2, 1], sizes = [16, 16], strides = [1, 1]} : vector<22x22xf32> to vector<16x16xf32>
    %c1_52 = arith.constant 1 : index
    %c15_53 = arith.constant 15 : index
    %161 = memref.load %arg3[%c1_52, %c15_53] : memref<2x49xf32, #tpu.memory_space<smem>>
    %162 = vector.broadcast %161 : f32 to vector<16x16xf32>
    %163 = arith.mulf %160, %162 : vector<16x16xf32>
    %164 = arith.addf %159, %163 : vector<16x16xf32>
    %165 = vector.extract_strided_slice %1 {offsets = [2, 2], sizes = [16, 16], strides = [1, 1]} : vector<22x22xf32> to vector<16x16xf32>
    %c0_54 = arith.constant 0 : index
    %c16 = arith.constant 16 : index
    %166 = memref.load %arg3[%c0_54, %c16] : memref<2x49xf32, #tpu.memory_space<smem>>
    %167 = vector.broadcast %166 : f32 to vector<16x16xf32>
    %168 = arith.mulf %165, %167 : vector<16x16xf32>
    %169 = arith.addf %164, %168 : vector<16x16xf32>
    %170 = vector.extract_strided_slice %3 {offsets = [2, 2], sizes = [16, 16], strides = [1, 1]} : vector<22x22xf32> to vector<16x16xf32>
    %c1_55 = arith.constant 1 : index
    %c16_56 = arith.constant 16 : index
    %171 = memref.load %arg3[%c1_55, %c16_56] : memref<2x49xf32, #tpu.memory_space<smem>>
    %172 = vector.broadcast %171 : f32 to vector<16x16xf32>
    %173 = arith.mulf %170, %172 : vector<16x16xf32>
    %174 = arith.addf %169, %173 : vector<16x16xf32>
    %175 = vector.extract_strided_slice %1 {offsets = [2, 3], sizes = [16, 16], strides = [1, 1]} : vector<22x22xf32> to vector<16x16xf32>
    %c0_57 = arith.constant 0 : index
    %c17 = arith.constant 17 : index
    %176 = memref.load %arg3[%c0_57, %c17] : memref<2x49xf32, #tpu.memory_space<smem>>
    %177 = vector.broadcast %176 : f32 to vector<16x16xf32>
    %178 = arith.mulf %175, %177 : vector<16x16xf32>
    %179 = arith.addf %174, %178 : vector<16x16xf32>
    %180 = vector.extract_strided_slice %3 {offsets = [2, 3], sizes = [16, 16], strides = [1, 1]} : vector<22x22xf32> to vector<16x16xf32>
    %c1_58 = arith.constant 1 : index
    %c17_59 = arith.constant 17 : index
    %181 = memref.load %arg3[%c1_58, %c17_59] : memref<2x49xf32, #tpu.memory_space<smem>>
    %182 = vector.broadcast %181 : f32 to vector<16x16xf32>
    %183 = arith.mulf %180, %182 : vector<16x16xf32>
    %184 = arith.addf %179, %183 : vector<16x16xf32>
    %185 = vector.extract_strided_slice %1 {offsets = [2, 4], sizes = [16, 16], strides = [1, 1]} : vector<22x22xf32> to vector<16x16xf32>
    %c0_60 = arith.constant 0 : index
    %c18 = arith.constant 18 : index
    %186 = memref.load %arg3[%c0_60, %c18] : memref<2x49xf32, #tpu.memory_space<smem>>
    %187 = vector.broadcast %186 : f32 to vector<16x16xf32>
    %188 = arith.mulf %185, %187 : vector<16x16xf32>
    %189 = arith.addf %184, %188 : vector<16x16xf32>
    %190 = vector.extract_strided_slice %3 {offsets = [2, 4], sizes = [16, 16], strides = [1, 1]} : vector<22x22xf32> to vector<16x16xf32>
    %c1_61 = arith.constant 1 : index
    %c18_62 = arith.constant 18 : index
    %191 = memref.load %arg3[%c1_61, %c18_62] : memref<2x49xf32, #tpu.memory_space<smem>>
    %192 = vector.broadcast %191 : f32 to vector<16x16xf32>
    %193 = arith.mulf %190, %192 : vector<16x16xf32>
    %194 = arith.addf %189, %193 : vector<16x16xf32>
    %195 = vector.extract_strided_slice %1 {offsets = [2, 5], sizes = [16, 16], strides = [1, 1]} : vector<22x22xf32> to vector<16x16xf32>
    %c0_63 = arith.constant 0 : index
    %c19 = arith.constant 19 : index
    %196 = memref.load %arg3[%c0_63, %c19] : memref<2x49xf32, #tpu.memory_space<smem>>
    %197 = vector.broadcast %196 : f32 to vector<16x16xf32>
    %198 = arith.mulf %195, %197 : vector<16x16xf32>
    %199 = arith.addf %194, %198 : vector<16x16xf32>
    %200 = vector.extract_strided_slice %3 {offsets = [2, 5], sizes = [16, 16], strides = [1, 1]} : vector<22x22xf32> to vector<16x16xf32>
    %c1_64 = arith.constant 1 : index
    %c19_65 = arith.constant 19 : index
    %201 = memref.load %arg3[%c1_64, %c19_65] : memref<2x49xf32, #tpu.memory_space<smem>>
    %202 = vector.broadcast %201 : f32 to vector<16x16xf32>
    %203 = arith.mulf %200, %202 : vector<16x16xf32>
    %204 = arith.addf %199, %203 : vector<16x16xf32>
    %205 = vector.extract_strided_slice %1 {offsets = [2, 6], sizes = [16, 16], strides = [1, 1]} : vector<22x22xf32> to vector<16x16xf32>
    %c0_66 = arith.constant 0 : index
    %c20 = arith.constant 20 : index
    %206 = memref.load %arg3[%c0_66, %c20] : memref<2x49xf32, #tpu.memory_space<smem>>
    %207 = vector.broadcast %206 : f32 to vector<16x16xf32>
    %208 = arith.mulf %205, %207 : vector<16x16xf32>
    %209 = arith.addf %204, %208 : vector<16x16xf32>
    %210 = vector.extract_strided_slice %3 {offsets = [2, 6], sizes = [16, 16], strides = [1, 1]} : vector<22x22xf32> to vector<16x16xf32>
    %c1_67 = arith.constant 1 : index
    %c20_68 = arith.constant 20 : index
    %211 = memref.load %arg3[%c1_67, %c20_68] : memref<2x49xf32, #tpu.memory_space<smem>>
    %212 = vector.broadcast %211 : f32 to vector<16x16xf32>
    %213 = arith.mulf %210, %212 : vector<16x16xf32>
    %214 = arith.addf %209, %213 : vector<16x16xf32>
    %215 = vector.extract_strided_slice %1 {offsets = [3, 0], sizes = [16, 16], strides = [1, 1]} : vector<22x22xf32> to vector<16x16xf32>
    %c0_69 = arith.constant 0 : index
    %c21 = arith.constant 21 : index
    %216 = memref.load %arg3[%c0_69, %c21] : memref<2x49xf32, #tpu.memory_space<smem>>
    %217 = vector.broadcast %216 : f32 to vector<16x16xf32>
    %218 = arith.mulf %215, %217 : vector<16x16xf32>
    %219 = arith.addf %214, %218 : vector<16x16xf32>
    %220 = vector.extract_strided_slice %3 {offsets = [3, 0], sizes = [16, 16], strides = [1, 1]} : vector<22x22xf32> to vector<16x16xf32>
    %c1_70 = arith.constant 1 : index
    %c21_71 = arith.constant 21 : index
    %221 = memref.load %arg3[%c1_70, %c21_71] : memref<2x49xf32, #tpu.memory_space<smem>>
    %222 = vector.broadcast %221 : f32 to vector<16x16xf32>
    %223 = arith.mulf %220, %222 : vector<16x16xf32>
    %224 = arith.addf %219, %223 : vector<16x16xf32>
    %225 = vector.extract_strided_slice %1 {offsets = [3, 1], sizes = [16, 16], strides = [1, 1]} : vector<22x22xf32> to vector<16x16xf32>
    %c0_72 = arith.constant 0 : index
    %c22 = arith.constant 22 : index
    %226 = memref.load %arg3[%c0_72, %c22] : memref<2x49xf32, #tpu.memory_space<smem>>
    %227 = vector.broadcast %226 : f32 to vector<16x16xf32>
    %228 = arith.mulf %225, %227 : vector<16x16xf32>
    %229 = arith.addf %224, %228 : vector<16x16xf32>
    %230 = vector.extract_strided_slice %3 {offsets = [3, 1], sizes = [16, 16], strides = [1, 1]} : vector<22x22xf32> to vector<16x16xf32>
    %c1_73 = arith.constant 1 : index
    %c22_74 = arith.constant 22 : index
    %231 = memref.load %arg3[%c1_73, %c22_74] : memref<2x49xf32, #tpu.memory_space<smem>>
    %232 = vector.broadcast %231 : f32 to vector<16x16xf32>
    %233 = arith.mulf %230, %232 : vector<16x16xf32>
    %234 = arith.addf %229, %233 : vector<16x16xf32>
    %235 = vector.extract_strided_slice %1 {offsets = [3, 2], sizes = [16, 16], strides = [1, 1]} : vector<22x22xf32> to vector<16x16xf32>
    %c0_75 = arith.constant 0 : index
    %c23 = arith.constant 23 : index
    %236 = memref.load %arg3[%c0_75, %c23] : memref<2x49xf32, #tpu.memory_space<smem>>
    %237 = vector.broadcast %236 : f32 to vector<16x16xf32>
    %238 = arith.mulf %235, %237 : vector<16x16xf32>
    %239 = arith.addf %234, %238 : vector<16x16xf32>
    %240 = vector.extract_strided_slice %3 {offsets = [3, 2], sizes = [16, 16], strides = [1, 1]} : vector<22x22xf32> to vector<16x16xf32>
    %c1_76 = arith.constant 1 : index
    %c23_77 = arith.constant 23 : index
    %241 = memref.load %arg3[%c1_76, %c23_77] : memref<2x49xf32, #tpu.memory_space<smem>>
    %242 = vector.broadcast %241 : f32 to vector<16x16xf32>
    %243 = arith.mulf %240, %242 : vector<16x16xf32>
    %244 = arith.addf %239, %243 : vector<16x16xf32>
    %245 = vector.extract_strided_slice %1 {offsets = [3, 3], sizes = [16, 16], strides = [1, 1]} : vector<22x22xf32> to vector<16x16xf32>
    %c0_78 = arith.constant 0 : index
    %c24 = arith.constant 24 : index
    %246 = memref.load %arg3[%c0_78, %c24] : memref<2x49xf32, #tpu.memory_space<smem>>
    %247 = vector.broadcast %246 : f32 to vector<16x16xf32>
    %248 = arith.mulf %245, %247 : vector<16x16xf32>
    %249 = arith.addf %244, %248 : vector<16x16xf32>
    %250 = vector.extract_strided_slice %3 {offsets = [3, 3], sizes = [16, 16], strides = [1, 1]} : vector<22x22xf32> to vector<16x16xf32>
    %c1_79 = arith.constant 1 : index
    %c24_80 = arith.constant 24 : index
    %251 = memref.load %arg3[%c1_79, %c24_80] : memref<2x49xf32, #tpu.memory_space<smem>>
    %252 = vector.broadcast %251 : f32 to vector<16x16xf32>
    %253 = arith.mulf %250, %252 : vector<16x16xf32>
    %254 = arith.addf %249, %253 : vector<16x16xf32>
    %255 = vector.extract_strided_slice %1 {offsets = [3, 4], sizes = [16, 16], strides = [1, 1]} : vector<22x22xf32> to vector<16x16xf32>
    %c0_81 = arith.constant 0 : index
    %c25 = arith.constant 25 : index
    %256 = memref.load %arg3[%c0_81, %c25] : memref<2x49xf32, #tpu.memory_space<smem>>
    %257 = vector.broadcast %256 : f32 to vector<16x16xf32>
    %258 = arith.mulf %255, %257 : vector<16x16xf32>
    %259 = arith.addf %254, %258 : vector<16x16xf32>
    %260 = vector.extract_strided_slice %3 {offsets = [3, 4], sizes = [16, 16], strides = [1, 1]} : vector<22x22xf32> to vector<16x16xf32>
    %c1_82 = arith.constant 1 : index
    %c25_83 = arith.constant 25 : index
    %261 = memref.load %arg3[%c1_82, %c25_83] : memref<2x49xf32, #tpu.memory_space<smem>>
    %262 = vector.broadcast %261 : f32 to vector<16x16xf32>
    %263 = arith.mulf %260, %262 : vector<16x16xf32>
    %264 = arith.addf %259, %263 : vector<16x16xf32>
    %265 = vector.extract_strided_slice %1 {offsets = [3, 5], sizes = [16, 16], strides = [1, 1]} : vector<22x22xf32> to vector<16x16xf32>
    %c0_84 = arith.constant 0 : index
    %c26 = arith.constant 26 : index
    %266 = memref.load %arg3[%c0_84, %c26] : memref<2x49xf32, #tpu.memory_space<smem>>
    %267 = vector.broadcast %266 : f32 to vector<16x16xf32>
    %268 = arith.mulf %265, %267 : vector<16x16xf32>
    %269 = arith.addf %264, %268 : vector<16x16xf32>
    %270 = vector.extract_strided_slice %3 {offsets = [3, 5], sizes = [16, 16], strides = [1, 1]} : vector<22x22xf32> to vector<16x16xf32>
    %c1_85 = arith.constant 1 : index
    %c26_86 = arith.constant 26 : index
    %271 = memref.load %arg3[%c1_85, %c26_86] : memref<2x49xf32, #tpu.memory_space<smem>>
    %272 = vector.broadcast %271 : f32 to vector<16x16xf32>
    %273 = arith.mulf %270, %272 : vector<16x16xf32>
    %274 = arith.addf %269, %273 : vector<16x16xf32>
    %275 = vector.extract_strided_slice %1 {offsets = [3, 6], sizes = [16, 16], strides = [1, 1]} : vector<22x22xf32> to vector<16x16xf32>
    %c0_87 = arith.constant 0 : index
    %c27 = arith.constant 27 : index
    %276 = memref.load %arg3[%c0_87, %c27] : memref<2x49xf32, #tpu.memory_space<smem>>
    %277 = vector.broadcast %276 : f32 to vector<16x16xf32>
    %278 = arith.mulf %275, %277 : vector<16x16xf32>
    %279 = arith.addf %274, %278 : vector<16x16xf32>
    %280 = vector.extract_strided_slice %3 {offsets = [3, 6], sizes = [16, 16], strides = [1, 1]} : vector<22x22xf32> to vector<16x16xf32>
    %c1_88 = arith.constant 1 : index
    %c27_89 = arith.constant 27 : index
    %281 = memref.load %arg3[%c1_88, %c27_89] : memref<2x49xf32, #tpu.memory_space<smem>>
    %282 = vector.broadcast %281 : f32 to vector<16x16xf32>
    %283 = arith.mulf %280, %282 : vector<16x16xf32>
    %284 = arith.addf %279, %283 : vector<16x16xf32>
    %285 = vector.extract_strided_slice %1 {offsets = [4, 0], sizes = [16, 16], strides = [1, 1]} : vector<22x22xf32> to vector<16x16xf32>
    %c0_90 = arith.constant 0 : index
    %c28 = arith.constant 28 : index
    %286 = memref.load %arg3[%c0_90, %c28] : memref<2x49xf32, #tpu.memory_space<smem>>
    %287 = vector.broadcast %286 : f32 to vector<16x16xf32>
    %288 = arith.mulf %285, %287 : vector<16x16xf32>
    %289 = arith.addf %284, %288 : vector<16x16xf32>
    %290 = vector.extract_strided_slice %3 {offsets = [4, 0], sizes = [16, 16], strides = [1, 1]} : vector<22x22xf32> to vector<16x16xf32>
    %c1_91 = arith.constant 1 : index
    %c28_92 = arith.constant 28 : index
    %291 = memref.load %arg3[%c1_91, %c28_92] : memref<2x49xf32, #tpu.memory_space<smem>>
    %292 = vector.broadcast %291 : f32 to vector<16x16xf32>
    %293 = arith.mulf %290, %292 : vector<16x16xf32>
    %294 = arith.addf %289, %293 : vector<16x16xf32>
    %295 = vector.extract_strided_slice %1 {offsets = [4, 1], sizes = [16, 16], strides = [1, 1]} : vector<22x22xf32> to vector<16x16xf32>
    %c0_93 = arith.constant 0 : index
    %c29 = arith.constant 29 : index
    %296 = memref.load %arg3[%c0_93, %c29] : memref<2x49xf32, #tpu.memory_space<smem>>
    %297 = vector.broadcast %296 : f32 to vector<16x16xf32>
    %298 = arith.mulf %295, %297 : vector<16x16xf32>
    %299 = arith.addf %294, %298 : vector<16x16xf32>
    %300 = vector.extract_strided_slice %3 {offsets = [4, 1], sizes = [16, 16], strides = [1, 1]} : vector<22x22xf32> to vector<16x16xf32>
    %c1_94 = arith.constant 1 : index
    %c29_95 = arith.constant 29 : index
    %301 = memref.load %arg3[%c1_94, %c29_95] : memref<2x49xf32, #tpu.memory_space<smem>>
    %302 = vector.broadcast %301 : f32 to vector<16x16xf32>
    %303 = arith.mulf %300, %302 : vector<16x16xf32>
    %304 = arith.addf %299, %303 : vector<16x16xf32>
    %305 = vector.extract_strided_slice %1 {offsets = [4, 2], sizes = [16, 16], strides = [1, 1]} : vector<22x22xf32> to vector<16x16xf32>
    %c0_96 = arith.constant 0 : index
    %c30 = arith.constant 30 : index
    %306 = memref.load %arg3[%c0_96, %c30] : memref<2x49xf32, #tpu.memory_space<smem>>
    %307 = vector.broadcast %306 : f32 to vector<16x16xf32>
    %308 = arith.mulf %305, %307 : vector<16x16xf32>
    %309 = arith.addf %304, %308 : vector<16x16xf32>
    %310 = vector.extract_strided_slice %3 {offsets = [4, 2], sizes = [16, 16], strides = [1, 1]} : vector<22x22xf32> to vector<16x16xf32>
    %c1_97 = arith.constant 1 : index
    %c30_98 = arith.constant 30 : index
    %311 = memref.load %arg3[%c1_97, %c30_98] : memref<2x49xf32, #tpu.memory_space<smem>>
    %312 = vector.broadcast %311 : f32 to vector<16x16xf32>
    %313 = arith.mulf %310, %312 : vector<16x16xf32>
    %314 = arith.addf %309, %313 : vector<16x16xf32>
    %315 = vector.extract_strided_slice %1 {offsets = [4, 3], sizes = [16, 16], strides = [1, 1]} : vector<22x22xf32> to vector<16x16xf32>
    %c0_99 = arith.constant 0 : index
    %c31 = arith.constant 31 : index
    %316 = memref.load %arg3[%c0_99, %c31] : memref<2x49xf32, #tpu.memory_space<smem>>
    %317 = vector.broadcast %316 : f32 to vector<16x16xf32>
    %318 = arith.mulf %315, %317 : vector<16x16xf32>
    %319 = arith.addf %314, %318 : vector<16x16xf32>
    %320 = vector.extract_strided_slice %3 {offsets = [4, 3], sizes = [16, 16], strides = [1, 1]} : vector<22x22xf32> to vector<16x16xf32>
    %c1_100 = arith.constant 1 : index
    %c31_101 = arith.constant 31 : index
    %321 = memref.load %arg3[%c1_100, %c31_101] : memref<2x49xf32, #tpu.memory_space<smem>>
    %322 = vector.broadcast %321 : f32 to vector<16x16xf32>
    %323 = arith.mulf %320, %322 : vector<16x16xf32>
    %324 = arith.addf %319, %323 : vector<16x16xf32>
    %325 = vector.extract_strided_slice %1 {offsets = [4, 4], sizes = [16, 16], strides = [1, 1]} : vector<22x22xf32> to vector<16x16xf32>
    %c0_102 = arith.constant 0 : index
    %c32 = arith.constant 32 : index
    %326 = memref.load %arg3[%c0_102, %c32] : memref<2x49xf32, #tpu.memory_space<smem>>
    %327 = vector.broadcast %326 : f32 to vector<16x16xf32>
    %328 = arith.mulf %325, %327 : vector<16x16xf32>
    %329 = arith.addf %324, %328 : vector<16x16xf32>
    %330 = vector.extract_strided_slice %3 {offsets = [4, 4], sizes = [16, 16], strides = [1, 1]} : vector<22x22xf32> to vector<16x16xf32>
    %c1_103 = arith.constant 1 : index
    %c32_104 = arith.constant 32 : index
    %331 = memref.load %arg3[%c1_103, %c32_104] : memref<2x49xf32, #tpu.memory_space<smem>>
    %332 = vector.broadcast %331 : f32 to vector<16x16xf32>
    %333 = arith.mulf %330, %332 : vector<16x16xf32>
    %334 = arith.addf %329, %333 : vector<16x16xf32>
    %335 = vector.extract_strided_slice %1 {offsets = [4, 5], sizes = [16, 16], strides = [1, 1]} : vector<22x22xf32> to vector<16x16xf32>
    %c0_105 = arith.constant 0 : index
    %c33 = arith.constant 33 : index
    %336 = memref.load %arg3[%c0_105, %c33] : memref<2x49xf32, #tpu.memory_space<smem>>
    %337 = vector.broadcast %336 : f32 to vector<16x16xf32>
    %338 = arith.mulf %335, %337 : vector<16x16xf32>
    %339 = arith.addf %334, %338 : vector<16x16xf32>
    %340 = vector.extract_strided_slice %3 {offsets = [4, 5], sizes = [16, 16], strides = [1, 1]} : vector<22x22xf32> to vector<16x16xf32>
    %c1_106 = arith.constant 1 : index
    %c33_107 = arith.constant 33 : index
    %341 = memref.load %arg3[%c1_106, %c33_107] : memref<2x49xf32, #tpu.memory_space<smem>>
    %342 = vector.broadcast %341 : f32 to vector<16x16xf32>
    %343 = arith.mulf %340, %342 : vector<16x16xf32>
    %344 = arith.addf %339, %343 : vector<16x16xf32>
    %345 = vector.extract_strided_slice %1 {offsets = [4, 6], sizes = [16, 16], strides = [1, 1]} : vector<22x22xf32> to vector<16x16xf32>
    %c0_108 = arith.constant 0 : index
    %c34 = arith.constant 34 : index
    %346 = memref.load %arg3[%c0_108, %c34] : memref<2x49xf32, #tpu.memory_space<smem>>
    %347 = vector.broadcast %346 : f32 to vector<16x16xf32>
    %348 = arith.mulf %345, %347 : vector<16x16xf32>
    %349 = arith.addf %344, %348 : vector<16x16xf32>
    %350 = vector.extract_strided_slice %3 {offsets = [4, 6], sizes = [16, 16], strides = [1, 1]} : vector<22x22xf32> to vector<16x16xf32>
    %c1_109 = arith.constant 1 : index
    %c34_110 = arith.constant 34 : index
    %351 = memref.load %arg3[%c1_109, %c34_110] : memref<2x49xf32, #tpu.memory_space<smem>>
    %352 = vector.broadcast %351 : f32 to vector<16x16xf32>
    %353 = arith.mulf %350, %352 : vector<16x16xf32>
    %354 = arith.addf %349, %353 : vector<16x16xf32>
    %355 = vector.extract_strided_slice %1 {offsets = [5, 0], sizes = [16, 16], strides = [1, 1]} : vector<22x22xf32> to vector<16x16xf32>
    %c0_111 = arith.constant 0 : index
    %c35 = arith.constant 35 : index
    %356 = memref.load %arg3[%c0_111, %c35] : memref<2x49xf32, #tpu.memory_space<smem>>
    %357 = vector.broadcast %356 : f32 to vector<16x16xf32>
    %358 = arith.mulf %355, %357 : vector<16x16xf32>
    %359 = arith.addf %354, %358 : vector<16x16xf32>
    %360 = vector.extract_strided_slice %3 {offsets = [5, 0], sizes = [16, 16], strides = [1, 1]} : vector<22x22xf32> to vector<16x16xf32>
    %c1_112 = arith.constant 1 : index
    %c35_113 = arith.constant 35 : index
    %361 = memref.load %arg3[%c1_112, %c35_113] : memref<2x49xf32, #tpu.memory_space<smem>>
    %362 = vector.broadcast %361 : f32 to vector<16x16xf32>
    %363 = arith.mulf %360, %362 : vector<16x16xf32>
    %364 = arith.addf %359, %363 : vector<16x16xf32>
    %365 = vector.extract_strided_slice %1 {offsets = [5, 1], sizes = [16, 16], strides = [1, 1]} : vector<22x22xf32> to vector<16x16xf32>
    %c0_114 = arith.constant 0 : index
    %c36 = arith.constant 36 : index
    %366 = memref.load %arg3[%c0_114, %c36] : memref<2x49xf32, #tpu.memory_space<smem>>
    %367 = vector.broadcast %366 : f32 to vector<16x16xf32>
    %368 = arith.mulf %365, %367 : vector<16x16xf32>
    %369 = arith.addf %364, %368 : vector<16x16xf32>
    %370 = vector.extract_strided_slice %3 {offsets = [5, 1], sizes = [16, 16], strides = [1, 1]} : vector<22x22xf32> to vector<16x16xf32>
    %c1_115 = arith.constant 1 : index
    %c36_116 = arith.constant 36 : index
    %371 = memref.load %arg3[%c1_115, %c36_116] : memref<2x49xf32, #tpu.memory_space<smem>>
    %372 = vector.broadcast %371 : f32 to vector<16x16xf32>
    %373 = arith.mulf %370, %372 : vector<16x16xf32>
    %374 = arith.addf %369, %373 : vector<16x16xf32>
    %375 = vector.extract_strided_slice %1 {offsets = [5, 2], sizes = [16, 16], strides = [1, 1]} : vector<22x22xf32> to vector<16x16xf32>
    %c0_117 = arith.constant 0 : index
    %c37 = arith.constant 37 : index
    %376 = memref.load %arg3[%c0_117, %c37] : memref<2x49xf32, #tpu.memory_space<smem>>
    %377 = vector.broadcast %376 : f32 to vector<16x16xf32>
    %378 = arith.mulf %375, %377 : vector<16x16xf32>
    %379 = arith.addf %374, %378 : vector<16x16xf32>
    %380 = vector.extract_strided_slice %3 {offsets = [5, 2], sizes = [16, 16], strides = [1, 1]} : vector<22x22xf32> to vector<16x16xf32>
    %c1_118 = arith.constant 1 : index
    %c37_119 = arith.constant 37 : index
    %381 = memref.load %arg3[%c1_118, %c37_119] : memref<2x49xf32, #tpu.memory_space<smem>>
    %382 = vector.broadcast %381 : f32 to vector<16x16xf32>
    %383 = arith.mulf %380, %382 : vector<16x16xf32>
    %384 = arith.addf %379, %383 : vector<16x16xf32>
    %385 = vector.extract_strided_slice %1 {offsets = [5, 3], sizes = [16, 16], strides = [1, 1]} : vector<22x22xf32> to vector<16x16xf32>
    %c0_120 = arith.constant 0 : index
    %c38 = arith.constant 38 : index
    %386 = memref.load %arg3[%c0_120, %c38] : memref<2x49xf32, #tpu.memory_space<smem>>
    %387 = vector.broadcast %386 : f32 to vector<16x16xf32>
    %388 = arith.mulf %385, %387 : vector<16x16xf32>
    %389 = arith.addf %384, %388 : vector<16x16xf32>
    %390 = vector.extract_strided_slice %3 {offsets = [5, 3], sizes = [16, 16], strides = [1, 1]} : vector<22x22xf32> to vector<16x16xf32>
    %c1_121 = arith.constant 1 : index
    %c38_122 = arith.constant 38 : index
    %391 = memref.load %arg3[%c1_121, %c38_122] : memref<2x49xf32, #tpu.memory_space<smem>>
    %392 = vector.broadcast %391 : f32 to vector<16x16xf32>
    %393 = arith.mulf %390, %392 : vector<16x16xf32>
    %394 = arith.addf %389, %393 : vector<16x16xf32>
    %395 = vector.extract_strided_slice %1 {offsets = [5, 4], sizes = [16, 16], strides = [1, 1]} : vector<22x22xf32> to vector<16x16xf32>
    %c0_123 = arith.constant 0 : index
    %c39 = arith.constant 39 : index
    %396 = memref.load %arg3[%c0_123, %c39] : memref<2x49xf32, #tpu.memory_space<smem>>
    %397 = vector.broadcast %396 : f32 to vector<16x16xf32>
    %398 = arith.mulf %395, %397 : vector<16x16xf32>
    %399 = arith.addf %394, %398 : vector<16x16xf32>
    %400 = vector.extract_strided_slice %3 {offsets = [5, 4], sizes = [16, 16], strides = [1, 1]} : vector<22x22xf32> to vector<16x16xf32>
    %c1_124 = arith.constant 1 : index
    %c39_125 = arith.constant 39 : index
    %401 = memref.load %arg3[%c1_124, %c39_125] : memref<2x49xf32, #tpu.memory_space<smem>>
    %402 = vector.broadcast %401 : f32 to vector<16x16xf32>
    %403 = arith.mulf %400, %402 : vector<16x16xf32>
    %404 = arith.addf %399, %403 : vector<16x16xf32>
    %405 = vector.extract_strided_slice %1 {offsets = [5, 5], sizes = [16, 16], strides = [1, 1]} : vector<22x22xf32> to vector<16x16xf32>
    %c0_126 = arith.constant 0 : index
    %c40 = arith.constant 40 : index
    %406 = memref.load %arg3[%c0_126, %c40] : memref<2x49xf32, #tpu.memory_space<smem>>
    %407 = vector.broadcast %406 : f32 to vector<16x16xf32>
    %408 = arith.mulf %405, %407 : vector<16x16xf32>
    %409 = arith.addf %404, %408 : vector<16x16xf32>
    %410 = vector.extract_strided_slice %3 {offsets = [5, 5], sizes = [16, 16], strides = [1, 1]} : vector<22x22xf32> to vector<16x16xf32>
    %c1_127 = arith.constant 1 : index
    %c40_128 = arith.constant 40 : index
    %411 = memref.load %arg3[%c1_127, %c40_128] : memref<2x49xf32, #tpu.memory_space<smem>>
    %412 = vector.broadcast %411 : f32 to vector<16x16xf32>
    %413 = arith.mulf %410, %412 : vector<16x16xf32>
    %414 = arith.addf %409, %413 : vector<16x16xf32>
    %415 = vector.extract_strided_slice %1 {offsets = [5, 6], sizes = [16, 16], strides = [1, 1]} : vector<22x22xf32> to vector<16x16xf32>
    %c0_129 = arith.constant 0 : index
    %c41 = arith.constant 41 : index
    %416 = memref.load %arg3[%c0_129, %c41] : memref<2x49xf32, #tpu.memory_space<smem>>
    %417 = vector.broadcast %416 : f32 to vector<16x16xf32>
    %418 = arith.mulf %415, %417 : vector<16x16xf32>
    %419 = arith.addf %414, %418 : vector<16x16xf32>
    %420 = vector.extract_strided_slice %3 {offsets = [5, 6], sizes = [16, 16], strides = [1, 1]} : vector<22x22xf32> to vector<16x16xf32>
    %c1_130 = arith.constant 1 : index
    %c41_131 = arith.constant 41 : index
    %421 = memref.load %arg3[%c1_130, %c41_131] : memref<2x49xf32, #tpu.memory_space<smem>>
    %422 = vector.broadcast %421 : f32 to vector<16x16xf32>
    %423 = arith.mulf %420, %422 : vector<16x16xf32>
    %424 = arith.addf %419, %423 : vector<16x16xf32>
    %425 = vector.extract_strided_slice %1 {offsets = [6, 0], sizes = [16, 16], strides = [1, 1]} : vector<22x22xf32> to vector<16x16xf32>
    %c0_132 = arith.constant 0 : index
    %c42 = arith.constant 42 : index
    %426 = memref.load %arg3[%c0_132, %c42] : memref<2x49xf32, #tpu.memory_space<smem>>
    %427 = vector.broadcast %426 : f32 to vector<16x16xf32>
    %428 = arith.mulf %425, %427 : vector<16x16xf32>
    %429 = arith.addf %424, %428 : vector<16x16xf32>
    %430 = vector.extract_strided_slice %3 {offsets = [6, 0], sizes = [16, 16], strides = [1, 1]} : vector<22x22xf32> to vector<16x16xf32>
    %c1_133 = arith.constant 1 : index
    %c42_134 = arith.constant 42 : index
    %431 = memref.load %arg3[%c1_133, %c42_134] : memref<2x49xf32, #tpu.memory_space<smem>>
    %432 = vector.broadcast %431 : f32 to vector<16x16xf32>
    %433 = arith.mulf %430, %432 : vector<16x16xf32>
    %434 = arith.addf %429, %433 : vector<16x16xf32>
    %435 = vector.extract_strided_slice %1 {offsets = [6, 1], sizes = [16, 16], strides = [1, 1]} : vector<22x22xf32> to vector<16x16xf32>
    %c0_135 = arith.constant 0 : index
    %c43 = arith.constant 43 : index
    %436 = memref.load %arg3[%c0_135, %c43] : memref<2x49xf32, #tpu.memory_space<smem>>
    %437 = vector.broadcast %436 : f32 to vector<16x16xf32>
    %438 = arith.mulf %435, %437 : vector<16x16xf32>
    %439 = arith.addf %434, %438 : vector<16x16xf32>
    %440 = vector.extract_strided_slice %3 {offsets = [6, 1], sizes = [16, 16], strides = [1, 1]} : vector<22x22xf32> to vector<16x16xf32>
    %c1_136 = arith.constant 1 : index
    %c43_137 = arith.constant 43 : index
    %441 = memref.load %arg3[%c1_136, %c43_137] : memref<2x49xf32, #tpu.memory_space<smem>>
    %442 = vector.broadcast %441 : f32 to vector<16x16xf32>
    %443 = arith.mulf %440, %442 : vector<16x16xf32>
    %444 = arith.addf %439, %443 : vector<16x16xf32>
    %445 = vector.extract_strided_slice %1 {offsets = [6, 2], sizes = [16, 16], strides = [1, 1]} : vector<22x22xf32> to vector<16x16xf32>
    %c0_138 = arith.constant 0 : index
    %c44 = arith.constant 44 : index
    %446 = memref.load %arg3[%c0_138, %c44] : memref<2x49xf32, #tpu.memory_space<smem>>
    %447 = vector.broadcast %446 : f32 to vector<16x16xf32>
    %448 = arith.mulf %445, %447 : vector<16x16xf32>
    %449 = arith.addf %444, %448 : vector<16x16xf32>
    %450 = vector.extract_strided_slice %3 {offsets = [6, 2], sizes = [16, 16], strides = [1, 1]} : vector<22x22xf32> to vector<16x16xf32>
    %c1_139 = arith.constant 1 : index
    %c44_140 = arith.constant 44 : index
    %451 = memref.load %arg3[%c1_139, %c44_140] : memref<2x49xf32, #tpu.memory_space<smem>>
    %452 = vector.broadcast %451 : f32 to vector<16x16xf32>
    %453 = arith.mulf %450, %452 : vector<16x16xf32>
    %454 = arith.addf %449, %453 : vector<16x16xf32>
    %455 = vector.extract_strided_slice %1 {offsets = [6, 3], sizes = [16, 16], strides = [1, 1]} : vector<22x22xf32> to vector<16x16xf32>
    %c0_141 = arith.constant 0 : index
    %c45 = arith.constant 45 : index
    %456 = memref.load %arg3[%c0_141, %c45] : memref<2x49xf32, #tpu.memory_space<smem>>
    %457 = vector.broadcast %456 : f32 to vector<16x16xf32>
    %458 = arith.mulf %455, %457 : vector<16x16xf32>
    %459 = arith.addf %454, %458 : vector<16x16xf32>
    %460 = vector.extract_strided_slice %3 {offsets = [6, 3], sizes = [16, 16], strides = [1, 1]} : vector<22x22xf32> to vector<16x16xf32>
    %c1_142 = arith.constant 1 : index
    %c45_143 = arith.constant 45 : index
    %461 = memref.load %arg3[%c1_142, %c45_143] : memref<2x49xf32, #tpu.memory_space<smem>>
    %462 = vector.broadcast %461 : f32 to vector<16x16xf32>
    %463 = arith.mulf %460, %462 : vector<16x16xf32>
    %464 = arith.addf %459, %463 : vector<16x16xf32>
    %465 = vector.extract_strided_slice %1 {offsets = [6, 4], sizes = [16, 16], strides = [1, 1]} : vector<22x22xf32> to vector<16x16xf32>
    %c0_144 = arith.constant 0 : index
    %c46 = arith.constant 46 : index
    %466 = memref.load %arg3[%c0_144, %c46] : memref<2x49xf32, #tpu.memory_space<smem>>
    %467 = vector.broadcast %466 : f32 to vector<16x16xf32>
    %468 = arith.mulf %465, %467 : vector<16x16xf32>
    %469 = arith.addf %464, %468 : vector<16x16xf32>
    %470 = vector.extract_strided_slice %3 {offsets = [6, 4], sizes = [16, 16], strides = [1, 1]} : vector<22x22xf32> to vector<16x16xf32>
    %c1_145 = arith.constant 1 : index
    %c46_146 = arith.constant 46 : index
    %471 = memref.load %arg3[%c1_145, %c46_146] : memref<2x49xf32, #tpu.memory_space<smem>>
    %472 = vector.broadcast %471 : f32 to vector<16x16xf32>
    %473 = arith.mulf %470, %472 : vector<16x16xf32>
    %474 = arith.addf %469, %473 : vector<16x16xf32>
    %475 = vector.extract_strided_slice %1 {offsets = [6, 5], sizes = [16, 16], strides = [1, 1]} : vector<22x22xf32> to vector<16x16xf32>
    %c0_147 = arith.constant 0 : index
    %c47 = arith.constant 47 : index
    %476 = memref.load %arg3[%c0_147, %c47] : memref<2x49xf32, #tpu.memory_space<smem>>
    %477 = vector.broadcast %476 : f32 to vector<16x16xf32>
    %478 = arith.mulf %475, %477 : vector<16x16xf32>
    %479 = arith.addf %474, %478 : vector<16x16xf32>
    %480 = vector.extract_strided_slice %3 {offsets = [6, 5], sizes = [16, 16], strides = [1, 1]} : vector<22x22xf32> to vector<16x16xf32>
    %c1_148 = arith.constant 1 : index
    %c47_149 = arith.constant 47 : index
    %481 = memref.load %arg3[%c1_148, %c47_149] : memref<2x49xf32, #tpu.memory_space<smem>>
    %482 = vector.broadcast %481 : f32 to vector<16x16xf32>
    %483 = arith.mulf %480, %482 : vector<16x16xf32>
    %484 = arith.addf %479, %483 : vector<16x16xf32>
    %485 = vector.extract_strided_slice %1 {offsets = [6, 6], sizes = [16, 16], strides = [1, 1]} : vector<22x22xf32> to vector<16x16xf32>
    %c0_150 = arith.constant 0 : index
    %c48 = arith.constant 48 : index
    %486 = memref.load %arg3[%c0_150, %c48] : memref<2x49xf32, #tpu.memory_space<smem>>
    %487 = vector.broadcast %486 : f32 to vector<16x16xf32>
    %488 = arith.mulf %485, %487 : vector<16x16xf32>
    %489 = arith.addf %484, %488 : vector<16x16xf32>
    %490 = vector.extract_strided_slice %3 {offsets = [6, 6], sizes = [16, 16], strides = [1, 1]} : vector<22x22xf32> to vector<16x16xf32>
    %c1_151 = arith.constant 1 : index
    %c48_152 = arith.constant 48 : index
    %491 = memref.load %arg3[%c1_151, %c48_152] : memref<2x49xf32, #tpu.memory_space<smem>>
    %492 = vector.broadcast %491 : f32 to vector<16x16xf32>
    %493 = arith.mulf %490, %492 : vector<16x16xf32>
    %494 = arith.addf %489, %493 : vector<16x16xf32>
    %c0_153 = arith.constant 0 : index
    %c0_154 = arith.constant 0 : index
    %495 = memref.load %arg4[%c0_153, %c0_154] : memref<1x1xf32, #tpu.memory_space<smem>>
    %496 = vector.broadcast %495 : f32 to vector<16x16xf32>
    %497 = arith.addf %494, %496 : vector<16x16xf32>
    %cst_155 = arith.constant 0.000000e+00 : f32
    %498 = vector.broadcast %cst_155 : f32 to vector<16x16xf32>
    %499 = arith.subf %498, %497 : vector<16x16xf32>
    %500 = math.exp %499 : vector<16x16xf32>
    %cst_156 = arith.constant 1.000000e+00 : f32
    %501 = vector.broadcast %cst_156 : f32 to vector<16x16xf32>
    %502 = arith.addf %501, %500 : vector<16x16xf32>
    %cst_157 = arith.constant 1.000000e+00 : f32
    %503 = vector.broadcast %cst_157 : f32 to vector<16x16xf32>
    %504 = arith.divf %503, %502 : vector<16x16xf32>
    %c0_158 = arith.constant 0 : index
    %c0_159 = arith.constant 0 : index
    %c0_160 = arith.constant 0 : index
    %505 = vector.load %arg5[%c0_158, %c0_159, %c0_160] : memref<1x16x16xf32, #tpu.memory_space<vmem>>, vector<1x16x16xf32>
    %506 = vector.shape_cast %505 : vector<1x16x16xf32> to vector<16x16xf32>
    %507 = vector.shape_cast %504 : vector<16x16xf32> to vector<1x16x16xf32>
    tpu.vector_store %arg5[%c0_158, %c0_159, %c0_160], %507 {strides = array<i32>} : memref<1x16x16xf32, #tpu.memory_space<vmem>>, vector<1x16x16xf32>,
    return
  }
  func.func @transform_0(%arg0: i32) -> (i32, i32, i32) {
    %c0_i32 = arith.constant 0 : i32
    %c0_i32_0 = arith.constant 0 : i32
    %c0_i32_1 = arith.constant 0 : i32
    return %arg0, %c0_i32, %c0_i32_0 : i32, i32, i32
  }
  func.func @transform_1(%arg0: i32) -> (i32, i32, i32) {
    %c0_i32 = arith.constant 0 : i32
    %c0_i32_0 = arith.constant 0 : i32
    %c0_i32_1 = arith.constant 0 : i32
    return %arg0, %c0_i32, %c0_i32_0 : i32, i32, i32
  }
  func.func @transform_2(%arg0: i32) -> (i32, i32) {
    %c0_i32 = arith.constant 0 : i32
    %c0_i32_0 = arith.constant 0 : i32
    %c0_i32_1 = arith.constant 0 : i32
    return %c0_i32, %c0_i32_0 : i32, i32
  }
  func.func @transform_3(%arg0: i32) -> (i32, i32) {
    %c0_i32 = arith.constant 0 : i32
    %c0_i32_0 = arith.constant 0 : i32
    %c0_i32_1 = arith.constant 0 : i32
    return %c0_i32, %c0_i32_0 : i32, i32
  }
  func.func @transform_4(%arg0: i32) -> (i32, i32, i32) {
    %c0_i32 = arith.constant 0 : i32
    %c0_i32_0 = arith.constant 0 : i32
    %c0_i32_1 = arith.constant 0 : i32
    return %arg0, %c0_i32, %c0_i32_0 : i32, i32, i32
  }
}

</mosaic_0001>

<bundles_post_ra>
// kernel: cbam_forward.4
= control target key start
LH: loop header
LB: loop body
LE: loop exit
PB: predicated region body
PF: predicated region fallthrough
CT: control target
= control target key end

     0   :  { %s709_s12 = smov 0   ;;  %s711_s13 = smov 0   ;;  %s939_s0 = inlined_call_operand.vmem [shape: f32[2,256,128], index: 0, kind: input, shape index: {}]   ;;  %s940_s1 = inlined_call_operand.vmem [shape: f32[128,8], index: 1, kind: input, shape index: {}]   ;;  %s941_s2 = inlined_call_operand.vmem [shape: f32[8,128], index: 2, kind: input, shape index: {}]   ;;  %s942_s3 = inlined_call_operand.vmem [shape: f32[2,1,128], index: 3, kind: output, shape index: {}]  }
   0x1   :  { %s713_s14 = smov 0  }
   0x2 LB: > { %s25_s15 = sadd.s32 1, %s680_s13  ;;  %p565_p0 = scmp.ge.s32.totalorder %s684_s14, 1  ;;  %s684_s14 = sphi %s713_s14, %s13_s14   ;;  %s680_s13 = sphi %s711_s13, %s944_s13   ;;  %s676_s12 = sphi %s709_s12, %s943_s12  }
   0x3   : > { %p27_p1 = scmp.ge.s32.totalorder %s25_s15, 2  ;;  %p156_p2 = scmp.lt.s32.totalorder %s684_s14, 3 }
   0x5   : > { %s946_s15 = smov (%p27_p1, %s25_s15), 0  ;;  %p157_p3 = pnand %p565_p0, %p156_p2 }
   0x6   : > { %p183_p4 = scmp.lt.s32.totalorder (!%p157_p3), %s676_s12, 1 }
   0x7   : > { %160 = sbr.rel (%p157_p3) target bundleno = 532 (0x214), region = 32 }
   0xc   : > { %v342_v0 = vld [vmem:[%s940_s1 + $0x78] sm:$0xff]  ;;  %v686_v1 = vmov 0.0   ;;  %v341_v2 = vld [vmem:[%s940_s1 + $0x70] sm:$0xff]  ;;  %vm687_vm0 = vmmov 0   ;;  %s948_s12 = smov (!%p183_p4, %s676_s12), 1  ;;  %v688_v3 = vmov -inf  }
   0xd   : > { %591 = vmatprep.subr.mxu0 %v686_v1  ;;  %200 = vst [vmem:[#allocation3] sm:$0x1] %v686_v1  ;;  %623 = vmatprep.mubr.msk.f32.mxu0 %vm687_vm0, %v686_v1  ;;  %199 = vst [vmem:[#allocation2] sm:$0x1] %v688_v3  ;;  %v340_v4 = vld [vmem:[%s940_s1 + $0x68] sm:$0xff]  ;;  %s571_s22 = sshll.u32 %s948_s12, 8  ;;  %s194_s6 = scalar_lea.vmem %s942_s3, %s948_s12 }
   0xe   : > { %592 = vmatpush3.msra.mxu0 %v342_v0  ;;  %626 = vmatprep.subr.mxu1 %v686_v1  ;;  %v339_v5 = vld [vmem:[%s940_s1 + $0x60] sm:$0xff]  ;;  %s752_s27 = scalar_lea.vmem %s939_s0, %s571_s22  ;;  %v338_v9 = vld [vmem:[%s940_s1 + $0x58] sm:$0xff]  ;;  %v337_v18 = vld [vmem:[%s940_s1 + $0x50] sm:$0xff]  ;;  %vm325_vm1 = vcmask 1040384   ;;  %vm415_vm2 = vcmask 64512  }
   0xf   : > { %593 = vmatprep.subr.mxu0 %v686_v1  ;;  %628 = vmatprep.mubr.msk.f32.mxu1 %vm687_vm0, %v686_v1  ;;  %v201_v6 = vld [vmem:[%s752_s27] sm:$0xff]  ;;  %v202_v7 = vld [vmem:[%s752_s27 + $0x8] sm:$0xff]  ;;  %v203_v8 = vld [vmem:[%s752_s27 + $0x10] sm:$0xff] }
  0x10   : > { %594 = vmatpush3.msra.mxu0 %v341_v2  ;;  %v205_v10 = vld [vmem:[%s752_s27 + $0x20] sm:$0xff]  ;;  %v206_v11 = vld [vmem:[%s752_s27 + $0x28] sm:$0xff]  ;;  %v274_v12 = vadd.f32 %v202_v7, %v201_v6  ;;  %v204_v13 = vld [vmem:[%s752_s27 + $0x18] sm:$0xff] }
  0x11   : > { %595 = vmatprep.subr.mxu0 %v686_v1  ;;  %v207_v14 = vld [vmem:[%s752_s27 + $0x30] sm:$0xff]  ;;  %v766_v15 = vld [vmem:[%s752_s27 + $0x38] sm:$0xff]  ;;  %v234_v16 = vmax.f32 %v201_v6, %v205_v10  ;;  %v235_v17 = vmax.f32 %v202_v7, %v206_v11  ;;  %v773_v19 = vld [vmem:[%s752_s27 + $0x40] sm:$0xff] }
  0x12   : > { %596 = vmatpush3.msra.mxu0 %v340_v4  ;;  %v776_v20 = vld [vmem:[%s752_s27 + $0x48] sm:$0xff]  ;;  %v236_v21 = vmax.f32 %v203_v8, %v207_v14  ;;  %v237_v22 = vmax.f32 %v204_v13, %v766_v15  ;;  %v275_v23 = vadd.f32 %v274_v12, %v203_v8  ;;  %v780_v24 = vld [vmem:[%s752_s27 + $0x50] sm:$0xff]  ;;  %v783_v25 = vld [vmem:[%s752_s27 + $0x58] sm:$0xff] }
  0x13   : > { %597 = vmatprep.subr.mxu0 %v686_v1  ;;  %v238_v26 = vmax.f32 %v234_v16, %v773_v19  ;;  %v239_v27 = vmax.f32 %v235_v17, %v776_v20  ;;  %v336_v28 = vld [vmem:[%s940_s1 + $0x48] sm:$0xff]  ;;  %v792_v29 = vld [vmem:[%s752_s27 + $0x60] sm:$0xff]  ;;  %v800_v34 = vld [vmem:[%s752_s27 + $0x70] sm:$0xff] }
  0x14   : > { %598 = vmatpush3.msra.mxu0 %v339_v5  ;;  %v795_v30 = vld [vmem:[%s752_s27 + $0x68] sm:$0xff]  ;;  %v240_v31 = vmax.f32 %v236_v21, %v780_v24  ;;  %v241_v32 = vmax.f32 %v237_v22, %v783_v25  ;;  %v276_v33 = vadd.f32 %v275_v23, %v204_v13  ;;  %v803_v35 = vld [vmem:[%s752_s27 + $0x78] sm:$0xff]  ;;  %v335_v38 = vld [vmem:[%s940_s1 + $0x40] sm:$0xff] }
  0x15   : > { %599 = vmatprep.subr.mxu0 %v686_v1  ;;  %v242_v36 = vmax.f32 %v238_v26, %v792_v29  ;;  %v243_v37 = vmax.f32 %v239_v27, %v795_v30  ;;  %v812_v39 = vld [vmem:[%s752_s27 + $0x80] sm:$0xff]  ;;  %v815_v40 = vld [vmem:[%s752_s27 + $0x88] sm:$0xff]  ;;  %v820_v44 = vld [vmem:[%s752_s27 + $0x90] sm:$0xff] }
  0x16   : > { %600 = vmatpush3.msra.mxu0 %v338_v9  ;;  %v244_v41 = vmax.f32 %v240_v31, %v800_v34  ;;  %v245_v42 = vmax.f32 %v241_v32, %v803_v35  ;;  %v277_v43 = vadd.f32 %v276_v33, %v205_v10  ;;  %v823_v45 = vld [vmem:[%s752_s27 + $0x98] sm:$0xff]  ;;  %v832_v49 = vld [vmem:[%s752_s27 + $0xa0] sm:$0xff]  ;;  %v835_v50 = vld [vmem:[%s752_s27 + $0xa8] sm:$0xff] }
  0x17   : > { %601 = vmatprep.subr.mxu0 %v686_v1  ;;  %v246_v46 = vmax.f32 %v242_v36, %v812_v39  ;;  %v247_v47 = vmax.f32 %v243_v37, %v815_v40  ;;  %v334_v48 = vld [vmem:[%s940_s1 + $0x38] sm:$0xff]  ;;  %v840_v54 = vld [vmem:[%s752_s27 + $0xb0] sm:$0xff]  ;;  %v852_v59 = vld [vmem:[%s752_s27 + $0xc0] sm:$0xff] }
  0x18   : > { %602 = vmatpush3.msra.mxu0 %v337_v18  ;;  %v248_v51 = vmax.f32 %v244_v41, %v820_v44  ;;  %v249_v52 = vmax.f32 %v245_v42, %v823_v45  ;;  %v278_v53 = vadd.f32 %v277_v43, %v206_v11  ;;  %v843_v55 = vld [vmem:[%s752_s27 + $0xb8] sm:$0xff]  ;;  %v333_v58 = vld [vmem:[%s940_s1 + $0x30] sm:$0xff]  ;;  %v855_v60 = vld [vmem:[%s752_s27 + $0xc8] sm:$0xff] }
  0x19   : > { %603 = vmatprep.subr.mxu0 %v686_v1  ;;  %v250_v56 = vmax.f32 %v246_v46, %v832_v49  ;;  %v251_v57 = vmax.f32 %v247_v47, %v835_v50  ;;  %v860_v0 = vld [vmem:[%s752_s27 + $0xd0] sm:$0xff]  ;;  %v863_v2 = vld [vmem:[%s752_s27 + $0xd8] sm:$0xff]  ;;  %v332_v6 = vld [vmem:[%s940_s1 + $0x28] sm:$0xff] }
  0x1a   : > { %604 = vmatpush3.msra.mxu0 %v336_v28  ;;  %v252_v61 = vmax.f32 %v248_v51, %v840_v54  ;;  %v253_v62 = vmax.f32 %v249_v52, %v843_v55  ;;  %v279_v63 = vadd.f32 %v278_v53, %v207_v14  ;;  %v866_v3 = vld [vmem:[%s752_s27 + $0xf8] sm:$0xff]  ;;  %v229_v7 = vld [vmem:[%s752_s27 + $0xe0] sm:$0xff]  ;;  %v230_v8 = vld [vmem:[%s752_s27 + $0xe8] sm:$0xff] }
  0x1b   : > { %605 = vmatprep.subr.mxu0 %v686_v1  ;;  %v254_v4 = vmax.f32 %v250_v56, %v852_v59  ;;  %v255_v5 = vmax.f32 %v251_v57, %v855_v60  ;;  %v231_v12 = vld [vmem:[%s752_s27 + $0xf0] sm:$0xff]  ;;  %v331_v16 = vld [vmem:[%s940_s1 + $0x20] sm:$0xff]  ;;  %v328_v31 = vld [vmem:[%s940_s1 + $0x8] sm:$0xff] }
  0x1c   : > { %606 = vmatpush3.msra.mxu0 %v335_v38  ;;  %v256_v9 = vmax.f32 %v252_v61, %v860_v0  ;;  %v257_v10 = vmax.f32 %v253_v62, %v863_v2  ;;  %v280_v11 = vadd.f32 %v279_v63, %v766_v15  ;;  %v330_v15 = vld [vmem:[%s940_s1 + $0x18] sm:$0xff]  ;;  %v329_v27 = vld [vmem:[%s940_s1 + $0x10] sm:$0xff]  ;;  %v327_v33 = vld [vmem:[%s940_s1] sm:$0xff] }
  0x1d   : > { %607 = vmatprep.subr.mxu0 %v686_v1  ;;  %v258_v13 = vmax.f32 %v254_v4, %v229_v7  ;;  %v259_v14 = vmax.f32 %v255_v5, %v230_v8  ;;  %v233_v46 = vld [vmem:[#allocation2] sm:$0x1]  ;;  %v273_v4 = vld [vmem:[#allocation3] sm:$0x1] }
  0x1e   : > { %608 = vmatpush3.msra.mxu0 %v334_v48  ;;  %v260_v17 = vmax.f32 %v256_v9, %v231_v12  ;;  %v261_v18 = vmax.f32 %v257_v10, %v866_v3  ;;  %v281_v21 = vadd.f32 %v280_v11, %v773_v19 }
  0x1f   : > { %609 = vmatprep.subr.mxu0 %v686_v1  ;;  %v262_v22 = vmax.f32 %v258_v13, %v259_v14 }
  0x20   : > { %610 = vmatpush3.msra.mxu0 %v333_v58  ;;  %v263_v23 = vmax.f32 %v260_v17, %v261_v18  ;;  %v282_v26 = vadd.f32 %v281_v21, %v776_v20 }
  0x21   : > { %611 = vmatprep.subr.mxu0 %v686_v1 }
  0x22   : > { %612 = vmatpush3.msra.mxu0 %v332_v6  ;;  %v264_v28 = vmax.f32 %v262_v22, %v263_v23  ;;  %v283_v19 = vadd.f32 %v282_v26, %v780_v24 }
  0x23   : > { %613 = vmatprep.subr.mxu0 %v686_v1 }
  0x24   : > { %614 = vmatpush3.msra.mxu0 %v331_v16  ;;  %v265_v32 = vrot.slane %v264_v28, 4  ;;  %v284_v20 = vadd.f32 %v283_v19, %v783_v25 }
  0x25   : > { %615 = vmatprep.subr.mxu0 %v686_v1 }
  0x26   : > { %616 = vmatpush3.msra.mxu0 %v330_v15  ;;  %v266_v36 = vmax.f32 %v264_v28, %v265_v32  ;;  %v285_v24 = vadd.f32 %v284_v20, %v792_v29 }
  0x27   : > { %617 = vmatprep.subr.mxu0 %v686_v1 }
  0x28   : > { %618 = vmatpush3.msra.mxu0 %v329_v27  ;;  %v267_v37 = vrot.slane %v266_v36, 2  ;;  %v286_v38 = vadd.f32 %v285_v24, %v795_v30 }
  0x29   : > { %619 = vmatprep.subr.mxu0 %v686_v1 }
  0x2a   : > { %620 = vmatpush3.msra.mxu0 %v328_v31  ;;  %v268_v41 = vmax.f32 %v266_v36, %v267_v37  ;;  %v287_v25 = vadd.f32 %v286_v38, %v800_v34 }
  0x2b   : > { %621 = vmatprep.subr.mxu0 %v686_v1 }
  0x2c   : > { %622 = vmatpush3.msra.mxu0 %v327_v33  ;;  %v269_v42 = vrot.slane %v268_v41, 1  ;;  %v288_v43 = vadd.f32 %v287_v25, %v803_v35 }
  0x2e   : > { %v270_v47 = vmax.f32 %v268_v41, %v269_v42  ;;  %v289_v48 = vadd.f32 %v288_v43, %v812_v39 }
  0x30   : > { %v271_v51 = vmax.f32 %v233_v46, %v270_v47  ;;  %v290_v29 = vadd.f32 %v289_v48, %v815_v40 }
  0x32   : > { %272 = vst [vmem:[#allocation2] sm:$0x1] %v271_v51  ;;  %v291_v1 = vadd.f32 %v290_v29, %v820_v44 }
  0x34   : > { %v292_v52 = vadd.f32 %v291_v1, %v823_v45 }
  0x36   : > { %v293_v30 = vadd.f32 %v292_v52, %v832_v49 }
  0x38   : > { %v294_v53 = vadd.f32 %v293_v30, %v835_v50 }
  0x3a   : > { %v295_v34 = vadd.f32 %v294_v53, %v840_v54 }
  0x3c   : > { %v296_v35 = vadd.f32 %v295_v34, %v843_v55 }
  0x3e   : > { %v297_v56 = vadd.f32 %v296_v35, %v852_v59  ;;  %v320_v59 = vlaneseq }
  0x40   : > { %v298_v39 = vadd.f32 %v297_v56, %v855_v60  ;;  %v321_v60 = vshrl.u32 %v320_v59, 7 }
  0x42   : > { %v299_v57 = vadd.f32 %v298_v39, %v860_v0  ;;  %v322_v6 = vsub.s32 0, %v321_v60 }
  0x44   : > { %v300_v40 = vadd.f32 %v299_v57, %v863_v2  ;;  %v318_v2 = vld [vmem:[#allocation2] sm:$0x1] }
  0x46   : > { %v301_v58 = vadd.f32 %v300_v40, %v229_v7 }
  0x48   : > { %v302_v44 = vadd.f32 %v301_v58, %v230_v8 }
  0x4a   : > { %v303_v61 = vadd.f32 %v302_v44, %v231_v12 }
  0x4c   : > { %v304_v45 = vadd.f32 %v303_v61, %v866_v3  ;;  %v414_v3 = vld [vmem:[%s941_s2] sm:$0xff] }
  0x4d   : > { %627 = vmatpush3.msra.mxu1 %v414_v3 }
  0x4e   : > { %v305_v49 = vrot.slane %v304_v45, 4 }
  0x50   : > { %v306_v62 = vadd.f32 %v305_v49, %v304_v45 }
  0x52   : > { %v307_v50 = vrot.slane %v306_v62, 2 }
  0x54   : > { %v308_v63 = vadd.f32 %v307_v50, %v306_v62 }
  0x56   : > { %v309_v54 = vrot.slane %v308_v63, 1 }
  0x58   : > { %v310_v55 = vadd.f32 %v309_v54, %v308_v63 }
  0x5a   : > { %v311_v5 = vadd.f32 %v310_v55, %v273_v4 }
  0x5c   : > { %312 = vst [vmem:[#allocation3] sm:$0x1] %v311_v5 }
  0x63   : > { %v316_v0 = vld [vmem:[#allocation3] sm:$0x1] }
  0x64   : > { %v317_v9 = vmul.f32 0.00390625, %v316_v0 }
  0x66   : > { %v323_v7 = vrot.slane %v317_v9, %v322_v6 }
  0x68   : > { %v326_v8 = vsel %vm325_vm1, %v318_v2, %v323_v7 }
  0x69   : > { %624 = vmatmul.mubr.f32.vlgmr.msra.gmra.mxu0 %v326_v8 }
 0x129   : > { %v409_v10 = vpop.f32.mrf.mxu0 }
 0x12a   : > { %v413_v11 = vmax.f32 %v409_v10, 0.0 }
 0x12b   : > { %v625_v12 = vpop.f32.mrf.mxu0 }
 0x12c   : > { %629 = vmatmul.mubr.msk.f32.vlgmr.msra.gmra.mxu1 %vm415_vm2, %v413_v11 }
 0x1ec   : > { %v485_v13 = vpop.f32.mrf.mxu1 }
 0x1ed   : > { %v490_v14 = vrot.slane %v485_v13, 1 }
 0x1ee   : > { %v630_v16 = vpop.f32.mrf.mxu1 }
 0x1ef   : > { %v492_v17 = vadd.f32 %v490_v14, %v485_v13 }
 0x1f1   : > { %v493_v18 = vsub.f32 0.0, %v492_v17 }
 0x1f3   : > { %v494_v21 = vmul.f32 1.442695, %v493_v18 }
 0x1f5   : > { %658 = vpow2.f32 %v494_v21 }
 0x202   : > { %v659_v22 = vpop.eup %658 }
 0x203   : > { %v496_v15 = vadd.f32 1.0, %v659_v22 }
 0x205   : > { %660 = vrcp.f32 %v496_v15 }
 0x212   : > { %v661_v23 = vpop.eup %660 }
 0x213   : > { %499 = vst [vmem:[%s194_s6] sm:$0x1] %v661_v23 }
 0x214 PF: > { %s13_s14 = sadd.s32 1, %s684_s14   ;;  %s943_s12 = smov %s680_s13 }
 0x215   : > { %p10_p5 = scmp.ge.s32.totalorder %s13_s14, 4   ;;  %s944_s13 = smov %s946_s15 }
 0x217   :  { %12 = sbr.rel (!%p10_p5) target bundleno = 2 (0x2), region = 70 }

// kernel: cbam_forward.5
= control target key start
LH: loop header
LB: loop body
LE: loop exit
PB: predicated region body
PF: predicated region fallthrough
CT: control target
= control target key end

     0   :  { %s667_s9 = smov 0   ;;  %s669_s10 = smov 0   ;;  %s987_s0 = inlined_call_operand.vmem [shape: f32[2,256,128], index: 0, kind: input, shape index: {}]   ;;  %s988_s1 = inlined_call_operand.vmem [shape: f32[2,1,128], index: 1, kind: input, shape index: {}]   ;;  %s989_s2 = inlined_call_operand.vmem [shape: f32[2,256,2], index: 2, kind: output, shape index: {}]  }
   0x1   :  { %s671_s11 = smov 0  }
   0x2 LB: > { %s24_s12 = sadd.s32 1, %s646_s10  ;;  %p594_p0 = scmp.ge.s32.totalorder %s650_s11, 1  ;;  %s650_s11 = sphi %s671_s11, %s12_s11   ;;  %s646_s10 = sphi %s669_s10, %s991_s10   ;;  %s642_s9 = sphi %s667_s9, %s990_s9  }
   0x3   : > { %p26_p1 = scmp.ge.s32.totalorder %s24_s12, 2  ;;  %p141_p2 = scmp.lt.s32.totalorder %s650_s11, 3 }
   0x5   : > { %s993_s12 = smov (%p26_p1, %s24_s12), 0  ;;  %p142_p3 = pnand %p594_p0, %p141_p2 }
   0x6   : > { %p175_p4 = scmp.lt.s32.totalorder (!%p142_p3), %s642_s9, 1 }
   0x7   : > { %145 = sbr.rel (%p142_p3) target bundleno = 282 (0x11a), region = 28 }
   0xc   : > { %s995_s9 = smov (!%p175_p4, %s642_s9), 1  ;;  %vm428_vm0 = vcmask 7168   ;;  %vm461_vm1 = vcmask 15360  }
   0xd   : > { %s602_s13 = sshll.u32 %s995_s9, 8  ;;  %s186_s16 = scalar_lea.vmem %s988_s1, %s995_s9 }
   0xe   : > { %s697_s19 = scalar_lea.vmem %s987_s0, %s602_s13  ;;  %v699_v0 = vld [vmem:[%s186_s16] ss:$0 sm:$0xff]  ;;  %s862_s22 = scalar_lea.vmem %s989_s2, %s602_s13 }
   0xf   : > { %v199_v1 = vld [vmem:[%s697_s19 + $0x10] sm:$0xff]  ;;  %v197_v2 = vld [vmem:[%s697_s19] sm:$0xff]  ;;  %v200_v3 = vld [vmem:[%s697_s19 + $0x18] sm:$0xff] }
  0x10   : > { %v705_v4 = vmul.f32 %v699_v0, %v199_v1  ;;  %v708_v5 = vmul.f32 %v699_v0, %v197_v2  ;;  %v198_v6 = vld [vmem:[%s697_s19 + $0x8] sm:$0xff]  ;;  %v714_v7 = vmul.f32 %v699_v0, %v200_v3  ;;  %v201_v10 = vld [vmem:[%s697_s19 + $0x20] sm:$0xff]  ;;  %v204_v13 = vld [vmem:[%s697_s19 + $0x38] sm:$0xff] }
  0x11   : > { %v717_v8 = vmul.f32 %v699_v0, %v198_v6  ;;  %v202_v9 = vld [vmem:[%s697_s19 + $0x28] sm:$0xff]  ;;  %v727_v12 = vmul.f32 %v699_v0, %v201_v10  ;;  %v203_v14 = vld [vmem:[%s697_s19 + $0x30] sm:$0xff]  ;;  %v225_v16 = vld [vmem:[%s697_s19 + $0xe0] sm:$0xff]  ;;  %v734_v17 = vmul.f32 %v699_v0, %v204_v13 }
  0x12   : > { %272 = vmax.xlane.f32.xlu1 %v705_v4  ;;  %268 = vmax.xlane.f32.xlu0 %v708_v5  ;;  %v724_v11 = vmul.f32 %v699_v0, %v202_v9  ;;  %v226_v15 = vld [vmem:[%s697_s19 + $0xe8] sm:$0xff]  ;;  %v740_v19 = vmul.f32 %v699_v0, %v225_v16  ;;  %v228_v20 = vld [vmem:[%s697_s19 + $0xf8] sm:$0xff]  ;;  %v227_v21 = vld [vmem:[%s697_s19 + $0xf0] sm:$0xff]  ;;  %v747_v22 = vmul.f32 %v699_v0, %v203_v14 }
  0x13   : > { %v737_v18 = vmul.f32 %v699_v0, %v226_v15  ;;  %v750_v23 = vmul.f32 %v699_v0, %v228_v20  ;;  %v753_v24 = vmul.f32 %v699_v0, %v227_v21  ;;  %v206_v25 = vld [vmem:[%s697_s19 + $0x48] sm:$0xff]  ;;  %v205_v26 = vld [vmem:[%s697_s19 + $0x40] sm:$0xff]  ;;  %v208_v29 = vld [vmem:[%s697_s19 + $0x58] sm:$0xff] }
  0x14   : > { %v760_v27 = vmul.f32 %v699_v0, %v206_v25  ;;  %v763_v28 = vmul.f32 %v699_v0, %v205_v26  ;;  %v207_v30 = vld [vmem:[%s697_s19 + $0x50] sm:$0xff]  ;;  %v247_v31 = vmul.f32 %v699_v0, %v208_v29  ;;  %v210_v33 = vld [vmem:[%s697_s19 + $0x68] sm:$0xff]  ;;  %v209_v34 = vld [vmem:[%s697_s19 + $0x60] sm:$0xff] }
  0x15   : > { %v246_v32 = vmul.f32 %v699_v0, %v207_v30  ;;  %v249_v35 = vmul.f32 %v699_v0, %v210_v33  ;;  %v248_v36 = vmul.f32 %v699_v0, %v209_v34  ;;  %v212_v37 = vld [vmem:[%s697_s19 + $0x78] sm:$0xff]  ;;  %v211_v38 = vld [vmem:[%s697_s19 + $0x70] sm:$0xff]  ;;  %v214_v41 = vld [vmem:[%s697_s19 + $0x88] sm:$0xff] }
  0x16   : > { %274 = vmax.xlane.f32.xlu1 %v714_v7  ;;  %270 = vmax.xlane.f32.xlu0 %v717_v8  ;;  %v251_v39 = vmul.f32 %v699_v0, %v212_v37  ;;  %v250_v40 = vmul.f32 %v699_v0, %v211_v38  ;;  %v213_v42 = vld [vmem:[%s697_s19 + $0x80] sm:$0xff]  ;;  %v253_v43 = vmul.f32 %v699_v0, %v214_v41  ;;  %v216_v45 = vld [vmem:[%s697_s19 + $0x98] sm:$0xff]  ;;  %v215_v46 = vld [vmem:[%s697_s19 + $0x90] sm:$0xff] }
  0x17   : > { %v252_v44 = vmul.f32 %v699_v0, %v213_v42  ;;  %v255_v47 = vmul.f32 %v699_v0, %v216_v45  ;;  %v254_v48 = vmul.f32 %v699_v0, %v215_v46  ;;  %v218_v49 = vld [vmem:[%s697_s19 + $0xa8] sm:$0xff]  ;;  %v217_v50 = vld [vmem:[%s697_s19 + $0xa0] sm:$0xff]  ;;  %v220_v53 = vld [vmem:[%s697_s19 + $0xb8] sm:$0xff] }
  0x18   : > { %v257_v51 = vmul.f32 %v699_v0, %v218_v49  ;;  %v256_v52 = vmul.f32 %v699_v0, %v217_v50  ;;  %v219_v54 = vld [vmem:[%s697_s19 + $0xb0] sm:$0xff]  ;;  %v259_v55 = vmul.f32 %v699_v0, %v220_v53  ;;  %v222_v57 = vld [vmem:[%s697_s19 + $0xc8] sm:$0xff]  ;;  %v221_v58 = vld [vmem:[%s697_s19 + $0xc0] sm:$0xff] }
  0x19   : > { %v258_v56 = vmul.f32 %v699_v0, %v219_v54  ;;  %v261_v59 = vmul.f32 %v699_v0, %v222_v57  ;;  %v260_v60 = vmul.f32 %v699_v0, %v221_v58  ;;  %v224_v61 = vld [vmem:[%s697_s19 + $0xd8] sm:$0xff]  ;;  %v223_v62 = vld [vmem:[%s697_s19 + $0xd0] sm:$0xff] }
  0x1a   : > { %278 = vmax.xlane.f32.xlu1 %v724_v11  ;;  %276 = vmax.xlane.f32.xlu0 %v727_v12  ;;  %v263_v63 = vmul.f32 %v699_v0, %v224_v61  ;;  %v262_v1 = vmul.f32 %v699_v0, %v223_v62 }
  0x1e   : > { %282 = vmax.xlane.f32.xlu1 %v734_v17  ;;  %280 = vmax.xlane.f32.xlu0 %v747_v22 }
  0x22   : > { %286 = vmax.xlane.f32.xlu1 %v760_v27  ;;  %284 = vmax.xlane.f32.xlu0 %v763_v28 }
  0x26   : > { %290 = vmax.xlane.f32.xlu1 %v247_v31  ;;  %288 = vmax.xlane.f32.xlu0 %v246_v32 }
  0x2a   : > { %294 = vmax.xlane.f32.xlu1 %v249_v35  ;;  %292 = vmax.xlane.f32.xlu0 %v248_v36 }
  0x2e   : > { %298 = vmax.xlane.f32.xlu1 %v251_v39  ;;  %296 = vmax.xlane.f32.xlu0 %v250_v40 }
  0x32   : > { %302 = vmax.xlane.f32.xlu1 %v253_v43  ;;  %300 = vmax.xlane.f32.xlu0 %v252_v44 }
  0x36   : > { %306 = vmax.xlane.f32.xlu1 %v255_v47  ;;  %304 = vmax.xlane.f32.xlu0 %v254_v48 }
  0x3a   : > { %310 = vmax.xlane.f32.xlu1 %v257_v51  ;;  %308 = vmax.xlane.f32.xlu0 %v256_v52 }
  0x3e   : > { %314 = vmax.xlane.f32.xlu1 %v259_v55  ;;  %312 = vmax.xlane.f32.xlu0 %v258_v56 }
  0x42   : > { %318 = vmax.xlane.f32.xlu1 %v261_v59  ;;  %316 = vmax.xlane.f32.xlu0 %v260_v60 }
  0x46   : > { %322 = vmax.xlane.f32.xlu1 %v263_v63  ;;  %320 = vmax.xlane.f32.xlu0 %v262_v1 }
  0x4a   : > { %334 = vadd.xlane.f32.xlu1 %v717_v8  ;;  %332 = vadd.xlane.f32.xlu0 %v708_v5 }
  0x4e   : > { %338 = vadd.xlane.f32.xlu1 %v714_v7  ;;  %336 = vadd.xlane.f32.xlu0 %v705_v4 }
  0x52   : > { %342 = vadd.xlane.f32.xlu1 %v724_v11  ;;  %340 = vadd.xlane.f32.xlu0 %v727_v12 }
  0x56   : > { %346 = vadd.xlane.f32.xlu1 %v734_v17  ;;  %344 = vadd.xlane.f32.xlu0 %v747_v22 }
  0x5a   : > { %350 = vadd.xlane.f32.xlu1 %v760_v27  ;;  %348 = vadd.xlane.f32.xlu0 %v763_v28 }
  0x5e   : > { %354 = vadd.xlane.f32.xlu1 %v247_v31  ;;  %352 = vadd.xlane.f32.xlu0 %v246_v32 }
  0x62   : > { %358 = vadd.xlane.f32.xlu1 %v249_v35  ;;  %356 = vadd.xlane.f32.xlu0 %v248_v36 }
  0x66   : > { %362 = vadd.xlane.f32.xlu1 %v251_v39  ;;  %360 = vadd.xlane.f32.xlu0 %v250_v40 }
  0x6a   : > { %366 = vadd.xlane.f32.xlu1 %v253_v43  ;;  %364 = vadd.xlane.f32.xlu0 %v252_v44 }
  0x6e   : > { %370 = vadd.xlane.f32.xlu1 %v255_v47  ;;  %368 = vadd.xlane.f32.xlu0 %v254_v48 }
  0x72   : > { %374 = vadd.xlane.f32.xlu1 %v257_v51  ;;  %372 = vadd.xlane.f32.xlu0 %v256_v52 }
  0x76   : > { %378 = vadd.xlane.f32.xlu1 %v259_v55  ;;  %376 = vadd.xlane.f32.xlu0 %v258_v56 }
  0x7a   : > { %382 = vadd.xlane.f32.xlu1 %v261_v59  ;;  %380 = vadd.xlane.f32.xlu0 %v260_v60 }
  0x7e   : > { %386 = vadd.xlane.f32.xlu1 %v263_v63  ;;  %384 = vadd.xlane.f32.xlu0 %v262_v1 }
  0x82   : > { %390 = vadd.xlane.f32.xlu1 %v737_v18  ;;  %388 = vadd.xlane.f32.xlu0 %v740_v19 }
  0x86   : > { %394 = vadd.xlane.f32.xlu1 %v750_v23  ;;  %392 = vadd.xlane.f32.xlu0 %v753_v24 }
  0x8a   : > { %326 = vmax.xlane.f32.xlu1 %v737_v18  ;;  %324 = vmax.xlane.f32.xlu0 %v740_v19 }
  0x8e   : > { %330 = vmax.xlane.f32.xlu1 %v750_v23  ;;  %328 = vmax.xlane.f32.xlu0 %v753_v24 }
  0x9b   : > { %v273_v0 = vpop.xlane.xlu1 %272  ;;  %v269_v2 = vpop.xlane.xlu0 %268 }
  0x9f   : > { %v275_v3 = vpop.xlane.xlu1 %274  ;;  %v271_v4 = vpop.xlane.xlu0 %270 }
  0xa3   : > { %v279_v5 = vpop.xlane.xlu1 %278  ;;  %v277_v6 = vpop.xlane.xlu0 %276 }
  0xa7   : > { %v283_v7 = vpop.xlane.xlu1 %282  ;;  %v281_v8 = vpop.xlane.xlu0 %280 }
  0xab   : > { %v287_v9 = vpop.xlane.xlu1 %286  ;;  %v285_v10 = vpop.xlane.xlu0 %284 }
  0xaf   : > { %v821_v11 = vpop.xlane.xlu1 %290  ;;  %v823_v12 = vpop.xlane.xlu0 %288 }
  0xb3   : > { %v825_v13 = vpop.xlane.xlu1 %294  ;;  %v827_v14 = vpop.xlane.xlu0 %292 }
  0xb7   : > { %v829_v15 = vpop.xlane.xlu1 %298  ;;  %v831_v16 = vpop.xlane.xlu0 %296 }
  0xbb   : > { %v833_v17 = vpop.xlane.xlu1 %302  ;;  %v835_v18 = vpop.xlane.xlu0 %300 }
  0xbf   : > { %v837_v19 = vpop.xlane.xlu1 %306  ;;  %v839_v20 = vpop.xlane.xlu0 %304 }
  0xc3   : > { %v841_v21 = vpop.xlane.xlu1 %310  ;;  %v843_v22 = vpop.xlane.xlu0 %308 }
  0xc7   : > { %v845_v23 = vpop.xlane.xlu1 %314  ;;  %v847_v24 = vpop.xlane.xlu0 %312 }
  0xcb   : > { %v849_v25 = vpop.xlane.xlu1 %318  ;;  %v851_v26 = vpop.xlane.xlu0 %316 }
  0xcf   : > { %v853_v27 = vpop.xlane.xlu1 %322  ;;  %v855_v28 = vpop.xlane.xlu0 %320 }
  0xd3   : > { %v335_v29 = vpop.xlane.xlu1 %334  ;;  %v333_v30 = vpop.xlane.xlu0 %332 }
  0xd4   : > { %v397_v31 = vmul.f32 0.0078125, %v335_v29  ;;  %v396_v32 = vmul.f32 0.0078125, %v333_v30 }
  0xd6   : > { %v430_v33 = vsel %vm428_vm0, %v271_v4, %v397_v31  ;;  %v429_v34 = vsel %vm428_vm0, %v269_v2, %v396_v32 }
  0xd7   : > { %463 = vst.msk [vmem:[%s862_s22 + $0x8] sm:$0xff] %vm461_vm1, %v430_v33  ;;  %462 = vst.msk [vmem:[%s862_s22] sm:$0xff] %vm461_vm1, %v429_v34  ;;  %v339_v35 = vpop.xlane.xlu1 %338  ;;  %v337_v36 = vpop.xlane.xlu0 %336 }
  0xd8   : > { %v399_v37 = vmul.f32 0.0078125, %v339_v35  ;;  %v398_v38 = vmul.f32 0.0078125, %v337_v36 }
  0xda   : > { %v432_v39 = vsel %vm428_vm0, %v275_v3, %v399_v37  ;;  %v431_v40 = vsel %vm428_vm0, %v273_v0, %v398_v38 }
  0xdb   : > { %465 = vst.msk [vmem:[%s862_s22 + $0x18] sm:$0xff] %vm461_vm1, %v432_v39  ;;  %464 = vst.msk [vmem:[%s862_s22 + $0x10] sm:$0xff] %vm461_vm1, %v431_v40  ;;  %v343_v41 = vpop.xlane.xlu1 %342  ;;  %v341_v42 = vpop.xlane.xlu0 %340 }
  0xdc   : > { %v401_v43 = vmul.f32 0.0078125, %v343_v41  ;;  %v400_v44 = vmul.f32 0.0078125, %v341_v42 }
  0xde   : > { %v434_v45 = vsel %vm428_vm0, %v279_v5, %v401_v43  ;;  %v433_v46 = vsel %vm428_vm0, %v277_v6, %v400_v44 }
  0xdf   : > { %467 = vst.msk [vmem:[%s862_s22 + $0x28] sm:$0xff] %vm461_vm1, %v434_v45  ;;  %466 = vst.msk [vmem:[%s862_s22 + $0x20] sm:$0xff] %vm461_vm1, %v433_v46  ;;  %v347_v47 = vpop.xlane.xlu1 %346  ;;  %v345_v48 = vpop.xlane.xlu0 %344 }
  0xe0   : > { %v403_v49 = vmul.f32 0.0078125, %v347_v47  ;;  %v402_v50 = vmul.f32 0.0078125, %v345_v48 }
  0xe2   : > { %v436_v51 = vsel %vm428_vm0, %v283_v7, %v403_v49  ;;  %v435_v52 = vsel %vm428_vm0, %v281_v8, %v402_v50 }
  0xe3   : > { %469 = vst.msk [vmem:[%s862_s22 + $0x38] sm:$0xff] %vm461_vm1, %v436_v51  ;;  %468 = vst.msk [vmem:[%s862_s22 + $0x30] sm:$0xff] %vm461_vm1, %v435_v52  ;;  %v351_v53 = vpop.xlane.xlu1 %350  ;;  %v349_v54 = vpop.xlane.xlu0 %348 }
  0xe4   : > { %v405_v55 = vmul.f32 0.0078125, %v351_v53  ;;  %v404_v56 = vmul.f32 0.0078125, %v349_v54 }
  0xe6   : > { %v438_v57 = vsel %vm428_vm0, %v287_v9, %v405_v55  ;;  %v437_v58 = vsel %vm428_vm0, %v285_v10, %v404_v56 }
  0xe7   : > { %471 = vst.msk [vmem:[%s862_s22 + $0x48] sm:$0xff] %vm461_vm1, %v438_v57  ;;  %470 = vst.msk [vmem:[%s862_s22 + $0x40] sm:$0xff] %vm461_vm1, %v437_v58  ;;  %v355_v59 = vpop.xlane.xlu1 %354  ;;  %v353_v60 = vpop.xlane.xlu0 %352 }
  0xe8   : > { %v407_v61 = vmul.f32 0.0078125, %v355_v59  ;;  %v406_v62 = vmul.f32 0.0078125, %v353_v60 }
  0xea   : > { %v440_v63 = vsel %vm428_vm0, %v821_v11, %v407_v61  ;;  %v439_v1 = vsel %vm428_vm0, %v823_v12, %v406_v62 }
  0xeb   : > { %473 = vst.msk [vmem:[%s862_s22 + $0x58] sm:$0xff] %vm461_vm1, %v440_v63  ;;  %472 = vst.msk [vmem:[%s862_s22 + $0x50] sm:$0xff] %vm461_vm1, %v439_v1  ;;  %v359_v0 = vpop.xlane.xlu1 %358  ;;  %v357_v2 = vpop.xlane.xlu0 %356 }
  0xec   : > { %v409_v3 = vmul.f32 0.0078125, %v359_v0  ;;  %v408_v4 = vmul.f32 0.0078125, %v357_v2 }
  0xee   : > { %v442_v5 = vsel %vm428_vm0, %v825_v13, %v409_v3  ;;  %v441_v6 = vsel %vm428_vm0, %v827_v14, %v408_v4 }
  0xef   : > { %475 = vst.msk [vmem:[%s862_s22 + $0x68] sm:$0xff] %vm461_vm1, %v442_v5  ;;  %474 = vst.msk [vmem:[%s862_s22 + $0x60] sm:$0xff] %vm461_vm1, %v441_v6  ;;  %v363_v7 = vpop.xlane.xlu1 %362  ;;  %v361_v8 = vpop.xlane.xlu0 %360 }
  0xf0   : > { %v411_v9 = vmul.f32 0.0078125, %v363_v7  ;;  %v410_v10 = vmul.f32 0.0078125, %v361_v8 }
  0xf2   : > { %v444_v11 = vsel %vm428_vm0, %v829_v15, %v411_v9  ;;  %v443_v12 = vsel %vm428_vm0, %v831_v16, %v410_v10 }
  0xf3   : > { %477 = vst.msk [vmem:[%s862_s22 + $0x78] sm:$0xff] %vm461_vm1, %v444_v11  ;;  %476 = vst.msk [vmem:[%s862_s22 + $0x70] sm:$0xff] %vm461_vm1, %v443_v12  ;;  %v367_v13 = vpop.xlane.xlu1 %366  ;;  %v365_v14 = vpop.xlane.xlu0 %364 }
  0xf4   : > { %v413_v29 = vmul.f32 0.0078125, %v367_v13  ;;  %v412_v30 = vmul.f32 0.0078125, %v365_v14 }
  0xf6   : > { %v446_v31 = vsel %vm428_vm0, %v833_v17, %v413_v29  ;;  %v445_v32 = vsel %vm428_vm0, %v835_v18, %v412_v30 }
  0xf7   : > { %479 = vst.msk [vmem:[%s862_s22 + $0x88] sm:$0xff] %vm461_vm1, %v446_v31  ;;  %478 = vst.msk [vmem:[%s862_s22 + $0x80] sm:$0xff] %vm461_vm1, %v445_v32  ;;  %v371_v15 = vpop.xlane.xlu1 %370  ;;  %v369_v16 = vpop.xlane.xlu0 %368 }
  0xf8   : > { %v415_v33 = vmul.f32 0.0078125, %v371_v15  ;;  %v414_v34 = vmul.f32 0.0078125, %v369_v16 }
  0xfa   : > { %v448_v35 = vsel %vm428_vm0, %v837_v19, %v415_v33  ;;  %v447_v36 = vsel %vm428_vm0, %v839_v20, %v414_v34 }
  0xfb   : > { %481 = vst.msk [vmem:[%s862_s22 + $0x98] sm:$0xff] %vm461_vm1, %v448_v35  ;;  %480 = vst.msk [vmem:[%s862_s22 + $0x90] sm:$0xff] %vm461_vm1, %v447_v36  ;;  %v375_v17 = vpop.xlane.xlu1 %374  ;;  %v373_v18 = vpop.xlane.xlu0 %372 }
  0xfc   : > { %v417_v37 = vmul.f32 0.0078125, %v375_v17  ;;  %v416_v38 = vmul.f32 0.0078125, %v373_v18 }
  0xfe   : > { %v450_v39 = vsel %vm428_vm0, %v841_v21, %v417_v37  ;;  %v449_v40 = vsel %vm428_vm0, %v843_v22, %v416_v38 }
  0xff   : > { %483 = vst.msk [vmem:[%s862_s22 + $0xa8] sm:$0xff] %vm461_vm1, %v450_v39  ;;  %482 = vst.msk [vmem:[%s862_s22 + $0xa0] sm:$0xff] %vm461_vm1, %v449_v40  ;;  %v379_v19 = vpop.xlane.xlu1 %378  ;;  %v377_v20 = vpop.xlane.xlu0 %376 }
 0x100   : > { %v419_v41 = vmul.f32 0.0078125, %v379_v19  ;;  %v418_v42 = vmul.f32 0.0078125, %v377_v20 }
 0x102   : > { %v452_v43 = vsel %vm428_vm0, %v845_v23, %v419_v41  ;;  %v451_v44 = vsel %vm428_vm0, %v847_v24, %v418_v42 }
 0x103   : > { %485 = vst.msk [vmem:[%s862_s22 + $0xb8] sm:$0xff] %vm461_vm1, %v452_v43  ;;  %484 = vst.msk [vmem:[%s862_s22 + $0xb0] sm:$0xff] %vm461_vm1, %v451_v44  ;;  %v383_v21 = vpop.xlane.xlu1 %382  ;;  %v381_v22 = vpop.xlane.xlu0 %380 }
 0x104   : > { %v421_v45 = vmul.f32 0.0078125, %v383_v21  ;;  %v420_v46 = vmul.f32 0.0078125, %v381_v22 }
 0x106   : > { %v454_v47 = vsel %vm428_vm0, %v849_v25, %v421_v45  ;;  %v453_v48 = vsel %vm428_vm0, %v851_v26, %v420_v46 }
 0x107   : > { %487 = vst.msk [vmem:[%s862_s22 + $0xc8] sm:$0xff] %vm461_vm1, %v454_v47  ;;  %486 = vst.msk [vmem:[%s862_s22 + $0xc0] sm:$0xff] %vm461_vm1, %v453_v48  ;;  %v387_v23 = vpop.xlane.xlu1 %386  ;;  %v385_v24 = vpop.xlane.xlu0 %384 }
 0x108   : > { %v423_v49 = vmul.f32 0.0078125, %v387_v23  ;;  %v422_v50 = vmul.f32 0.0078125, %v385_v24 }
 0x10a   : > { %v456_v51 = vsel %vm428_vm0, %v853_v27, %v423_v49  ;;  %v455_v52 = vsel %vm428_vm0, %v855_v28, %v422_v50 }
 0x10b   : > { %489 = vst.msk [vmem:[%s862_s22 + $0xd8] sm:$0xff] %vm461_vm1, %v456_v51  ;;  %488 = vst.msk [vmem:[%s862_s22 + $0xd0] sm:$0xff] %vm461_vm1, %v455_v52  ;;  %v391_v25 = vpop.xlane.xlu1 %390  ;;  %v389_v26 = vpop.xlane.xlu0 %388 }
 0x10c   : > { %v425_v55 = vmul.f32 0.0078125, %v391_v25  ;;  %v424_v56 = vmul.f32 0.0078125, %v389_v26 }
 0x10f   : > { %v395_v53 = vpop.xlane.xlu1 %394  ;;  %v393_v54 = vpop.xlane.xlu0 %392 }
 0x110   : > { %v427_v28 = vmul.f32 0.0078125, %v395_v53  ;;  %v426_v60 = vmul.f32 0.0078125, %v393_v54 }
 0x113   : > { %v327_v57 = vpop.xlane.xlu1 %326  ;;  %v325_v58 = vpop.xlane.xlu0 %324 }
 0x114   : > { %v458_v59 = vsel %vm428_vm0, %v327_v57, %v425_v55  ;;  %v457_v27 = vsel %vm428_vm0, %v325_v58, %v424_v56 }
 0x115   : > { %491 = vst.msk [vmem:[%s862_s22 + $0xe8] sm:$0xff] %vm461_vm1, %v458_v59  ;;  %490 = vst.msk [vmem:[%s862_s22 + $0xe0] sm:$0xff] %vm461_vm1, %v457_v27 }
 0x117   : > { %v331_v61 = vpop.xlane.xlu1 %330  ;;  %v329_v62 = vpop.xlane.xlu0 %328 }
 0x118   : > { %v460_v63 = vsel %vm428_vm0, %v331_v61, %v427_v28  ;;  %v459_v1 = vsel %vm428_vm0, %v329_v62, %v426_v60 }
 0x119   : > { %493 = vst.msk [vmem:[%s862_s22 + $0xf8] sm:$0xff] %vm461_vm1, %v460_v63  ;;  %492 = vst.msk [vmem:[%s862_s22 + $0xf0] sm:$0xff] %vm461_vm1, %v459_v1 }
 0x11a PF: > { %s12_s11 = sadd.s32 1, %s650_s11   ;;  %s990_s9 = smov %s646_s10 }
 0x11b   : > { %p9_p5 = scmp.ge.s32.totalorder %s12_s11, 4   ;;  %s991_s10 = smov %s993_s12 }
 0x11d   :  { %11 = sbr.rel (!%p9_p5) target bundleno = 2 (0x2), region = 61 }

// kernel: cbam_forward.7
= control target key start
LH: loop header
LB: loop body
LE: loop exit
PB: predicated region body
PF: predicated region fallthrough
CT: control target
= control target key end

     0   :  { %s822_s12 = smov 0   ;;  %s824_s13 = smov 0   ;;  %s1078_s0 = inlined_call_operand.vmem [shape: f32[2,256,128], index: 0, kind: input, shape index: {}, may-alias: {0,3}]   ;;  %s1079_s1 = inlined_call_operand.vmem [shape: f32[2,1,128], index: 1, kind: input, shape index: {}]   ;;  %s1080_s2 = inlined_call_operand.vmem [shape: f32[2,256,1], index: 2, kind: input, shape index: {}]   ;;  %s1081_s3 = inlined_call_operand.vmem [shape: f32[2,256,128], index: 3, kind: output, shape index: {}, may-alias: {0,3}]  }
   0x1   :  { %s826_s14 = smov 0  }
   0x2 LB: > { %s25_s15 = sadd.s32 1, %s795_s13  ;;  %p737_p0 = scmp.ge.s32.totalorder %s799_s14, 1  ;;  %s799_s14 = sphi %s826_s14, %s13_s14   ;;  %s795_s13 = sphi %s824_s13, %s1083_s13   ;;  %s791_s12 = sphi %s822_s12, %s1082_s12  }
   0x3   : > { %p27_p1 = scmp.ge.s32.totalorder %s25_s15, 2  ;;  %p183_p2 = scmp.lt.s32.totalorder %s799_s14, 3 }
   0x5   : > { %s1085_s15 = smov (%p27_p1, %s25_s15), 0  ;;  %p184_p3 = pnand %p737_p0, %p183_p2 }
   0x6   : > { %p228_p4 = scmp.lt.s32.totalorder (!%p184_p3), %s791_s12, 1 }
   0x7   : > { %187 = sbr.rel (%p184_p3) target bundleno = 207 (0xcf), region = 32 }
   0xc   : > { %v801_v0 = vmov 0   ;;  %s1087_s12 = smov (!%p228_p4, %s791_s12), 1 }
   0xd   : > { %776 = vset.pattern.permute.xlu1 %v801_v0  ;;  %775 = vset.pattern.permute.xlu0 %v801_v0  ;;  %s843_s16 = sshll.u32 %s1087_s12, 8  ;;  %s239_s22 = scalar_lea.vmem %s1079_s1, %s1087_s12 }
   0xe   : > { %s849_s19 = scalar_lea.vmem %s1080_s2, %s843_s16  ;;  %s891_s25 = scalar_lea.vmem %s1078_s0, %s843_s16  ;;  %v893_v33 = vld [vmem:[%s239_s22] ss:$0 sm:$0xff] }
   0xf   : > { %v295_v1 = vld [vmem:[%s849_s19 + $0x10] sm:$0xff]  ;;  %v293_v2 = vld [vmem:[%s849_s19] sm:$0xff]  ;;  %v296_v3 = vld [vmem:[%s849_s19 + $0x18] sm:$0xff]  ;;  %s972_s28 = scalar_lea.vmem %s1081_s3, %s843_s16 }
  0x10   : > { %343 = vperm.xlu1 %776, %v295_v1   ;;  %333 = vperm.xlu0 %775, %v293_v2   ;;  %v294_v4 = vld [vmem:[%s849_s19 + $0x8] sm:$0xff]  ;;  %v297_v6 = vld [vmem:[%s849_s19 + $0x20] sm:$0xff]  ;;  %v300_v7 = vld [vmem:[%s849_s19 + $0x38] sm:$0xff] }
  0x11   : > { %v298_v5 = vld [vmem:[%s849_s19 + $0x28] sm:$0xff]  ;;  %v299_v8 = vld [vmem:[%s849_s19 + $0x30] sm:$0xff]  ;;  %v301_v10 = vld [vmem:[%s849_s19 + $0x40] sm:$0xff] }
  0x12   : > { %v302_v9 = vld [vmem:[%s849_s19 + $0x48] sm:$0xff]  ;;  %v304_v11 = vld [vmem:[%s849_s19 + $0x58] sm:$0xff]  ;;  %v303_v12 = vld [vmem:[%s849_s19 + $0x50] sm:$0xff] }
  0x13   : > { %v306_v13 = vld [vmem:[%s849_s19 + $0x68] sm:$0xff]  ;;  %v305_v14 = vld [vmem:[%s849_s19 + $0x60] sm:$0xff]  ;;  %v308_v15 = vld [vmem:[%s849_s19 + $0x78] sm:$0xff] }
  0x14   : > { %348 = vperm.xlu1 %776, %v296_v3   ;;  %338 = vperm.xlu0 %775, %v294_v4   ;;  %v307_v16 = vld [vmem:[%s849_s19 + $0x70] sm:$0xff]  ;;  %v310_v17 = vld [vmem:[%s849_s19 + $0x88] sm:$0xff]  ;;  %v309_v18 = vld [vmem:[%s849_s19 + $0x80] sm:$0xff] }
  0x15   : > { %v312_v19 = vld [vmem:[%s849_s19 + $0x98] sm:$0xff]  ;;  %v311_v20 = vld [vmem:[%s849_s19 + $0x90] sm:$0xff]  ;;  %v314_v21 = vld [vmem:[%s849_s19 + $0xa8] sm:$0xff] }
  0x16   : > { %v313_v22 = vld [vmem:[%s849_s19 + $0xa0] sm:$0xff]  ;;  %v316_v23 = vld [vmem:[%s849_s19 + $0xb8] sm:$0xff]  ;;  %v315_v24 = vld [vmem:[%s849_s19 + $0xb0] sm:$0xff] }
  0x17   : > { %v318_v25 = vld [vmem:[%s849_s19 + $0xc8] sm:$0xff]  ;;  %v317_v26 = vld [vmem:[%s849_s19 + $0xc0] sm:$0xff]  ;;  %v320_v27 = vld [vmem:[%s849_s19 + $0xd8] sm:$0xff] }
  0x18   : > { %358 = vperm.xlu1 %776, %v298_v5   ;;  %353 = vperm.xlu0 %775, %v297_v6   ;;  %v319_v28 = vld [vmem:[%s849_s19 + $0xd0] sm:$0xff]  ;;  %v322_v29 = vld [vmem:[%s849_s19 + $0xe8] sm:$0xff]  ;;  %v321_v30 = vld [vmem:[%s849_s19 + $0xe0] sm:$0xff] }
  0x19   : > { %v324_v31 = vld [vmem:[%s849_s19 + $0xf8] sm:$0xff]  ;;  %v323_v32 = vld [vmem:[%s849_s19 + $0xf0] sm:$0xff]  ;;  %v260_v38 = vld [vmem:[%s891_s25] sm:$0xff] }
  0x1a   : > { %v262_v36 = vld [vmem:[%s891_s25 + $0x10] sm:$0xff]  ;;  %v263_v40 = vld [vmem:[%s891_s25 + $0x18] sm:$0xff]  ;;  %v261_v41 = vld [vmem:[%s891_s25 + $0x8] sm:$0xff] }
  0x1b   : > { %v265_v42 = vld [vmem:[%s891_s25 + $0x28] sm:$0xff]  ;;  %v264_v43 = vld [vmem:[%s891_s25 + $0x20] sm:$0xff]  ;;  %v267_v44 = vld [vmem:[%s891_s25 + $0x38] sm:$0xff] }
  0x1c   : > { %368 = vperm.xlu1 %776, %v300_v7   ;;  %363 = vperm.xlu0 %775, %v299_v8   ;;  %v266_v45 = vld [vmem:[%s891_s25 + $0x30] sm:$0xff]  ;;  %v906_v46 = vld [vmem:[%s891_s25 + $0x48] sm:$0xff]  ;;  %v909_v47 = vld [vmem:[%s891_s25 + $0x40] sm:$0xff] }
  0x1d   : > { %v912_v48 = vld [vmem:[%s891_s25 + $0x58] sm:$0xff]  ;;  %v915_v49 = vld [vmem:[%s891_s25 + $0x50] sm:$0xff]  ;;  %v918_v50 = vld [vmem:[%s891_s25 + $0x68] sm:$0xff] }
  0x1e   : > { %v921_v51 = vld [vmem:[%s891_s25 + $0x60] sm:$0xff]  ;;  %v924_v52 = vld [vmem:[%s891_s25 + $0x78] sm:$0xff]  ;;  %v927_v53 = vld [vmem:[%s891_s25 + $0x70] sm:$0xff] }
  0x1f   : > { %v930_v54 = vld [vmem:[%s891_s25 + $0x88] sm:$0xff]  ;;  %v933_v55 = vld [vmem:[%s891_s25 + $0x80] sm:$0xff]  ;;  %v936_v56 = vld [vmem:[%s891_s25 + $0x98] sm:$0xff] }
  0x20   : > { %378 = vperm.xlu1 %776, %v302_v9   ;;  %373 = vperm.xlu0 %775, %v301_v10   ;;  %v939_v57 = vld [vmem:[%s891_s25 + $0x90] sm:$0xff]  ;;  %v942_v58 = vld [vmem:[%s891_s25 + $0xa8] sm:$0xff]  ;;  %v945_v59 = vld [vmem:[%s891_s25 + $0xa0] sm:$0xff] }
  0x21   : > { %v948_v60 = vld [vmem:[%s891_s25 + $0xb8] sm:$0xff]  ;;  %v951_v61 = vld [vmem:[%s891_s25 + $0xb0] sm:$0xff]  ;;  %v954_v62 = vld [vmem:[%s891_s25 + $0xc8] sm:$0xff] }
  0x22   : > { %v957_v63 = vld [vmem:[%s891_s25 + $0xc0] sm:$0xff]  ;;  %v960_v2 = vld [vmem:[%s891_s25 + $0xd8] sm:$0xff]  ;;  %v963_v3 = vld [vmem:[%s891_s25 + $0xd0] sm:$0xff] }
  0x23   : > { %v966_v4 = vld [vmem:[%s891_s25 + $0xe8] sm:$0xff]  ;;  %v975_v7 = vld [vmem:[%s891_s25 + $0xe0] sm:$0xff]  ;;  %v978_v8 = vld [vmem:[%s891_s25 + $0xf8] sm:$0xff] }
  0x24   : > { %388 = vperm.xlu1 %776, %v304_v11   ;;  %383 = vperm.xlu0 %775, %v303_v12   ;;  %v981_v9 = vld [vmem:[%s891_s25 + $0xf0] sm:$0xff] }
  0x28   : > { %398 = vperm.xlu1 %776, %v306_v13   ;;  %393 = vperm.xlu0 %775, %v305_v14  }
  0x2c   : > { %408 = vperm.xlu1 %776, %v308_v15   ;;  %403 = vperm.xlu0 %775, %v307_v16  }
  0x30   : > { %418 = vperm.xlu1 %776, %v310_v17   ;;  %413 = vperm.xlu0 %775, %v309_v18  }
  0x34   : > { %428 = vperm.xlu1 %776, %v312_v19   ;;  %423 = vperm.xlu0 %775, %v311_v20  }
  0x38   : > { %438 = vperm.xlu1 %776, %v314_v21   ;;  %433 = vperm.xlu0 %775, %v313_v22  }
  0x3c   : > { %448 = vperm.xlu1 %776, %v316_v23   ;;  %443 = vperm.xlu0 %775, %v315_v24  }
  0x40   : > { %458 = vperm.xlu1 %776, %v318_v25   ;;  %453 = vperm.xlu0 %775, %v317_v26  }
  0x44   : > { %468 = vperm.xlu1 %776, %v320_v27   ;;  %463 = vperm.xlu0 %775, %v319_v28  }
  0x48   : > { %478 = vperm.xlu1 %776, %v322_v29   ;;  %473 = vperm.xlu0 %775, %v321_v30  }
  0x4c   : > { %488 = vperm.xlu1 %776, %v324_v31   ;;  %483 = vperm.xlu0 %775, %v323_v32  }
  0x8b   : > { %v344_v34 = vpop.permute.xlu1 %343  ;;  %v334_v35 = vpop.permute.xlu0 %333 }
  0x8c   : > { %v493_v37 = vmul.f32 %v893_v33, %v344_v34  ;;  %v491_v39 = vmul.f32 %v893_v33, %v334_v35 }
  0x8e   : > { %v525_v0 = vadd.f32 1.0, %v493_v37  ;;  %v523_v1 = vadd.f32 1.0, %v491_v39 }
  0x8f   : > { %v349_v5 = vpop.permute.xlu1 %348  ;;  %v339_v6 = vpop.permute.xlu0 %338 }
  0x90   : > { %v557_v10 = vmul.f32 %v525_v0, %v262_v36  ;;  %v555_v11 = vmul.f32 %v523_v1, %v260_v38  ;;  %v494_v12 = vmul.f32 %v893_v33, %v349_v5  ;;  %v492_v13 = vmul.f32 %v893_v33, %v339_v6 }
  0x92   : > { %v526_v14 = vadd.f32 1.0, %v494_v12  ;;  %v524_v15 = vadd.f32 1.0, %v492_v13  ;;  %587 = vst [vmem:[%s972_s28] sm:$0xff] %v555_v11  ;;  %589 = vst [vmem:[%s972_s28 + $0x10] sm:$0xff] %v557_v10 }
  0x93   : > { %v359_v16 = vpop.permute.xlu1 %358  ;;  %v354_v17 = vpop.permute.xlu0 %353 }
  0x94   : > { %v558_v18 = vmul.f32 %v526_v14, %v263_v40  ;;  %v556_v19 = vmul.f32 %v524_v15, %v261_v41  ;;  %v496_v20 = vmul.f32 %v893_v33, %v359_v16  ;;  %v495_v21 = vmul.f32 %v893_v33, %v354_v17 }
  0x96   : > { %v528_v22 = vadd.f32 1.0, %v496_v20  ;;  %v527_v23 = vadd.f32 1.0, %v495_v21  ;;  %588 = vst [vmem:[%s972_s28 + $0x8] sm:$0xff] %v556_v19  ;;  %590 = vst [vmem:[%s972_s28 + $0x18] sm:$0xff] %v558_v18 }
  0x97   : > { %v369_v24 = vpop.permute.xlu1 %368  ;;  %v364_v25 = vpop.permute.xlu0 %363 }
  0x98   : > { %v560_v26 = vmul.f32 %v528_v22, %v265_v42  ;;  %v559_v27 = vmul.f32 %v527_v23, %v264_v43  ;;  %v498_v28 = vmul.f32 %v893_v33, %v369_v24  ;;  %v497_v29 = vmul.f32 %v893_v33, %v364_v25 }
  0x9a   : > { %v530_v30 = vadd.f32 1.0, %v498_v28  ;;  %v529_v31 = vadd.f32 1.0, %v497_v29  ;;  %591 = vst [vmem:[%s972_s28 + $0x20] sm:$0xff] %v559_v27  ;;  %592 = vst [vmem:[%s972_s28 + $0x28] sm:$0xff] %v560_v26 }
  0x9b   : > { %v379_v32 = vpop.permute.xlu1 %378  ;;  %v374_v34 = vpop.permute.xlu0 %373 }
  0x9c   : > { %v562_v35 = vmul.f32 %v530_v30, %v267_v44  ;;  %v561_v36 = vmul.f32 %v529_v31, %v266_v45  ;;  %v500_v37 = vmul.f32 %v893_v33, %v379_v32  ;;  %v499_v38 = vmul.f32 %v893_v33, %v374_v34 }
  0x9e   : > { %v532_v39 = vadd.f32 1.0, %v500_v37  ;;  %v531_v40 = vadd.f32 1.0, %v499_v38  ;;  %593 = vst [vmem:[%s972_s28 + $0x30] sm:$0xff] %v561_v36  ;;  %594 = vst [vmem:[%s972_s28 + $0x38] sm:$0xff] %v562_v35 }
  0x9f   : > { %v389_v41 = vpop.permute.xlu1 %388  ;;  %v384_v42 = vpop.permute.xlu0 %383 }
  0xa0   : > { %v564_v43 = vmul.f32 %v532_v39, %v906_v46  ;;  %v563_v0 = vmul.f32 %v531_v40, %v909_v47  ;;  %v502_v44 = vmul.f32 %v893_v33, %v389_v41  ;;  %v501_v45 = vmul.f32 %v893_v33, %v384_v42 }
  0xa2   : > { %v534_v1 = vadd.f32 1.0, %v502_v44  ;;  %v533_v5 = vadd.f32 1.0, %v501_v45  ;;  %595 = vst [vmem:[%s972_s28 + $0x40] sm:$0xff] %v563_v0  ;;  %596 = vst [vmem:[%s972_s28 + $0x48] sm:$0xff] %v564_v43 }
  0xa3   : > { %v399_v6 = vpop.permute.xlu1 %398  ;;  %v394_v10 = vpop.permute.xlu0 %393 }
  0xa4   : > { %v566_v11 = vmul.f32 %v534_v1, %v912_v48  ;;  %v565_v12 = vmul.f32 %v533_v5, %v915_v49  ;;  %v504_v46 = vmul.f32 %v893_v33, %v399_v6  ;;  %v503_v47 = vmul.f32 %v893_v33, %v394_v10 }
  0xa6   : > { %v536_v13 = vadd.f32 1.0, %v504_v46  ;;  %v535_v14 = vadd.f32 1.0, %v503_v47  ;;  %597 = vst [vmem:[%s972_s28 + $0x50] sm:$0xff] %v565_v12  ;;  %598 = vst [vmem:[%s972_s28 + $0x58] sm:$0xff] %v566_v11 }
  0xa7   : > { %v409_v15 = vpop.permute.xlu1 %408  ;;  %v404_v16 = vpop.permute.xlu0 %403 }
  0xa8   : > { %v568_v17 = vmul.f32 %v536_v13, %v918_v50  ;;  %v567_v18 = vmul.f32 %v535_v14, %v921_v51  ;;  %v506_v48 = vmul.f32 %v893_v33, %v409_v15  ;;  %v505_v49 = vmul.f32 %v893_v33, %v404_v16 }
  0xaa   : > { %v538_v19 = vadd.f32 1.0, %v506_v48  ;;  %v537_v20 = vadd.f32 1.0, %v505_v49  ;;  %599 = vst [vmem:[%s972_s28 + $0x60] sm:$0xff] %v567_v18  ;;  %600 = vst [vmem:[%s972_s28 + $0x68] sm:$0xff] %v568_v17 }
  0xab   : > { %v419_v21 = vpop.permute.xlu1 %418  ;;  %v414_v22 = vpop.permute.xlu0 %413 }
  0xac   : > { %v570_v23 = vmul.f32 %v538_v19, %v924_v52  ;;  %v569_v24 = vmul.f32 %v537_v20, %v927_v53  ;;  %v508_v50 = vmul.f32 %v893_v33, %v419_v21  ;;  %v507_v51 = vmul.f32 %v893_v33, %v414_v22 }
  0xae   : > { %v540_v25 = vadd.f32 1.0, %v508_v50  ;;  %v539_v26 = vadd.f32 1.0, %v507_v51  ;;  %601 = vst [vmem:[%s972_s28 + $0x70] sm:$0xff] %v569_v24  ;;  %602 = vst [vmem:[%s972_s28 + $0x78] sm:$0xff] %v570_v23 }
  0xaf   : > { %v429_v27 = vpop.permute.xlu1 %428  ;;  %v424_v28 = vpop.permute.xlu0 %423 }
  0xb0   : > { %v572_v29 = vmul.f32 %v540_v25, %v930_v54  ;;  %v571_v30 = vmul.f32 %v539_v26, %v933_v55  ;;  %v510_v52 = vmul.f32 %v893_v33, %v429_v27  ;;  %v509_v53 = vmul.f32 %v893_v33, %v424_v28 }
  0xb2   : > { %v542_v31 = vadd.f32 1.0, %v510_v52  ;;  %v541_v32 = vadd.f32 1.0, %v509_v53  ;;  %603 = vst [vmem:[%s972_s28 + $0x80] sm:$0xff] %v571_v30  ;;  %604 = vst [vmem:[%s972_s28 + $0x88] sm:$0xff] %v572_v29 }
  0xb3   : > { %v439_v34 = vpop.permute.xlu1 %438  ;;  %v434_v35 = vpop.permute.xlu0 %433 }
  0xb4   : > { %v574_v36 = vmul.f32 %v542_v31, %v936_v56  ;;  %v573_v37 = vmul.f32 %v541_v32, %v939_v57  ;;  %v512_v54 = vmul.f32 %v893_v33, %v439_v34  ;;  %v511_v55 = vmul.f32 %v893_v33, %v434_v35 }
  0xb6   : > { %v544_v38 = vadd.f32 1.0, %v512_v54  ;;  %v543_v39 = vadd.f32 1.0, %v511_v55  ;;  %605 = vst [vmem:[%s972_s28 + $0x90] sm:$0xff] %v573_v37  ;;  %606 = vst [vmem:[%s972_s28 + $0x98] sm:$0xff] %v574_v36 }
  0xb7   : > { %v449_v40 = vpop.permute.xlu1 %448  ;;  %v444_v41 = vpop.permute.xlu0 %443 }
  0xb8   : > { %v576_v42 = vmul.f32 %v544_v38, %v942_v58  ;;  %v575_v43 = vmul.f32 %v543_v39, %v945_v59  ;;  %v514_v56 = vmul.f32 %v893_v33, %v449_v40  ;;  %v513_v57 = vmul.f32 %v893_v33, %v444_v41 }
  0xba   : > { %v546_v0 = vadd.f32 1.0, %v514_v56  ;;  %v545_v44 = vadd.f32 1.0, %v513_v57  ;;  %607 = vst [vmem:[%s972_s28 + $0xa0] sm:$0xff] %v575_v43  ;;  %608 = vst [vmem:[%s972_s28 + $0xa8] sm:$0xff] %v576_v42 }
  0xbb   : > { %v459_v45 = vpop.permute.xlu1 %458  ;;  %v454_v1 = vpop.permute.xlu0 %453 }
  0xbc   : > { %v578_v5 = vmul.f32 %v546_v0, %v948_v60  ;;  %v577_v6 = vmul.f32 %v545_v44, %v951_v61  ;;  %v516_v58 = vmul.f32 %v893_v33, %v459_v45  ;;  %v515_v59 = vmul.f32 %v893_v33, %v454_v1 }
  0xbe   : > { %v548_v10 = vadd.f32 1.0, %v516_v58  ;;  %v547_v11 = vadd.f32 1.0, %v515_v59  ;;  %609 = vst [vmem:[%s972_s28 + $0xb0] sm:$0xff] %v577_v6  ;;  %610 = vst [vmem:[%s972_s28 + $0xb8] sm:$0xff] %v578_v5 }
  0xbf   : > { %v469_v12 = vpop.permute.xlu1 %468  ;;  %v464_v46 = vpop.permute.xlu0 %463 }
  0xc0   : > { %v580_v47 = vmul.f32 %v548_v10, %v954_v62  ;;  %v579_v13 = vmul.f32 %v547_v11, %v957_v63  ;;  %v518_v60 = vmul.f32 %v893_v33, %v469_v12  ;;  %v517_v61 = vmul.f32 %v893_v33, %v464_v46 }
  0xc2   : > { %v550_v14 = vadd.f32 1.0, %v518_v60  ;;  %v549_v15 = vadd.f32 1.0, %v517_v61  ;;  %611 = vst [vmem:[%s972_s28 + $0xc0] sm:$0xff] %v579_v13  ;;  %612 = vst [vmem:[%s972_s28 + $0xc8] sm:$0xff] %v580_v47 }
  0xc3   : > { %v479_v16 = vpop.permute.xlu1 %478  ;;  %v474_v17 = vpop.permute.xlu0 %473 }
  0xc4   : > { %v582_v18 = vmul.f32 %v550_v14, %v960_v2  ;;  %v581_v48 = vmul.f32 %v549_v15, %v963_v3  ;;  %v520_v62 = vmul.f32 %v893_v33, %v479_v16  ;;  %v519_v63 = vmul.f32 %v893_v33, %v474_v17 }
  0xc6   : > { %v552_v49 = vadd.f32 1.0, %v520_v62  ;;  %v551_v19 = vadd.f32 1.0, %v519_v63  ;;  %613 = vst [vmem:[%s972_s28 + $0xd0] sm:$0xff] %v581_v48  ;;  %614 = vst [vmem:[%s972_s28 + $0xd8] sm:$0xff] %v582_v18 }
  0xc7   : > { %v489_v20 = vpop.permute.xlu1 %488  ;;  %v484_v21 = vpop.permute.xlu0 %483 }
  0xc8   : > { %v584_v22 = vmul.f32 %v552_v49, %v966_v4  ;;  %v583_v2 = vmul.f32 %v551_v19, %v975_v7  ;;  %v522_v23 = vmul.f32 %v893_v33, %v489_v20  ;;  %v521_v3 = vmul.f32 %v893_v33, %v484_v21 }
  0xca   : > { %v554_v24 = vadd.f32 1.0, %v522_v23  ;;  %v553_v50 = vadd.f32 1.0, %v521_v3  ;;  %615 = vst [vmem:[%s972_s28 + $0xe0] sm:$0xff] %v583_v2  ;;  %616 = vst [vmem:[%s972_s28 + $0xe8] sm:$0xff] %v584_v22 }
  0xcc   : > { %v586_v51 = vmul.f32 %v554_v24, %v978_v8  ;;  %v585_v25 = vmul.f32 %v553_v50, %v981_v9 }
  0xce   : > { %617 = vst [vmem:[%s972_s28 + $0xf0] sm:$0xff] %v585_v25  ;;  %618 = vst [vmem:[%s972_s28 + $0xf8] sm:$0xff] %v586_v51 }
  0xcf PF: > { %s13_s14 = sadd.s32 1, %s799_s14   ;;  %s1082_s12 = smov %s795_s13 }
  0xd0   : > { %p10_p5 = scmp.ge.s32.totalorder %s13_s14, 4   ;;  %s1083_s13 = smov %s1085_s15 }
  0xd2   :  { %12 = sbr.rel (!%p10_p5) target bundleno = 2 (0x2), region = 68 }

// kernel: cbam_forward.6
= control target key start
LH: loop header
LB: loop body
LE: loop exit
PB: predicated region body
PF: predicated region fallthrough
CT: control target
= control target key end

     0   :  { %s3599_s0 = inlined_call_operand.vmem [shape: f32[2,22,22], index: 0, kind: input, shape index: {}]   ;;  %s3600_s1 = inlined_call_operand.vmem [shape: f32[2,22,22], index: 1, kind: input, shape index: {}]   ;;  %s3601_s2 = inlined_call_operand.vmem [shape: f32[2,49], index: 2, kind: input, shape index: {}]   ;;  %s3602_s3 = inlined_call_operand.<no memory space> [shape: f32[1,1], index: 3, kind: input, shape index: {}]   ;;  %s3603_s4 = inlined_call_operand.vmem [shape: f32[2,16,16], index: 4, kind: output, shape index: {}]  }
   0x1   :  { %9 = sst [smem:[#allocation2]] %s3602_s3 }
   0x2   :  { %10 = vsyncpa [#allocation4], 0  ;;  %s2458_s17 = smov 0  }
   0x3 LB: > { %s2239_s18 = sadd.s32 4294967295, %s2421_s17   ;;  %p2241_p0 = scmp.ge.s32.totalorder %s2421_s17, 1  ;;  %s2421_s17 = sphi %s2458_s17, %s16_s17  }
   0x4   : > { %p141_p1 = scmp.lt.s32.totalorder %s2421_s17, 3  ;;  %s154_s21 = sshll.u32 %s3601_s2, 4  ;;  %s155_s21 = int_to_ptr.vmem [resolvable:$true] %s154_s21 }
   0x5   : > { %p2359_p3 = scmp.eq.s32.totalorder %s2239_s18, 0  ;;  %s2396_s22 = scalar_lea.vmem %s155_s21, 32 }
   0x6   : > { %p2469_p2 = pnand %p2241_p0, %p141_p1  ;;  %p2397_p6 = scmp.ne.s32.totalorder %s155_s21, %s2396_s22 }
   0x7   : > { %p2404_p10 = scmp.lt.s32.totalorder %s155_s21, %s155_s21  ;;  %p2405_p11 = scmp.lt.s32.totalorder %s2396_s22, %s2396_s22 }
   0x8   : > { %p2355_p4 = pneg %p2469_p2 }
   0x9   : > { %p2406_p12 = por %p2405_p11, %p2404_p10 }
   0xa   : > { %p2356_p5 = pnand %p2359_p3, %p2355_p4 }
   0xc   : > { %p2398_p7 = pneg %p2356_p5 }
   0xe   : > { %p2399_p8 = pnand %p2398_p7, %p2397_p6 }
  0x10   : > { %p2400_p9 = pneg %p2399_p8 }
  0x12   : > { %p2407_p13 = pnand %p2406_p12, %p2400_p9 }
  0x14   : > { %2410 = shalt.err (!%p2407_p13)
}
  0x15   : > { %s2423_s23 = smov [#allocation3]   ;;  %186 = sbr.rel (%p2469_p2) target bundleno = 525 (0x20d), region = 36 }
  0x16   : > { %2358 = dma.vmem_to_smem (!%p2356_p5), %s155_s21, 32, %s2423_s23, [#allocation4]  }
  0x1a   : > { %2416 = dma.done.wait (%p2359_p3), [#allocation4], 32  }
  0x1b   : > { %2418 = vsyncadd (%p2359_p3), [#allocation4], 4294967264 }
  0x1c   : > { %192 = sfence }
  0x1d   : > { %p218_p0 = scmp.lt.s32.totalorder %s2239_s18, 1  ;;  %s2252_s24 = sld [smem:[#allocation3 + $0x81]]  ;;  %vm427_vm0 = vcmask 1046528   ;;  %vm714_vm1 = vcmask 1045504   ;;  %vm1001_vm2 = vcmask 1044480   ;;  %vm1288_vm3 = vcmask 1043456  }
  0x1e   : > { %s2251_s25 = sld [smem:[#allocation3 + $0x1]]  ;;  %s2424_s9 = smov 127   ;;  %vm1575_vm4 = vcmask 1042432   ;;  %vm1862_vm5 = vcmask 1041408   ;;  %vm2157_vm6 = vcmask 130048  }
  0x1f   : > { %s3606_s18 = smov (!%p218_p0, %s2239_s18), 1  ;;  %s2253_s27 = sld [smem:[#allocation3 + $0x2]] }
  0x20   : > { %s2350_s26 = smul.u32 24, %s3606_s18  ;;  %s2254_s8 = sld [smem:[#allocation3 + $0x82]] }
  0x21   : > { %s2255_s10 = sld [smem:[#allocation3 + $0x3]]  ;;  %s2425_s12 = smov 126  }
  0x22   : > { %s2486_s30 = scalar_lea.vmem %s3600_s1, %s2350_s26  ;;  %s2491_s7 = scalar_lea.vmem %s3599_s0, %s2350_s26 }
  0x23   : > { %v2494_v0 = vld [vmem:[%s2486_s30] sm:$0xff]  ;;  %v2497_v1 = vld [vmem:[%s2486_s30 + $0x8] sm:$0xff]  ;;  %v266_v2 = vstv %s2252_s24  ;;  %s2256_s11 = sld [smem:[#allocation3 + $0x83]]  ;;  %s2426_s15 = smov 125   ;;  %v2546_v35 = vld [vmem:[%s2491_s7 + $0x10] sm:$0x3f] }
  0x24   : > { %v2500_v3 = vld [vmem:[%s2491_s7] sm:$0xff]  ;;  %v267_v4 = vmul.f32 %v266_v2, %v2494_v0  ;;  %v2504_v5 = vld [vmem:[%s2491_s7 + $0x8] sm:$0xff]  ;;  %v252_v6 = vstv %s2251_s25  ;;  %v268_v7 = vmul.f32 %v266_v2, %v2497_v1  ;;  %s2257_s13 = sld [smem:[#allocation3 + $0x4]]  ;;  %s2427_s20 = smov 124   ;;  %v2556_v43 = vld [vmem:[%s2486_s30 + $0x10] sm:$0x3f] }
  0x25   : > { %v253_v8 = vmul.f32 %v252_v6, %v2500_v3  ;;  %v280_v9 = vstv %s2253_s27  ;;  %v254_v10 = vmul.f32 %v252_v6, %v2504_v5  ;;  %s2258_s14 = sld [smem:[#allocation3 + $0x84]]  ;;  %s2428_s24 = smov 123  }
  0x26   : > { %271 = vrot.lane.b32.xlu1 %v267_v4, %s2424_s9  ;;  %v282_v11 = vmul.f32 %v280_v9, %v2504_v5  ;;  %v294_v12 = vstv %s2254_s8  ;;  %v281_v13 = vmul.f32 %v280_v9, %v2500_v3  ;;  %s2259_s16 = sld [smem:[#allocation3 + $0x5]]  ;;  %s2429_s27 = smov 122  }
  0x27   : > { %257 = vrot.lane.b32.xlu0 %v253_v8, %s2424_s9  ;;  %v296_v14 = vmul.f32 %v294_v12, %v2497_v1  ;;  %v308_v15 = vstv %s2255_s10  ;;  %v295_v16 = vmul.f32 %v294_v12, %v2494_v0  ;;  %s2260_s19 = sld [smem:[#allocation3 + $0x85]] }
  0x28   : > { %v310_v17 = vmul.f32 %v308_v15, %v2504_v5  ;;  %v309_v19 = vmul.f32 %v308_v15, %v2500_v3  ;;  %s2261_s21 = sld [smem:[#allocation3 + $0x6]] }
  0x29   : > { %v322_v18 = vstv %s2256_s11  ;;  %s2265_s3 = sld [smem:[#allocation3 + $0x8]] }
  0x2a   : > { %273 = vrot.lane.b32.xlu1 %v268_v7, %s2424_s9  ;;  %v324_v20 = vmul.f32 %v322_v18, %v2497_v1  ;;  %v336_v21 = vstv %s2257_s13  ;;  %v323_v22 = vmul.f32 %v322_v18, %v2494_v0  ;;  %s2537_s22 = sld [smem:[#allocation3 + $0x86]] }
  0x2b   : > { %259 = vrot.lane.b32.xlu0 %v254_v10, %s2424_s9  ;;  %v338_v23 = vmul.f32 %v336_v21, %v2504_v5  ;;  %v350_v24 = vstv %s2258_s14  ;;  %v337_v25 = vmul.f32 %v336_v21, %v2500_v3  ;;  %s2266_s23 = sld [smem:[#allocation3 + $0x88]] }
  0x2c   : > { %v352_v26 = vmul.f32 %v350_v24, %v2497_v1  ;;  %v364_v27 = vstv %s2259_s16  ;;  %v351_v28 = vmul.f32 %v350_v24, %v2494_v0  ;;  %s2267_s25 = sld [smem:[#allocation3 + $0x9]] }
  0x2d   : > { %v366_v29 = vmul.f32 %v364_v27, %v2504_v5  ;;  %v378_v30 = vstv %s2260_s19  ;;  %v365_v31 = vmul.f32 %v364_v27, %v2500_v3  ;;  %s2268_s26 = sld [smem:[#allocation3 + $0x89]] }
  0x2e   : > { %287 = vrot.lane.b32.xlu1 %v282_v11, %s2425_s12  ;;  %v380_v32 = vmul.f32 %v378_v30, %v2497_v1  ;;  %v392_v33 = vstv %s2261_s21  ;;  %v379_v34 = vmul.f32 %v378_v30, %v2494_v0  ;;  %s2269_s28 = sld [smem:[#allocation3 + $0xa]] }
  0x2f   : > { %285 = vrot.lane.b32.xlu0 %v281_v13, %s2425_s12  ;;  %v455_v36 = vstv %s2265_s3  ;;  %v394_v37 = vmul.f32 %v392_v33, %v2504_v5  ;;  %v393_v42 = vmul.f32 %v392_v33, %v2500_v3  ;;  %s2270_s29 = sld [smem:[#allocation3 + $0x8a]] }
  0x30   : > { %v406_v38 = vstv %s2537_s22  ;;  %v457_v39 = vmul.f32 %v455_v36, %v2504_v5  ;;  %v458_v40 = vmul.f32 %v455_v36, %v2546_v35  ;;  %v456_v44 = vmul.f32 %v455_v36, %v2500_v3  ;;  %s2271_s5 = sld [smem:[#allocation3 + $0xb]] }
  0x31   : > { %v476_v41 = vstv %s2266_s23  ;;  %v408_v45 = vmul.f32 %v406_v38, %v2497_v1  ;;  %v407_v51 = vmul.f32 %v406_v38, %v2494_v0  ;;  %s2272_s6 = sld [smem:[#allocation3 + $0x8b]] }
  0x32   : > { %301 = vrot.lane.b32.xlu1 %v296_v14, %s2425_s12  ;;  %v478_v46 = vmul.f32 %v476_v41, %v2497_v1  ;;  %v463_v47 = vrot.slane %v457_v39, 1  ;;  %v465_v48 = vrot.slane %v458_v40, 1  ;;  %v479_v49 = vmul.f32 %v476_v41, %v2556_v43  ;;  %s2273_s8 = sld [smem:[#allocation3 + $0xc]] }
  0x33   : > { %299 = vrot.lane.b32.xlu0 %v295_v16, %s2425_s12  ;;  %v497_v50 = vstv %s2267_s25  ;;  %v462_v52 = vrot.slane %v456_v44, 1  ;;  %v477_v53 = vmul.f32 %v476_v41, %v2494_v0  ;;  %v518_v59 = vstv %s2268_s26  ;;  %s2274_s10 = sld [smem:[#allocation3 + $0x8c]] }
  0x34   : > { %v499_v54 = vmul.f32 %v497_v50, %v2504_v5  ;;  %v500_v55 = vmul.f32 %v497_v50, %v2546_v35  ;;  %v466_v56 = vsel %vm427_vm0, %v463_v47, %v465_v48  ;;  %v484_v57 = vrot.slane %v478_v46, 1  ;;  %s2275_s11 = sld [smem:[#allocation3 + $0xd]] }
  0x35   : > { %v486_v58 = vrot.slane %v479_v49, 1  ;;  %v464_v60 = vsel %vm427_vm0, %v462_v52, %v463_v47  ;;  %v483_v61 = vrot.slane %v477_v53, 1  ;;  %v498_v62 = vmul.f32 %v497_v50, %v2500_v3  ;;  %s2276_s13 = sld [smem:[#allocation3 + $0x8d]] }
  0x36   : > { %315 = vrot.lane.b32.xlu1 %v310_v17, %s2426_s15  ;;  %v505_v63 = vrot.slane %v499_v54, 1  ;;  %v507_v2 = vrot.slane %v500_v55, 1  ;;  %v520_v6 = vmul.f32 %v518_v59, %v2497_v1  ;;  %v521_v7 = vmul.f32 %v518_v59, %v2556_v43  ;;  %s2279_s14 = sld [smem:[#allocation3 + $0xf]] }
  0x37   : > { %313 = vrot.lane.b32.xlu0 %v309_v19, %s2426_s15  ;;  %v487_v4 = vsel %vm427_vm0, %v484_v57, %v486_v58  ;;  %v539_v8 = vstv %s2269_s28  ;;  %v485_v9 = vsel %vm427_vm0, %v483_v61, %v484_v57  ;;  %v504_v10 = vrot.slane %v498_v62, 1  ;;  %s2280_s16 = sld [smem:[#allocation3 + $0x8f]] }
  0x38   : > { %v519_v11 = vmul.f32 %v518_v59, %v2494_v0  ;;  %v508_v12 = vsel %vm427_vm0, %v505_v63, %v507_v2  ;;  %v560_v13 = vstv %s2270_s29  ;;  %v526_v14 = vrot.slane %v520_v6, 1  ;;  %s2281_s19 = sld [smem:[#allocation3 + $0x10]] }
  0x39   : > { %v528_v15 = vrot.slane %v521_v7, 1  ;;  %v541_v16 = vmul.f32 %v539_v8, %v2504_v5  ;;  %v542_v17 = vmul.f32 %v539_v8, %v2546_v35  ;;  %v506_v18 = vsel %vm427_vm0, %v504_v10, %v505_v63  ;;  %s2282_s21 = sld [smem:[#allocation3 + $0x90]] }
  0x3a   : > { %329 = vrot.lane.b32.xlu1 %v324_v20, %s2426_s15  ;;  %v525_v19 = vrot.slane %v519_v11, 1  ;;  %v540_v20 = vmul.f32 %v539_v8, %v2500_v3  ;;  %v562_v21 = vmul.f32 %v560_v13, %v2497_v1  ;;  %v602_v36 = vstv %s2272_s6  ;;  %s2283_s3 = sld [smem:[#allocation3 + $0x11]] }
  0x3b   : > { %327 = vrot.lane.b32.xlu0 %v323_v22, %s2426_s15  ;;  %v581_v22 = vstv %s2271_s5  ;;  %v547_v24 = vrot.slane %v541_v16, 1  ;;  %v604_v44 = vmul.f32 %v602_v36, %v2497_v1  ;;  %v623_v46 = vstv %s2273_s8  ;;  %s2284_s22 = sld [smem:[#allocation3 + $0x91]] }
  0x3c   : > { %v527_v27 = vsel %vm427_vm0, %v525_v19, %v526_v14  ;;  %v583_v30 = vmul.f32 %v581_v22, %v2504_v5  ;;  %v568_v33 = vrot.slane %v562_v21, 1  ;;  %v582_v39 = vmul.f32 %v581_v22, %v2500_v3  ;;  %s2285_s23 = sld [smem:[#allocation3 + $0x12]] }
  0x3d   : > { %v603_v49 = vmul.f32 %v602_v36, %v2494_v0  ;;  %v610_v52 = vrot.slane %v604_v44, 1  ;;  %v625_v54 = vmul.f32 %v623_v46, %v2504_v5  ;;  %v626_v55 = vmul.f32 %v623_v46, %v2546_v35  ;;  %s2286_s25 = sld [smem:[#allocation3 + $0x92]] }
  0x3e   : > { %343 = vrot.lane.b32.xlu1 %v338_v23, %s2427_s20  ;;  %v529_v23 = vsel %vm427_vm0, %v526_v14, %v528_v15  ;;  %v589_v40 = vrot.slane %v583_v30, 1  ;;  %v588_v48 = vrot.slane %v582_v39, 1  ;;  %v624_v58 = vmul.f32 %v623_v46, %v2500_v3  ;;  %s2287_s26 = sld [smem:[#allocation3 + $0x13]] }
  0x3f   : > { %341 = vrot.lane.b32.xlu0 %v337_v25, %s2427_s20  ;;  %v549_v25 = vrot.slane %v542_v17, 1  ;;  %v609_v57 = vrot.slane %v603_v49, 1  ;;  %v631_v62 = vrot.slane %v625_v54, 1  ;;  %v633_v63 = vrot.slane %v626_v55, 1  ;;  %s2288_s28 = sld [smem:[#allocation3 + $0x93]] }
  0x40   : > { %v630_v6 = vrot.slane %v624_v58, 1  ;;  %s2289_s29 = sld [smem:[#allocation3 + $0x14]] }
  0x41   : > { %v634_v10 = vsel %vm427_vm0, %v631_v62, %v633_v63  ;;  %s2290_s5 = sld [smem:[#allocation3 + $0x94]] }
  0x42   : > { %357 = vrot.lane.b32.xlu1 %v352_v26, %s2427_s20  ;;  %v563_v26 = vmul.f32 %v560_v13, %v2556_v43  ;;  %v632_v14 = vsel %vm427_vm0, %v630_v6, %v631_v62  ;;  %s2293_s6 = sld [smem:[#allocation3 + $0x16]] }
  0x43   : > { %355 = vrot.lane.b32.xlu0 %v351_v28, %s2427_s20  ;;  %v546_v28 = vrot.slane %v540_v20, 1  ;;  %s2294_s8 = sld [smem:[#allocation3 + $0x96]] }
  0x46   : > { %371 = vrot.lane.b32.xlu1 %v366_v29, %s2428_s24  ;;  %v561_v29 = vmul.f32 %v560_v13, %v2494_v0  ;;  %v686_v13 = vstv %s2276_s13  ;;  %s2754_s13 = sld [smem:[#allocation3]] }
  0x47   : > { %369 = vrot.lane.b32.xlu0 %v365_v31, %s2428_s24  ;;  %v584_v31 = vmul.f32 %v581_v22, %v2546_v35  ;;  %v688_v20 = vmul.f32 %v686_v13, %v2497_v1  ;;  %v689_v21 = vmul.f32 %v686_v13, %v2556_v43  ;;  %v742_v22 = vstv %s2279_s14  ;;  %s2297_s14 = sld [smem:[#allocation3 + $0x18]] }
  0x48   : > { %v567_v38 = vrot.slane %v561_v29, 1  ;;  %v744_v30 = vmul.f32 %v742_v22, %v2504_v5 }
  0x49   : > { %v591_v41 = vrot.slane %v584_v31, 1  ;;  %v696_v29 = vrot.slane %v689_v21, 1  ;;  %v745_v31 = vmul.f32 %v742_v22, %v2546_v35 }
  0x4a   : > { %385 = vrot.lane.b32.xlu1 %v380_v32, %s2428_s24  ;;  %v550_v32 = vsel %vm427_vm0, %v547_v24, %v549_v25  ;;  %v569_v47 = vsel %vm427_vm0, %v567_v38, %v568_v33  ;;  %v687_v25 = vmul.f32 %v686_v13, %v2494_v0  ;;  %v750_v39 = vrot.slane %v744_v30, 2 }
  0x4b   : > { %383 = vrot.lane.b32.xlu0 %v379_v34, %s2428_s24  ;;  %v570_v34 = vrot.slane %v563_v26, 1  ;;  %v592_v50 = vsel %vm427_vm0, %v589_v40, %v591_v41  ;;  %v784_v41 = vstv %s2281_s19  ;;  %s2770_s19 = sld [smem:[#allocation3 + $0x98]] }
  0x4c   : > { %v785_v54 = vmul.f32 %v784_v41, %v2500_v3 }
  0x4e   : > { %399 = vrot.lane.b32.xlu1 %v394_v37, %s2429_s27  ;;  %v548_v37 = vsel %vm427_vm0, %v546_v28, %v547_v24  ;;  %v694_v28 = vrot.slane %v688_v20, 1  ;;  %v791_v62 = vrot.slane %v785_v54, 2 }
  0x4f   : > { %397 = vrot.lane.b32.xlu0 %v393_v42, %s2429_s27  ;;  %v571_v42 = vsel %vm427_vm0, %v568_v33, %v570_v34  ;;  %v693_v33 = vrot.slane %v687_v25, 1  ;;  %v743_v34 = vmul.f32 %v742_v22, %v2500_v3 }
  0x50   : > { %v697_v38 = vsel %vm427_vm0, %v694_v28, %v696_v29 }
  0x51   : > { %v749_v44 = vrot.slane %v743_v34, 2 }
  0x52   : > { %413 = vrot.lane.b32.xlu1 %v408_v45, %s2429_s27  ;;  %v605_v45 = vmul.f32 %v602_v36, %v2556_v43 }
  0x53   : > { %411 = vrot.lane.b32.xlu0 %v407_v51, %s2429_s27  ;;  %v644_v51 = vstv %s2274_s10  ;;  %s2295_s10 = sld [smem:[#allocation3 + $0x17]] }
  0x54   : > { %v612_v53 = vrot.slane %v605_v45, 1  ;;  %v646_v59 = vmul.f32 %v644_v51, %v2497_v1  ;;  %v647_v2 = vmul.f32 %v644_v51, %v2556_v43  ;;  %v645_v7 = vmul.f32 %v644_v51, %v2494_v0 }
  0x55   : > { %v805_v51 = vstv %s2282_s21  ;;  %s2783_s21 = sld [smem:[#allocation3 + $0x19]] }
  0x56   : > { %469 = vrot.lane.b32.xlu1 %v466_v56, %s2424_s9  ;;  %v590_v56 = vsel %vm427_vm0, %v588_v48, %v589_v40  ;;  %v613_v61 = vsel %vm427_vm0, %v610_v52, %v612_v53  ;;  %v652_v11 = vrot.slane %v646_v59, 1  ;;  %v651_v15 = vrot.slane %v645_v7, 1 }
  0x57   : > { %467 = vrot.lane.b32.xlu0 %v464_v60, %s2424_s9  ;;  %v665_v60 = vstv %s2275_s11  ;;  %v752_v40 = vrot.slane %v745_v31, 2  ;;  %v786_v48 = vmul.f32 %v784_v41, %v2504_v5  ;;  %v807_v58 = vmul.f32 %v805_v51, %v2497_v1  ;;  %s2296_s11 = sld [smem:[#allocation3 + $0x97]] }
  0x58   : > { %v667_v8 = vmul.f32 %v665_v60, %v2504_v5  ;;  %v666_v16 = vmul.f32 %v665_v60, %v2500_v3  ;;  %v808_v59 = vmul.f32 %v805_v51, %v2556_v43  ;;  %v806_v63 = vmul.f32 %v805_v51, %v2494_v0 }
  0x59   : > { %v753_v49 = vsel %vm714_vm1, %v750_v39, %v752_v40  ;;  %v813_v7 = vrot.slane %v807_v58, 2 }
  0x5a   : > { %490 = vrot.lane.b32.xlu1 %v487_v4, %s2424_s9  ;;  %v611_v4 = vsel %vm427_vm0, %v609_v57, %v610_v52  ;;  %v673_v17 = vrot.slane %v667_v8, 1  ;;  %v672_v24 = vrot.slane %v666_v16, 1  ;;  %v751_v52 = vsel %vm714_vm1, %v749_v44, %v750_v39 }
  0x5b   : > { %488 = vrot.lane.b32.xlu0 %v485_v9, %s2424_s9  ;;  %v668_v9 = vmul.f32 %v665_v60, %v2546_v35  ;;  %v826_v60 = vstv %s2283_s3  ;;  %v815_v8 = vrot.slane %v808_v59, 2  ;;  %s2801_s3 = sld [smem:[#allocation3 + $0x99]] }
  0x5d   : > { %v816_v16 = vsel %vm714_vm1, %v813_v7, %v815_v8 }
  0x5e   : > { %511 = vrot.lane.b32.xlu1 %v508_v12, %s2425_s12  ;;  %v654_v12 = vrot.slane %v647_v2, 1  ;;  %v828_v2 = vmul.f32 %v826_v60, %v2504_v5 }
  0x5f   : > { %509 = vrot.lane.b32.xlu0 %v506_v18, %s2425_s12  ;;  %v675_v18 = vrot.slane %v668_v9, 1  ;;  %v847_v9 = vstv %s2284_s22  ;;  %s2817_s22 = sld [smem:[#allocation3 + $0x1a]] }
  0x60   : > { %v655_v19 = vsel %vm427_vm0, %v652_v11, %v654_v12  ;;  %v827_v12 = vmul.f32 %v826_v60, %v2500_v3  ;;  %v834_v13 = vrot.slane %v828_v2, 2  ;;  %v848_v21 = vmul.f32 %v847_v9, %v2494_v0 }
  0x61   : > { %v676_v26 = vsel %vm427_vm0, %v673_v17, %v675_v18  ;;  %v868_v18 = vstv %s2285_s23  ;;  %s2832_s23 = sld [smem:[#allocation3 + $0x9a]] }
  0x62   : > { %532 = vrot.lane.b32.xlu1 %v529_v23, %s2425_s12  ;;  %v653_v23 = vsel %vm427_vm0, %v651_v15, %v652_v11  ;;  %v812_v11 = vrot.slane %v806_v63, 2  ;;  %v849_v15 = vmul.f32 %v847_v9, %v2497_v1  ;;  %v833_v20 = vrot.slane %v827_v12, 2 }
  0x63   : > { %530 = vrot.lane.b32.xlu0 %v527_v27, %s2425_s12  ;;  %v763_v27 = vstv %s2280_s16  ;;  %v870_v25 = vmul.f32 %v868_v18, %v2504_v5  ;;  %v854_v29 = vrot.slane %v848_v21, 2  ;;  %v869_v30 = vmul.f32 %v868_v18, %v2500_v3  ;;  %s2760_s16 = sld [smem:[#allocation3 + $0x80]] }
  0x64   : > { %v765_v36 = vmul.f32 %v763_v27, %v2497_v1  ;;  %v764_v45 = vmul.f32 %v763_v27, %v2494_v0 }
  0x65   : > { %v876_v34 = vrot.slane %v870_v25, 2  ;;  %v875_v40 = vrot.slane %v869_v30, 2 }
  0x66   : > { %553 = vrot.lane.b32.xlu1 %v550_v32, %s2426_s15  ;;  %v674_v32 = vsel %vm427_vm0, %v672_v24, %v673_v17  ;;  %v771_v46 = vrot.slane %v765_v36, 2  ;;  %v770_v53 = vrot.slane %v764_v45, 2  ;;  %v850_v17 = vmul.f32 %v847_v9, %v2556_v43 }
  0x67   : > { %551 = vrot.lane.b32.xlu0 %v548_v37, %s2426_s15  ;;  %v766_v37 = vmul.f32 %v763_v27, %v2556_v43  ;;  %v889_v27 = vstv %s2286_s25  ;;  %v877_v51 = vsel %vm714_vm1, %v875_v40, %v876_v34  ;;  %s2835_s25 = sld [smem:[#allocation3 + $0x7]] }
  0x68   : > { %v857_v24 = vrot.slane %v850_v17, 2  ;;  %v891_v31 = vmul.f32 %v889_v27, %v2497_v1 }
  0x6a   : > { %574 = vrot.lane.b32.xlu1 %v571_v42, %s2426_s15  ;;  %v695_v42 = vsel %vm427_vm0, %v693_v33, %v694_v28  ;;  %v835_v28 = vsel %vm714_vm1, %v833_v20, %v834_v13  ;;  %v897_v44 = vrot.slane %v891_v31, 2 }
  0x6b   : > { %572 = vrot.lane.b32.xlu0 %v569_v47, %s2426_s15  ;;  %v773_v47 = vrot.slane %v766_v37, 2 }
  0x6d   : > { %v774_v55 = vsel %vm714_vm1, %v771_v46, %v773_v47 }
  0x6e   : > { %595 = vrot.lane.b32.xlu1 %v592_v50, %s2427_s20  ;;  %v787_v50 = vmul.f32 %v784_v41, %v2546_v35  ;;  %v890_v41 = vmul.f32 %v889_v27, %v2494_v0 }
  0x6f   : > { %593 = vrot.lane.b32.xlu0 %v590_v56, %s2427_s20  ;;  %v792_v56 = vrot.slane %v786_v48, 2 }
  0x70   : > { %v794_v57 = vrot.slane %v787_v50, 2 }
  0x72   : > { %616 = vrot.lane.b32.xlu1 %v613_v61, %s2427_s20  ;;  %v772_v61 = vsel %vm714_vm1, %v770_v53, %v771_v46  ;;  %v795_v6 = vsel %vm714_vm1, %v792_v56, %v794_v57 }
  0x73   : > { %614 = vrot.lane.b32.xlu0 %v611_v4, %s2427_s20  ;;  %v829_v4 = vmul.f32 %v826_v60, %v2546_v35 }
  0x76   : > { %637 = vrot.lane.b32.xlu1 %v634_v10, %s2428_s24  ;;  %v793_v10 = vsel %vm714_vm1, %v791_v62, %v792_v56 }
  0x77   : > { %635 = vrot.lane.b32.xlu0 %v632_v14, %s2428_s24  ;;  %v836_v14 = vrot.slane %v829_v4, 2 }
  0x79   : > { %v837_v22 = vsel %vm714_vm1, %v834_v13, %v836_v14 }
  0x7a   : > { %658 = vrot.lane.b32.xlu1 %v655_v19, %s2428_s24  ;;  %v814_v19 = vsel %vm714_vm1, %v812_v11, %v813_v7  ;;  %v973_v11 = vstv %s2290_s5  ;;  %s2913_s5 = sld [smem:[#allocation3 + $0x1d]] }
  0x7b   : > { %656 = vrot.lane.b32.xlu0 %v653_v23, %s2428_s24  ;;  %v855_v23 = vrot.slane %v849_v15, 2  ;;  %v975_v17 = vmul.f32 %v973_v11, %v2497_v1 }
  0x7d   : > { %v858_v33 = vsel %vm714_vm1, %v855_v23, %v857_v24  ;;  %v856_v39 = vsel %vm714_vm1, %v854_v29, %v855_v23  ;;  %v1029_v23 = vstv %s2293_s6  ;;  %s2927_s6 = sld [smem:[#allocation3 + $0x9d]] }
  0x7e   : > { %679 = vrot.lane.b32.xlu1 %v676_v26, %s2429_s27  ;;  %v871_v26 = vmul.f32 %v868_v18, %v2546_v35  ;;  %v976_v18 = vmul.f32 %v973_v11, %v2556_v43  ;;  %v1031_v31 = vmul.f32 %v1029_v23, %v2504_v5 }
  0x7f   : > { %677 = vrot.lane.b32.xlu0 %v674_v32, %s2429_s27  ;;  %v892_v32 = vmul.f32 %v889_v27, %v2556_v43 }
  0x80   : > { %v878_v36 = vrot.slane %v871_v26, 2  ;;  %v974_v26 = vmul.f32 %v973_v11, %v2494_v0  ;;  %v983_v29 = vrot.slane %v976_v18, 2  ;;  %v1113_v18 = vstv %s2297_s14  ;;  %s3043_s14 = sld [smem:[#allocation3 + $0xe]] }
  0x81   : > { %v899_v45 = vrot.slane %v892_v32, 2  ;;  %v1032_v32 = vmul.f32 %v1029_v23, %v2546_v35 }
  0x82   : > { %700 = vrot.lane.b32.xlu1 %v697_v38, %s2429_s27  ;;  %v910_v38 = vstv %s2287_s26  ;;  %v879_v46 = vsel %vm714_vm1, %v876_v34, %v878_v36  ;;  %s2846_s26 = sld [smem:[#allocation3 + $0x1b]] }
  0x83   : > { %698 = vrot.lane.b32.xlu0 %v695_v42, %s2429_s27  ;;  %v912_v47 = vmul.f32 %v910_v38, %v2504_v5  ;;  %v913_v48 = vmul.f32 %v910_v38, %v2546_v35  ;;  %v911_v53 = vmul.f32 %v910_v38, %v2500_v3  ;;  %v900_v57 = vsel %vm714_vm1, %v897_v44, %v899_v45 }
  0x84   : > { %v980_v38 = vrot.slane %v974_v26, 2  ;;  %v1037_v45 = vrot.slane %v1031_v31, 3  ;;  %v1115_v31 = vmul.f32 %v1113_v18, %v2504_v5 }
  0x85   : > { %v918_v58 = vrot.slane %v912_v47, 2  ;;  %v920_v59 = vrot.slane %v913_v48, 2  ;;  %v917_v63 = vrot.slane %v911_v53, 2  ;;  %v1071_v48 = vstv %s2295_s10  ;;  %s2982_s10 = sld [smem:[#allocation3 + $0x9e]] }
  0x86   : > { %756 = vrot.lane.b32.xlu1 %v753_v49, %s2424_s9  ;;  %v931_v49 = vstv %s2288_s28  ;;  %s2852_s28 = sld [smem:[#allocation3 + $0x87]] }
  0x87   : > { %754 = vrot.lane.b32.xlu0 %v751_v52, %s2424_s9  ;;  %v896_v52 = vrot.slane %v890_v41, 2  ;;  %v934_v56 = vmul.f32 %v931_v49, %v2556_v43  ;;  %v932_v2 = vmul.f32 %v931_v49, %v2494_v0  ;;  %v921_v8 = vsel %vm714_vm1, %v918_v58, %v920_v59 }
  0x88   : > { %v919_v13 = vsel %vm714_vm1, %v917_v63, %v918_v58 }
  0x89   : > { %v898_v62 = vsel %vm714_vm1, %v896_v52, %v897_v44  ;;  %v941_v7 = vrot.slane %v934_v56, 2  ;;  %v938_v14 = vrot.slane %v932_v2, 2  ;;  %v1073_v56 = vmul.f32 %v1071_v48, %v2504_v5 }
  0x8a   : > { %777 = vrot.lane.b32.xlu1 %v774_v55, %s2424_s9  ;;  %v933_v55 = vmul.f32 %v931_v49, %v2497_v1 }
  0x8b   : > { %775 = vrot.lane.b32.xlu0 %v772_v61, %s2424_s9  ;;  %v952_v61 = vstv %s2289_s29  ;;  %s2868_s29 = sld [smem:[#allocation3 + $0x9b]] }
  0x8c   : > { %v954_v9 = vmul.f32 %v952_v61, %v2504_v5  ;;  %v953_v15 = vmul.f32 %v952_v61, %v2500_v3 }
  0x8e   : > { %798 = vrot.lane.b32.xlu1 %v795_v6, %s2425_s12  ;;  %v939_v6 = vrot.slane %v933_v55, 2  ;;  %v960_v20 = vrot.slane %v954_v9, 2  ;;  %v959_v25 = vrot.slane %v953_v15, 2  ;;  %v1079_v9 = vrot.slane %v1073_v56, 3 }
  0x8f   : > { %796 = vrot.lane.b32.xlu0 %v793_v10, %s2425_s12  ;;  %v955_v10 = vmul.f32 %v952_v61, %v2546_v35  ;;  %v240_v15 = vstv %s2754_s13  ;;  %s3028_s13 = sld [smem:[#allocation3 + $0x9f]] }
  0x90   : > { %v940_v24 = vsel %vm714_vm1, %v938_v14, %v939_v6  ;;  %v961_v36 = vsel %vm714_vm1, %v959_v25, %v960_v20 }
  0x91   : > { %v962_v21 = vrot.slane %v955_v10, 2 }
  0x92   : > { %819 = vrot.lane.b32.xlu1 %v816_v16, %s2425_s12 }
  0x93   : > { %817 = vrot.lane.b32.xlu0 %v814_v19, %s2425_s12  ;;  %v942_v19 = vsel %vm714_vm1, %v939_v6, %v941_v7  ;;  %v963_v30 = vsel %vm714_vm1, %v960_v20, %v962_v21  ;;  %v1072_v7 = vmul.f32 %v1071_v48, %v2500_v3 }
  0x95   : > { %v1078_v21 = vrot.slane %v1072_v7, 3 }
  0x96   : > { %840 = vrot.lane.b32.xlu1 %v837_v22, %s2426_s15 }
  0x97   : > { %838 = vrot.lane.b32.xlu0 %v835_v28, %s2426_s15  ;;  %v981_v28 = vrot.slane %v975_v17, 2 }
  0x98   : > { %v2690_v37 = vpop.permute.xlu1 %271 }
  0x99   : > { %v2694_v42 = vpop.permute.xlu0 %257  ;;  %v984_v41 = vsel %vm714_vm1, %v981_v28, %v983_v29 }
  0x9a   : > { %861 = vrot.lane.b32.xlu1 %v858_v33, %s2426_s15  ;;  %v1050_v33 = vstv %s2294_s8  ;;  %s2953_s8 = sld [smem:[#allocation3 + $0x1e]] }
  0x9b   : > { %859 = vrot.lane.b32.xlu0 %v856_v39, %s2426_s15  ;;  %v1030_v39 = vmul.f32 %v1029_v23, %v2500_v3  ;;  %v1052_v44 = vmul.f32 %v1050_v33, %v2497_v1  ;;  %v1053_v47 = vmul.f32 %v1050_v33, %v2556_v43  ;;  %v1051_v53 = vmul.f32 %v1050_v33, %v2494_v0 }
  0x9c   : > { %v2701_v50 = vpop.permute.xlu1 %273  ;;  %v1134_v33 = vstv %s2770_s19  ;;  %s3052_s19 = sld [smem:[#allocation3 + $0x8e]] }
  0x9d   : > { %v2705_v54 = vpop.permute.xlu0 %259  ;;  %v1036_v52 = vrot.slane %v1030_v39, 3  ;;  %v1058_v59 = vrot.slane %v1052_v44, 3  ;;  %v1060_v61 = vrot.slane %v1053_v47, 3  ;;  %v1057_v6 = vrot.slane %v1051_v53, 3 }
  0x9e   : > { %882 = vrot.lane.b32.xlu1 %v879_v46, %s2427_s20  ;;  %v1039_v46 = vrot.slane %v1032_v32, 3  ;;  %v1116_v32 = vmul.f32 %v1113_v18, %v2546_v35  ;;  %v1080_v39 = vsel %vm1001_vm2, %v1078_v21, %v1079_v9  ;;  %v1114_v44 = vmul.f32 %v1113_v18, %v2500_v3 }
  0x9f   : > { %880 = vrot.lane.b32.xlu0 %v877_v51, %s2427_s20  ;;  %v982_v51 = vsel %vm714_vm1, %v980_v38, %v981_v28  ;;  %v1038_v2 = vsel %vm1001_vm2, %v1036_v52, %v1037_v45  ;;  %v1059_v20 = vsel %vm1001_vm2, %v1057_v6, %v1058_v59  ;;  %v1121_v53 = vrot.slane %v1115_v31, 3 }
  0xa0   : > { %v2712_v60 = vpop.permute.xlu1 %287  ;;  %v1040_v58 = vsel %vm1001_vm2, %v1037_v45, %v1039_v46  ;;  %v241_v45 = vmul.f32 %v240_v15, %v2500_v3  ;;  %v1123_v56 = vrot.slane %v1116_v32, 3  ;;  %v1197_v32 = vstv %s2817_s22  ;;  %s3102_s22 = sld [smem:[#allocation3 + $0xa1]] }
  0xa1   : > { %v2716_v4 = vpop.permute.xlu0 %285 }
  0xa2   : > { %903 = vrot.lane.b32.xlu1 %v900_v57, %s2427_s20  ;;  %v1074_v57 = vmul.f32 %v1071_v48, %v2546_v35  ;;  %v1136_v48 = vmul.f32 %v1134_v33, %v2497_v1 }
  0xa3   : > { %901 = vrot.lane.b32.xlu0 %v898_v62, %s2427_s20  ;;  %v1092_v62 = vstv %s2296_s11  ;;  %s3008_s11 = sld [smem:[#allocation3 + $0x1f]] }
  0xa4   : > { %v2723_v12 = vpop.permute.xlu1 %301  ;;  %v1081_v10 = vrot.slane %v1074_v57, 3  ;;  %v1094_v11 = vmul.f32 %v1092_v62, %v2497_v1  ;;  %v1095_v14 = vmul.f32 %v1092_v62, %v2556_v43  ;;  %v1093_v23 = vmul.f32 %v1092_v62, %v2494_v0 }
  0xa5   : > { %v2727_v16 = vpop.permute.xlu0 %299  ;;  %v1155_v57 = vstv %s2783_s21  ;;  %v1135_v62 = vmul.f32 %v1134_v33, %v2494_v0  ;;  %v1142_v6 = vrot.slane %v1136_v48, 3  ;;  %v1218_v48 = vstv %s2832_s23  ;;  %s3062_s21 = sld [smem:[#allocation3 + $0xa0]] }
  0xa6   : > { %924 = vrot.lane.b32.xlu1 %v921_v8, %s2428_s24  ;;  %v1082_v28 = vsel %vm1001_vm2, %v1079_v9, %v1081_v10  ;;  %v1100_v29 = vrot.slane %v1094_v11, 3  ;;  %v1157_v9 = vmul.f32 %v1155_v57, %v2504_v5  ;;  %v1158_v10 = vmul.f32 %v1155_v57, %v2546_v35  ;;  %s3129_s23 = sld [smem:[#allocation3 + $0x22]] }
  0xa7   : > { %922 = vrot.lane.b32.xlu0 %v919_v13, %s2428_s24  ;;  %v1061_v13 = vsel %vm1001_vm2, %v1058_v59, %v1060_v61  ;;  %v1120_v61 = vrot.slane %v1114_v44, 3  ;;  %v1156_v21 = vmul.f32 %v1155_v57, %v2500_v3  ;;  %v1200_v44 = vmul.f32 %v1197_v32, %v2546_v35 }
  0xa8   : > { %v2734_v22 = vpop.permute.xlu1 %315 }
  0xa9   : > { %v2738_v27 = vpop.permute.xlu0 %313 }
  0xaa   : > { %945 = vrot.lane.b32.xlu1 %v942_v19, %s2428_s24  ;;  %v246_v19 = vstv %s2760_s16  ;;  %s3047_s16 = sld [smem:[#allocation3 + $0x20]] }
  0xab   : > { %943 = vrot.lane.b32.xlu0 %v940_v24, %s2428_s24  ;;  %v242_v24 = vmul.f32 %v240_v15, %v2504_v5  ;;  %v248_v25 = vmul.f32 %v246_v19, %v2497_v1  ;;  %v247_v38 = vmul.f32 %v246_v19, %v2494_v0  ;;  %v1176_v15 = vstv %s2801_s3  ;;  %s3082_s3 = sld [smem:[#allocation3 + $0x21]] }
  0xac   : > { %v2745_v34 = vpop.permute.xlu1 %329  ;;  %v1122_v19 = vsel %vm1001_vm2, %v1120_v61, %v1121_v53  ;;  %v1179_v31 = vmul.f32 %v1176_v15, %v2556_v43 }
  0xad   : > { %v2749_v40 = vpop.permute.xlu0 %327  ;;  %v250_v46 = vadd.f32 %v248_v25, %v242_v24  ;;  %v249_v11 = vadd.f32 %v247_v38, %v241_v45  ;;  %v1163_v24 = vrot.slane %v1157_v9, 3  ;;  %v1165_v25 = vrot.slane %v1158_v10, 3 }
  0xae   : > { %966 = vrot.lane.b32.xlu1 %v963_v30, %s2429_s27  ;;  %v1102_v30 = vrot.slane %v1095_v14, 3  ;;  %v1124_v14 = vsel %vm1001_vm2, %v1121_v53, %v1123_v56  ;;  %v1162_v38 = vrot.slane %v1156_v21, 3  ;;  %v2880_v56 = vld [vmem:[%s2491_s7] sm:$0xff] }
  0xaf   : > { %964 = vrot.lane.b32.xlu0 %v961_v36, %s2429_s27  ;;  %v1198_v57 = vmul.f32 %v2880_v56, %v1197_v32 }
  0xb0   : > { %v2758_v49 = vpop.permute.xlu1 %343  ;;  %v1103_v52 = vsel %vm1001_vm2, %v1100_v29, %v1102_v30 }
  0xb1   : > { %v2764_v55 = vpop.permute.xlu0 %341 }
  0xb2   : > { %987 = vrot.lane.b32.xlu1 %v984_v41, %s2429_s27  ;;  %v1099_v41 = vrot.slane %v1093_v23, 3 }
  0xb3   : > { %985 = vrot.lane.b32.xlu0 %v982_v51, %s2429_s27  ;;  %v1137_v51 = vmul.f32 %v1134_v33, %v2556_v43  ;;  %v1177_v33 = vmul.f32 %v1176_v15, %v2494_v0  ;;  %v1186_v0 = vrot.slane %v1179_v31, 3 }
  0xb4   : > { %v2773_v63 = vpop.permute.xlu1 %357  ;;  %v1101_v59 = vsel %vm1001_vm2, %v1099_v41, %v1100_v29  ;;  %v263_v29 = vadd.f32 %v2694_v42, %v249_v11  ;;  %v1166_v42 = vsel %vm1001_vm2, %v1163_v24, %v1165_v25  ;;  %v1199_v41 = vmul.f32 %v1197_v32, %v2504_v5 }
  0xb5   : > { %v2777_v8 = vpop.permute.xlu0 %355  ;;  %v1144_v7 = vrot.slane %v1137_v51, 3  ;;  %v2871_v51 = vstv %s2835_s25  ;;  %v1183_v53 = vrot.slane %v1177_v33, 3  ;;  %v1221_v11 = vmul.f32 %v1218_v48, %v2556_v43  ;;  %s3160_s25 = sld [smem:[#allocation3 + $0xa2]] }
  0xb6   : > { %1043 = vrot.lane.b32.xlu1 %v1040_v58, %s2424_s9  ;;  %v277_v45 = vadd.f32 %v2690_v37, %v263_v29  ;;  %v1205_v61 = vrot.slane %v1199_v41, 3 }
  0xb7   : > { %1041 = vrot.lane.b32.xlu0 %v1038_v2, %s2424_s9  ;;  %v1228_v33 = vrot.slane %v1221_v11, 3 }
  0xb8   : > { %v2787_v17 = vpop.permute.xlu1 %371  ;;  %v291_v5 = vadd.f32 %v2716_v4, %v277_v45 }
  0xb9   : > { %v2794_v26 = vpop.permute.xlu0 %369 }
  0xba   : > { %1064 = vrot.lane.b32.xlu1 %v1061_v13, %s2424_s9  ;;  %v264_v13 = vadd.f32 %v2705_v54, %v250_v46  ;;  %v1145_v54 = vsel %vm1001_vm2, %v1142_v6, %v1144_v7  ;;  %v1239_v7 = vstv %s2846_s26  ;;  %s3175_s26 = sld [smem:[#allocation3 + $0x24]] }
  0xbb   : > { %1062 = vrot.lane.b32.xlu0 %v1059_v20, %s2424_s9  ;;  %v1141_v20 = vrot.slane %v1135_v62, 3  ;;  %v1207_v62 = vrot.slane %v1200_v44, 3  ;;  %v1242_v32 = vmul.f32 %v1239_v7, %v2546_v35 }
  0xbc   : > { %v2804_v36 = vpop.permute.xlu1 %385  ;;  %v278_v30 = vadd.f32 %v2701_v50, %v264_v13  ;;  %v2896_v13 = vld [vmem:[%s2491_s7 + $0x8] sm:$0xff] }
  0xbd   : > { %v2810_v47 = vpop.permute.xlu0 %383  ;;  %v1208_v29 = vsel %vm1001_vm2, %v1205_v61, %v1207_v62  ;;  %v1241_v31 = vmul.f32 %v2896_v13, %v1239_v7 }
  0xbe   : > { %1085 = vrot.lane.b32.xlu1 %v1082_v28, %s2425_s12  ;;  %v1178_v28 = vmul.f32 %v1176_v15, %v2497_v1  ;;  %v1143_v1 = vsel %vm1001_vm2, %v1141_v20, %v1142_v6  ;;  %v292_v46 = vadd.f32 %v2712_v60, %v278_v30  ;;  %v1164_v60 = vsel %vm1001_vm2, %v1162_v38, %v1163_v24  ;;  %v2887_v6 = vld [vmem:[%s2486_s30 + $0x8] sm:$0xff]  ;;  %v2918_v24 = vld [vmem:[%s2486_s30] sm:$0xff] }
  0xbf   : > { %1083 = vrot.lane.b32.xlu0 %v1080_v39, %s2425_s12  ;;  %v1220_v4 = vmul.f32 %v2887_v6, %v1218_v48  ;;  %v2904_v15 = vmul.f32 %v2871_v51, %v2546_v35  ;;  %v1219_v25 = vmul.f32 %v2918_v24, %v1218_v48  ;;  %v1249_v48 = vrot.slane %v1242_v32, 3 }
  0xc0   : > { %v2820_v58 = vpop.permute.xlu1 %399  ;;  %v1184_v50 = vrot.slane %v1178_v28, 3  ;;  %v306_v37 = vadd.f32 %v2723_v12, %v292_v46  ;;  %v305_v12 = vadd.f32 %v2727_v16, %v291_v5 }
  0xc1   : > { %v2824_v2 = vpop.permute.xlu0 %397  ;;  %v1226_v30 = vrot.slane %v1220_v4, 3  ;;  %v1225_v45 = vrot.slane %v1219_v25, 3  ;;  %v1316_v4 = vstv %s2913_s5  ;;  %s3219_s5 = sld [smem:[#allocation3 + $0xa5]] }
  0xc2   : > { %1106 = vrot.lane.b32.xlu1 %v1103_v52, %s2425_s12  ;;  %v320_v9 = vadd.f32 %v2734_v22, %v306_v37  ;;  %v1187_v10 = vsel %vm1001_vm2, %v1184_v50, %v1186_v0  ;;  %v1185_v22 = vsel %vm1001_vm2, %v1183_v53, %v1184_v50  ;;  %v319_v20 = vadd.f32 %v2738_v27, %v305_v12 }
  0xc3   : > { %1104 = vrot.lane.b32.xlu0 %v1101_v59, %s2425_s12  ;;  %v1247_v0 = vrot.slane %v1241_v31, 3  ;;  %v421_v37 = vmul.f32 %v2880_v56, %v2871_v51 }
  0xc4   : > { %v2837_v18 = vpop.permute.xlu1 %413  ;;  %v334_v21 = vadd.f32 %v2745_v34, %v320_v9  ;;  %v333_v27 = vadd.f32 %v2749_v40, %v319_v20  ;;  %v1240_v40 = vmul.f32 %v2880_v56, %v1239_v7 }
  0xc5   : > { %v2841_v23 = vpop.permute.xlu0 %411  ;;  %v1250_v9 = vsel %vm1001_vm2, %v1247_v0, %v1249_v48  ;;  %v428_v25 = vrot.slane %v421_v37, 1 }
  0xc6   : > { %1127 = vrot.lane.b32.xlu1 %v1124_v14, %s2426_s15  ;;  %v2900_v14 = vmul.f32 %v2896_v13, %v2871_v51  ;;  %v348_v34 = vadd.f32 %v2758_v49, %v334_v21  ;;  %v347_v49 = vadd.f32 %v2764_v55, %v333_v27  ;;  %v1227_v51 = vsel %vm1001_vm2, %v1225_v45, %v1226_v30 }
  0xc7   : > { %1125 = vrot.lane.b32.xlu0 %v1122_v19, %s2426_s15  ;;  %v2907_v19 = vstv %s2852_s28  ;;  %v1317_v27 = vmul.f32 %v2880_v56, %v1316_v4  ;;  %s3193_s28 = sld [smem:[#allocation3 + $0xa4]] }
  0xc8   : > { %v2855_v3 = vpop.permute.xlu1 %469  ;;  %v429_v38 = vrot.slane %v2900_v14, 1  ;;  %v2939_v50 = vmul.f32 %v2907_v19, %v2556_v43  ;;  %v362_v41 = vadd.f32 %v2773_v63, %v348_v34  ;;  %v361_v55 = vadd.f32 %v2777_v8, %v347_v49 }
  0xc9   : > { %v2859_v39 = vpop.permute.xlu0 %467 }
  0xca   : > { %1148 = vrot.lane.b32.xlu1 %v1145_v54, %s2426_s15  ;;  %v1204_v54 = vrot.slane %v1198_v57, 3  ;;  %v376_v63 = vadd.f32 %v2787_v17, %v362_v41  ;;  %v431_v57 = vrot.slane %v2904_v15, 1  ;;  %v375_v8 = vadd.f32 %v2794_v26, %v361_v55 }
  0xcb   : > { %1146 = vrot.lane.b32.xlu0 %v1143_v1, %s2426_s15  ;;  %v1260_v1 = vstv %s2868_s29  ;;  %v1337_v15 = vstv %s2927_s6  ;;  %v1318_v26 = vmul.f32 %v2896_v13, %v1316_v4  ;;  %s3203_s29 = sld [smem:[#allocation3 + $0x25]] }
  0xcc   : > { %v2874_v52 = vpop.permute.xlu1 %490  ;;  %v1206_v44 = vsel %vm1001_vm2, %v1204_v54, %v1205_v61  ;;  %v1262_v53 = vmul.f32 %v2887_v6, %v1260_v1  ;;  %v1263_v5 = vmul.f32 %v1260_v1, %v2556_v43  ;;  %v1246_v43 = vrot.slane %v1240_v40, 3  ;;  %s3228_s6 = sld [smem:[#allocation3 + $0x15]] }
  0xcd   : > { %v2883_v59 = vpop.permute.xlu0 %488  ;;  %v390_v17 = vadd.f32 %v2804_v36, %v376_v63  ;;  %v1261_v7 = vmul.f32 %v2918_v24, %v1260_v1  ;;  %v2979_v36 = vld [vmem:[%s2491_s7 + $0x10] sm:$0x3f]  ;;  %v448_v54 = vrot.slane %v2939_v50, 1  ;;  %v432_v34 = vsel %vm427_vm0, %v429_v38, %v431_v57 }
  0xce   : > { %1169 = vrot.lane.b32.xlu1 %v1166_v42, %s2427_s20  ;;  %v2935_v42 = vmul.f32 %v2887_v6, %v2907_v19  ;;  %v1270_v11 = vrot.slane %v1263_v5, 3  ;;  %v1319_v21 = vmul.f32 %v2979_v36, %v1316_v4  ;;  %v3002_v1 = vld [vmem:[%s2486_s30 + $0x10] sm:$0x3f]  ;;  %v1324_v49 = vrot.slane %v1318_v26, 4 }
  0xcf   : > { %1167 = vrot.lane.b32.xlu0 %v1164_v60, %s2427_s20  ;;  %v1229_v60 = vsel %vm1001_vm2, %v1226_v30, %v1228_v33  ;;  %v404_v20 = vadd.f32 %v2820_v58, %v390_v17  ;;  %v1248_v58 = vsel %vm1001_vm2, %v1246_v43, %v1247_v0  ;;  %v1267_v32 = vrot.slane %v1261_v7, 3 }
  0xd0   : > { %v2910_v16 = vpop.permute.xlu1 %511  ;;  %v446_v61 = vrot.slane %v2935_v42, 1  ;;  %v1340_v50 = vmul.f32 %v3002_v1, %v1337_v15  ;;  %v1326_v41 = vrot.slane %v1319_v21, 4  ;;  %v1338_v5 = vmul.f32 %v2918_v24, %v1337_v15 }
  0xd1   : > { %v2921_v28 = vpop.permute.xlu0 %509  ;;  %v418_v31 = vadd.f32 %v2837_v18, %v404_v20  ;;  %v1379_v4 = vstv %s2982_s10  ;;  %v1400_v21 = vstv %s3008_s11  ;;  %s3253_s10 = sld [smem:[#allocation3 + $0x95]] }
  0xd2   : > { %1190 = vrot.lane.b32.xlu1 %v1187_v10, %s2427_s20  ;;  %v1268_v10 = vrot.slane %v1262_v53, 3  ;;  %v1323_v53 = vrot.slane %v1317_v27, 4  ;;  %v449_v55 = vsel %vm427_vm0, %v446_v61, %v448_v54  ;;  %v1347_v63 = vrot.slane %v1340_v50, 4  ;;  %s3261_s11 = sld [smem:[#allocation3 + $0xa6]] }
  0xd3   : > { %1188 = vrot.lane.b32.xlu0 %v1185_v22, %s2427_s20  ;;  %v389_v22 = vadd.f32 %v2810_v47, %v375_v8  ;;  %v436_v48 = vadd.f32 %v432_v34, %v418_v31  ;;  %v1327_v57 = vsel %vm1288_vm3, %v1324_v49, %v1326_v41  ;;  %v1381_v42 = vmul.f32 %v2887_v6, %v1379_v4 }
  0xd4   : > { %v2942_v35 = vpop.permute.xlu1 %532  ;;  %v1271_v40 = vsel %vm1001_vm2, %v1268_v10, %v1270_v11  ;;  %v1325_v7 = vsel %vm1288_vm3, %v1323_v53, %v1324_v49  ;;  %v1402_v34 = vmul.f32 %v2896_v13, %v1400_v21 }
  0xd5   : > { %v2948_v46 = vpop.permute.xlu0 %530  ;;  %v403_v30 = vadd.f32 %v2824_v2, %v389_v22  ;;  %v1358_v2 = vstv %s2953_s8  ;;  %s3245_s8 = sld [smem:[#allocation3 + $0x26]] }
  0xd6   : > { %1211 = vrot.lane.b32.xlu1 %v1208_v29, %s2428_s24  ;;  %v439_v29 = vmul.f32 %v2918_v24, %v2907_v19  ;;  %v1339_v19 = vmul.f32 %v2887_v6, %v1337_v15  ;;  %v1360_v37 = vmul.f32 %v2896_v13, %v1358_v2  ;;  %v1361_v43 = vmul.f32 %v2979_v36, %v1358_v2 }
  0xd7   : > { %1209 = vrot.lane.b32.xlu0 %v1206_v44, %s2428_s24  ;;  %v417_v18 = vadd.f32 %v2841_v23, %v403_v30  ;;  %v430_v44 = vsel %vm427_vm0, %v428_v25, %v429_v38  ;;  %v1269_v23 = vsel %vm1001_vm2, %v1267_v32, %v1268_v10  ;;  %v1359_v10 = vmul.f32 %v2880_v56, %v1358_v2 }
  0xd8   : > { %v2963_v62 = vpop.permute.xlu1 %553  ;;  %v445_v45 = vrot.slane %v439_v29, 1  ;;  %v1345_v38 = vrot.slane %v1339_v19, 4  ;;  %v1366_v15 = vrot.slane %v1360_v37, 4  ;;  %v1368_v26 = vrot.slane %v1361_v43, 4 }
  0xd9   : > { %v2970_v12 = vpop.permute.xlu0 %551  ;;  %v1380_v30 = vmul.f32 %v2918_v24, %v1379_v4  ;;  %v1387_v32 = vrot.slane %v1381_v42, 4  ;;  %v1403_v19 = vmul.f32 %v2979_v36, %v1400_v21  ;;  %v1421_v2 = vstv %s3028_s13  ;;  %s3279_s13 = sld [smem:[#allocation3 + $0x27]] }
  0xda   : > { %1232 = vrot.lane.b32.xlu1 %v1229_v60, %s2428_s24  ;;  %v435_v60 = vadd.f32 %v430_v44, %v417_v18  ;;  %v447_v8 = vsel %vm427_vm0, %v445_v45, %v446_v61  ;;  %v1382_v61 = vmul.f32 %v3002_v1, %v1379_v4  ;;  %v1348_v20 = vsel %vm1288_vm3, %v1345_v38, %v1347_v63 }
  0xdb   : > { %1230 = vrot.lane.b32.xlu0 %v1227_v51, %s2428_s24  ;;  %v453_v51 = vadd.f32 %v449_v55, %v436_v48  ;;  %v1386_v44 = vrot.slane %v1380_v30, 4  ;;  %v1408_v48 = vrot.slane %v1402_v34, 4  ;;  %v1423_v53 = vmul.f32 %v2887_v6, %v1421_v2 }
  0xdc   : > { %v2988_v47 = vpop.permute.xlu1 %574  ;;  %v452_v22 = vadd.f32 %v447_v8, %v435_v60  ;;  %v1389_v27 = vrot.slane %v1382_v61, 4  ;;  %v707_v37 = vstv %s3043_s14  ;;  %v725_v60 = vstv %s3052_s19  ;;  %s3294_s14 = sld [smem:[#allocation3 + $0xa7]] }
  0xdd   : > { %v2997_v33 = vpop.permute.xlu0 %572  ;;  %v474_v25 = vadd.f32 %v2855_v3, %v453_v51  ;;  %v1369_v3 = vsel %vm1288_vm3, %v1366_v15, %v1368_v26  ;;  %v3106_v61 = vmul.f32 %v2896_v13, %v707_v37  ;;  %s3318_s19 = sld [smem:[#allocation3 + $0xa8]] }
  0xde   : > { %1253 = vrot.lane.b32.xlu1 %v1250_v9, %s2429_s27  ;;  %v1344_v9 = vrot.slane %v1338_v5, 4  ;;  %v473_v50 = vadd.f32 %v2859_v39, %v452_v22  ;;  %v1390_v39 = vsel %vm1288_vm3, %v1387_v32, %v1389_v27  ;;  %v3109_v22 = vmul.f32 %v2979_v36, %v707_v37 }
  0xdf   : > { %1251 = vrot.lane.b32.xlu0 %v1248_v58, %s2429_s27  ;;  %v1365_v58 = vrot.slane %v1359_v10, 4  ;;  %v495_v49 = vadd.f32 %v2874_v52, %v474_v25  ;;  %v1424_v52 = vmul.f32 %v3002_v1, %v1421_v2  ;;  %v1463_v10 = vstv %s3062_s21  ;;  %s3330_s21 = sld [smem:[#allocation3 + $0x29]] }
  0xe0   : > { %v3014_v0 = vpop.permute.xlu1 %595  ;;  %v1346_v29 = vsel %vm1288_vm3, %v1344_v9, %v1345_v38  ;;  %v494_v5 = vadd.f32 %v2883_v59, %v473_v50  ;;  %v1442_v38 = vstv %s3047_s16  ;;  %v1388_v59 = vsel %vm1288_vm3, %v1386_v44, %v1387_v32  ;;  %s3308_s16 = sld [smem:[#allocation3 + $0x28]] }
  0xe1   : > { %v3021_v14 = vpop.permute.xlu0 %593  ;;  %v1367_v41 = vsel %vm1288_vm3, %v1365_v58, %v1366_v15  ;;  %v516_v55 = vadd.f32 %v2910_v16, %v495_v49  ;;  %v1422_v16 = vmul.f32 %v2918_v24, %v1421_v2  ;;  %v1445_v9 = vmul.f32 %v2979_v36, %v1442_v38 }
  0xe2   : > { %1274 = vrot.lane.b32.xlu1 %v1271_v40, %s2429_s27  ;;  %v1401_v40 = vmul.f32 %v2880_v56, %v1400_v21  ;;  %v515_v43 = vadd.f32 %v2921_v28, %v494_v5  ;;  %v1431_v42 = vrot.slane %v1424_v52, 4  ;;  %v1465_v27 = vmul.f32 %v2887_v6, %v1463_v10 }
  0xe3   : > { %1272 = vrot.lane.b32.xlu0 %v1269_v23, %s2429_s27  ;;  %v1410_v23 = vrot.slane %v1403_v19, 4  ;;  %v537_v4 = vadd.f32 %v2942_v35, %v516_v55  ;;  %v1429_v35 = vrot.slane %v1423_v53, 4  ;;  %v1428_v25 = vrot.slane %v1422_v16, 4 }
  0xe4   : > { %v3034_v17 = vpop.permute.xlu1 %616  ;;  %v536_v15 = vadd.f32 %v2948_v46, %v515_v43  ;;  %v1452_v32 = vrot.slane %v1445_v9, 4  ;;  %v1466_v34 = vmul.f32 %v3002_v1, %v1463_v10  ;;  %v708_v2 = vmul.f32 %v2880_v56, %v707_v37 }
  0xe5   : > { %v3038_v11 = vpop.permute.xlu0 %614  ;;  %v1411_v51 = vsel %vm1288_vm3, %v1408_v48, %v1410_v23  ;;  %v558_v28 = vadd.f32 %v2963_v62, %v537_v4  ;;  %v1430_v44 = vsel %vm1288_vm3, %v1428_v25, %v1429_v35  ;;  %v1471_v53 = vrot.slane %v1465_v27, 4 }
  0xe6   : > { %1330 = vrot.lane.b32.xlu1 %v1327_v57, %s2424_s9  ;;  %v1407_v57 = vrot.slane %v1401_v40, 4  ;;  %v557_v62 = vadd.f32 %v2970_v12, %v536_v15  ;;  %v1432_v12 = vsel %vm1288_vm3, %v1429_v35, %v1431_v42  ;;  %v3136_v40 = vmul.f32 %v2918_v24, %v725_v60 }
  0xe7   : > { %1328 = vrot.lane.b32.xlu0 %v1325_v7, %s2424_s9  ;;  %v1444_v7 = vmul.f32 %v2896_v13, %v1442_v38  ;;  %v579_v21 = vadd.f32 %v2988_v47, %v558_v28  ;;  %v1484_v47 = vstv %s3082_s3  ;;  %v1473_v5 = vrot.slane %v1466_v34, 4  ;;  %s3341_s3 = sld [smem:[#allocation3 + $0xa9]] }
  0xe8   : > { %v3050_v54 = vpop.permute.xlu1 %637  ;;  %v1409_v46 = vsel %vm1288_vm3, %v1407_v57, %v1408_v48  ;;  %v578_v19 = vadd.f32 %v2997_v33, %v557_v62  ;;  %v1464_v33 = vmul.f32 %v2918_v24, %v1463_v10  ;;  %v1486_v55 = vmul.f32 %v2896_v13, %v1484_v47 }
  0xe9   : > { %v3057_v31 = vpop.permute.xlu0 %635  ;;  %v1450_v30 = vrot.slane %v1444_v7, 4  ;;  %v600_v50 = vadd.f32 %v3014_v0, %v579_v21  ;;  %v716_v37 = vrot.slane %v3106_v61, 2  ;;  %v1485_v16 = vmul.f32 %v2880_v56, %v1484_v47 }
  0xea   : > { %1351 = vrot.lane.b32.xlu1 %v1348_v20, %s2424_s9  ;;  %v3112_v20 = vmul.f32 %v2887_v6, %v725_v60  ;;  %v599_v0 = vadd.f32 %v3021_v14, %v578_v19  ;;  %v1487_v14 = vmul.f32 %v2979_v36, %v1484_v47  ;;  %v1470_v4 = vrot.slane %v1464_v33, 4 }
  0xeb   : > { %1349 = vrot.lane.b32.xlu0 %v1346_v29, %s2424_s9  ;;  %v1443_v29 = vmul.f32 %v2880_v56, %v1442_v38  ;;  %v1453_v23 = vsel %vm1288_vm3, %v1450_v30, %v1452_v32  ;;  %v1474_v7 = vsel %vm1288_vm3, %v1471_v53, %v1473_v5  ;;  %v1492_v9 = vrot.slane %v1486_v55, 4 }
  0xec   : > { %v3068_v18 = vpop.permute.xlu1 %658  ;;  %v620_v52 = vadd.f32 %v3038_v11, %v599_v0  ;;  %v733_v57 = vrot.slane %v3112_v20, 2  ;;  %v1526_v35 = vstv %s3129_s23  ;;  %v732_v19 = vrot.slane %v3136_v40, 2  ;;  %s3362_s23 = sld [smem:[#allocation3 + $0xab]] }
  0xed   : > { %v3073_v45 = vpop.permute.xlu0 %656  ;;  %v1528_v32 = vmul.f32 %v2896_v13, %v1526_v35  ;;  %v1529_v27 = vmul.f32 %v2979_v36, %v1526_v35  ;;  %v1547_v47 = vstv %s3160_s25  ;;  %v1603_v5 = vstv %s3175_s26  ;;  %s3371_s25 = sld [smem:[#allocation3 + $0x2c]] }
  0xee   : > { %1372 = vrot.lane.b32.xlu1 %v1369_v3, %s2425_s12  ;;  %v3132_v3 = vmul.f32 %v3002_v1, %v725_v60  ;;  %v718_v60 = vrot.slane %v3109_v22, 2  ;;  %v641_v11 = vadd.f32 %v3057_v31, %v620_v52  ;;  %v715_v22 = vrot.slane %v708_v2, 2  ;;  %s3383_s26 = sld [smem:[#allocation3 + $0xac]] }
  0xef   : > { %1370 = vrot.lane.b32.xlu0 %v1367_v41, %s2425_s12  ;;  %v621_v41 = vadd.f32 %v3034_v17, %v600_v50  ;;  %v1505_v17 = vstv %s3102_s22  ;;  %v734_v55 = vsel %vm714_vm1, %v732_v19, %v733_v57  ;;  %s3351_s22 = sld [smem:[#allocation3 + $0x2b]] }
  0xf0   : > { %v3085_v63 = vpop.permute.xlu1 %679  ;;  %v1507_v10 = vmul.f32 %v2887_v6, %v1505_v17  ;;  %v1508_v15 = vmul.f32 %v3002_v1, %v1505_v17  ;;  %v662_v28 = vadd.f32 %v3073_v45, %v641_v11  ;;  %v719_v42 = vsel %vm714_vm1, %v716_v37, %v718_v60 }
  0xf1   : > { %v3093_v8 = vpop.permute.xlu0 %677  ;;  %v642_v38 = vadd.f32 %v3050_v54, %v621_v41  ;;  %v735_v61 = vrot.slane %v3132_v3, 2  ;;  %v1506_v21 = vmul.f32 %v2918_v24, %v1505_v17  ;;  %v1534_v41 = vrot.slane %v1528_v32, 4 }
  0xf2   : > { %1393 = vrot.lane.b32.xlu1 %v1390_v39, %s2425_s12  ;;  %v1449_v39 = vrot.slane %v1443_v29, 4  ;;  %v683_v62 = vadd.f32 %v3093_v8, %v662_v28  ;;  %v1513_v29 = vrot.slane %v1507_v10, 4  ;;  %v1606_v11 = vmul.f32 %v2979_v36, %v1603_v5 }
  0xf3   : > { %1391 = vrot.lane.b32.xlu0 %v1388_v59, %s2425_s12  ;;  %v663_v54 = vadd.f32 %v3068_v18, %v642_v38  ;;  %v1494_v18 = vrot.slane %v1487_v14, 4  ;;  %v736_v33 = vsel %vm714_vm1, %v733_v57, %v735_v61 }
  0xf4   : > { %v3114_v26 = vpop.permute.xlu1 %700  ;;  %v1451_v59 = vsel %vm1288_vm3, %v1449_v39, %v1450_v30  ;;  %v1515_v30 = vrot.slane %v1508_v15, 4  ;;  %v1613_v61 = vrot.slane %v1606_v11, 5 }
  0xf5   : > { %v3120_v58 = vpop.permute.xlu0 %698  ;;  %v684_v31 = vadd.f32 %v3085_v63, %v663_v54  ;;  %v1491_v63 = vrot.slane %v1485_v16, 4  ;;  %v1495_v8 = vsel %vm1288_vm3, %v1492_v9, %v1494_v18  ;;  %v1645_v18 = vstv %s3203_s29  ;;  %s3413_s29 = sld [smem:[#allocation3 + $0xad]] }
  0xf6   : > { %1414 = vrot.lane.b32.xlu1 %v1411_v51, %s2426_s15  ;;  %v704_v34 = vadd.f32 %v3120_v58, %v683_v62  ;;  %v1512_v58 = vrot.slane %v1506_v21, 4  ;;  %v1516_v40 = vsel %vm1288_vm3, %v1513_v29, %v1515_v30  ;;  %v1647_v21 = vmul.f32 %v2896_v13, %v1645_v18 }
  0xf7   : > { %1412 = vrot.lane.b32.xlu0 %v1409_v46, %s2426_s15  ;;  %v1472_v46 = vsel %vm1288_vm3, %v1470_v4, %v1471_v53  ;;  %v705_v45 = vadd.f32 %v3114_v26, %v684_v31  ;;  %v717_v26 = vsel %vm714_vm1, %v715_v22, %v716_v37  ;;  %v1493_v2 = vsel %vm1288_vm3, %v1491_v63, %v1492_v9 }
  0xf8   : > { %v3139_v49 = vpop.permute.xlu1 %756  ;;  %v722_v39 = vadd.f32 %v717_v26, %v704_v34  ;;  %v1550_v53 = vmul.f32 %v3002_v1, %v1547_v47  ;;  %v1514_v17 = vsel %vm1288_vm3, %v1512_v58, %v1513_v29  ;;  %v1548_v37 = vmul.f32 %v2918_v24, %v1547_v47 }
  0xf9   : > { %v3145_v48 = vpop.permute.xlu0 %754  ;;  %v723_v3 = vadd.f32 %v719_v42, %v705_v45  ;;  %v1605_v4 = vmul.f32 %v2896_v13, %v1603_v5  ;;  %v1604_v31 = vmul.f32 %v2880_v56, %v1603_v5  ;;  %v1648_v29 = vmul.f32 %v2979_v36, %v1645_v18 }
  0xfa   : > { %1435 = vrot.lane.b32.xlu1 %v1432_v12, %s2426_s15  ;;  %v1527_v12 = vmul.f32 %v2880_v56, %v1526_v35  ;;  %v739_v54 = vadd.f32 %v734_v55, %v722_v39  ;;  %v1557_v16 = vrot.slane %v1550_v53, 4  ;;  %v1554_v28 = vrot.slane %v1548_v37, 4 }
  0xfb   : > { %1433 = vrot.lane.b32.xlu0 %v1430_v44, %s2426_s15  ;;  %v1536_v44 = vrot.slane %v1529_v27, 4  ;;  %v740_v14 = vadd.f32 %v736_v33, %v723_v3  ;;  %v1611_v42 = vrot.slane %v1605_v4, 5  ;;  %v1666_v27 = vstv %s3219_s5  ;;  %s3424_s5 = sld [smem:[#allocation3 + $0x2e]] }
  0xfc   : > { %v3158_v43 = vpop.permute.xlu1 %777  ;;  %v1533_v38 = vrot.slane %v1527_v12, 4  ;;  %v760_v62 = vadd.f32 %v3145_v48, %v739_v54  ;;  %v1610_v48 = vrot.slane %v1604_v31, 5  ;;  %v1646_v12 = vmul.f32 %v2880_v56, %v1645_v18 }
  0xfd   : > { %v3166_v51 = vpop.permute.xlu0 %775  ;;  %v1537_v57 = vsel %vm1288_vm3, %v1534_v41, %v1536_v44  ;;  %v761_v15 = vadd.f32 %v3139_v49, %v740_v14  ;;  %v1653_v33 = vrot.slane %v1647_v21, 5  ;;  %v1669_v44 = vmul.f32 %v3002_v1, %v1666_v27 }
  0xfe   : > { %1456 = vrot.lane.b32.xlu1 %v1453_v23, %s2427_s20  ;;  %v1549_v23 = vmul.f32 %v2887_v6, %v1547_v47  ;;  %v1535_v10 = vsel %vm1288_vm3, %v1533_v38, %v1534_v41  ;;  %v781_v47 = vadd.f32 %v3166_v51, %v760_v62  ;;  %v1668_v41 = vmul.f32 %v2887_v6, %v1666_v27 }
  0xff   : > { %1454 = vrot.lane.b32.xlu0 %v1451_v59, %s2427_s20  ;;  %v782_v30 = vadd.f32 %v3158_v43, %v761_v15  ;;  %v1652_v55 = vrot.slane %v1646_v12, 5  ;;  %v1676_v54 = vrot.slane %v1669_v44, 5  ;;  %v1729_v12 = vstv %s3279_s13  ;;  %s2349_s13 = sshll.u32 %s3606_s18, 4 }
 0x100   : > { %v3180_v20 = vpop.permute.xlu1 %798  ;;  %v1555_v59 = vrot.slane %v1549_v23, 4  ;;  %v1667_v23 = vmul.f32 %v2918_v24, %v1666_v27  ;;  %v1674_v11 = vrot.slane %v1668_v41, 5 }
 0x101   : > { %v3186_v25 = vpop.permute.xlu0 %796  ;;  %v803_v3 = vadd.f32 %v3180_v20, %v782_v30  ;;  %v1612_v20 = vsel %vm1575_vm4, %v1610_v48, %v1611_v42 }
 0x102   : > { %1477 = vrot.lane.b32.xlu1 %v1474_v7, %s2427_s20  ;;  %v1624_v7 = vstv %s3193_s28  ;;  %v1558_v45 = vsel %vm1288_vm3, %v1555_v59, %v1557_v16  ;;  %v1556_v32 = vsel %vm1288_vm3, %v1554_v28, %v1555_v59  ;;  %v802_v39 = vadd.f32 %v3186_v25, %v781_v47  ;;  %s3401_s28 = sld [smem:[#allocation3 + $0x2d]] }
 0x103   : > { %1475 = vrot.lane.b32.xlu0 %v1472_v46, %s2427_s20  ;;  %v1626_v22 = vmul.f32 %v2887_v6, %v1624_v7  ;;  %v1627_v46 = vmul.f32 %v3002_v1, %v1624_v7  ;;  %v1625_v49 = vmul.f32 %v2918_v24, %v1624_v7  ;;  %v1012_v16 = vstv %s3253_s10  ;;  %s2334_s10 = sld [smem:[#allocation3 + $0xaa]] }
 0x104   : > { %v3198_v50 = vpop.permute.xlu1 %819  ;;  %v1015_v62 = vmul.f32 %v3002_v1, %v1012_v16  ;;  %v1013_v30 = vmul.f32 %v2918_v24, %v1012_v16 }
 0x105   : > { %v3206_v0 = vpop.permute.xlu0 %817  ;;  %v1632_v26 = vrot.slane %v1626_v22, 5  ;;  %v1634_v19 = vrot.slane %v1627_v46, 5  ;;  %v1631_v43 = vrot.slane %v1625_v49, 5  ;;  %v824_v51 = vadd.f32 %v3198_v50, %v803_v3 }
 0x106   : > { %1498 = vrot.lane.b32.xlu1 %v1495_v8, %s2428_s24  ;;  %v1614_v8 = vsel %vm1575_vm4, %v1611_v42, %v1613_v61  ;;  %v823_v14 = vadd.f32 %v3206_v0, %v802_v39  ;;  %v1677_v22 = vsel %vm1575_vm4, %v1674_v11, %v1676_v54  ;;  %v1014_v46 = vmul.f32 %v2887_v6, %v1012_v16 }
 0x107   : > { %1496 = vrot.lane.b32.xlu0 %v1493_v2, %s2428_s24  ;;  %v994_v2 = vstv %s3228_s6  ;;  %v1635_v5 = vsel %vm1575_vm4, %v1632_v26, %v1634_v19  ;;  %s2342_s6 = sld [smem:[#allocation3 + $0xae]] }
 0x108   : > { %v3215_v52 = vpop.permute.xlu1 %840  ;;  %v3273_v38 = vmul.f32 %v2896_v13, %v994_v2  ;;  %v997_v50 = vmul.f32 %v2979_v36, %v994_v2  ;;  %v1020_v3 = vrot.slane %v1014_v46, 3 }
 0x109   : > { %v3221_v60 = vpop.permute.xlu0 %838  ;;  %v845_v25 = vadd.f32 %v3215_v52, %v824_v51  ;;  %v1673_v52 = vrot.slane %v1667_v23, 5  ;;  %v1732_v23 = vmul.f32 %v2979_v36, %v1729_v12 }
 0x10a   : > { %1519 = vrot.lane.b32.xlu1 %v1516_v40, %s2428_s24  ;;  %v1655_v40 = vrot.slane %v1648_v29, 5  ;;  %v844_v59 = vadd.f32 %v3221_v60, %v823_v14  ;;  %v1003_v15 = vrot.slane %v3273_v38, 3  ;;  %v1005_v61 = vrot.slane %v997_v50, 3 }
 0x10b   : > { %1517 = vrot.lane.b32.xlu0 %v1514_v17, %s2428_s24  ;;  %v1687_v17 = vstv %s3245_s8  ;;  %v1708_v60 = vstv %s3261_s11  ;;  %v1750_v38 = vstv %s3294_s14  ;;  %s2333_s8 = sld [smem:[#allocation3 + $0x2a]] }
 0x10c   : > { %v3231_v9 = vpop.permute.xlu1 %861  ;;  %v1656_v4 = vsel %vm1575_vm4, %v1653_v33, %v1655_v40  ;;  %v1689_v28 = vmul.f32 %v2896_v13, %v1687_v17  ;;  %v1690_v31 = vmul.f32 %v2979_v36, %v1687_v17  ;;  %v1710_v27 = vmul.f32 %v2887_v6, %v1708_v60  ;;  %s2141_s11 = sld [smem:[#allocation2]] }
 0x10d   : > { %v3237_v35 = vpop.permute.xlu0 %859  ;;  %v866_v0 = vadd.f32 %v3231_v9, %v845_v25  ;;  %v1711_v19 = vmul.f32 %v3002_v1, %v1708_v60  ;;  %v1006_v47 = vsel %vm1001_vm2, %v1003_v15, %v1005_v61  ;;  %v1709_v41 = vmul.f32 %v2918_v24, %v1708_v60 }
 0x10e   : > { %1540 = vrot.lane.b32.xlu1 %v1537_v57, %s2429_s27  ;;  %v1633_v57 = vsel %vm1575_vm4, %v1631_v43, %v1632_v26  ;;  %v865_v18 = vadd.f32 %v3237_v35, %v844_v59  ;;  %v1675_v35 = vsel %vm1575_vm4, %v1673_v52, %v1674_v11  ;;  %v1697_v48 = vrot.slane %v1690_v31, 5 }
 0x10f   : > { %1538 = vrot.lane.b32.xlu0 %v1535_v10, %s2429_s27  ;;  %v1654_v10 = vsel %vm1575_vm4, %v1652_v55, %v1653_v33  ;;  %v1022_v43 = vrot.slane %v1015_v62, 3  ;;  %v1716_v51 = vrot.slane %v1710_v27, 5  ;;  %v1718_v55 = vrot.slane %v1711_v19, 5 }
 0x110   : > { %v883_v63 = vpop.permute.xlu1 %882  ;;  %v1715_v54 = vrot.slane %v1709_v41, 5  ;;  %v1739_v52 = vrot.slane %v1732_v23, 5  ;;  %v1752_v16 = vmul.f32 %v2887_v6, %v1750_v38  ;;  %v1771_v31 = vstv %s3308_s16 }
 0x111   : > { %v881_v34 = vpop.permute.xlu0 %880  ;;  %v887_v42 = vadd.f32 %v883_v63, %v866_v0  ;;  %v1688_v63 = vmul.f32 %v2880_v56, %v1687_v17  ;;  %v1023_v14 = vsel %vm1001_vm2, %v1020_v3, %v1022_v43  ;;  %v1019_v17 = vrot.slane %v1013_v30, 3 }
 0x112   : > { %1561 = vrot.lane.b32.xlu1 %v1558_v45, %s2429_s27  ;;  %v995_v45 = vmul.f32 %v2880_v56, %v994_v2  ;;  %v886_v49 = vadd.f32 %v881_v34, %v865_v18  ;;  %v1751_v46 = vmul.f32 %v2918_v24, %v1750_v38  ;;  %v1774_v30 = vmul.f32 %v2979_v36, %v1771_v31 }
 0x113   : > { %1559 = vrot.lane.b32.xlu0 %v1556_v32, %s2429_s27  ;;  %v1695_v32 = vrot.slane %v1689_v28, 5  ;;  %v1694_v40 = vrot.slane %v1688_v63, 5  ;;  %v1719_v28 = vsel %vm1575_vm4, %v1716_v51, %v1718_v55  ;;  %v1021_v18 = vsel %vm1001_vm2, %v1019_v17, %v1020_v3 }
 0x114   : > { %v904_v58 = vpop.permute.xlu1 %903  ;;  %v1002_v2 = vrot.slane %v995_v45, 3  ;;  %v1757_v19 = vrot.slane %v1751_v46, 5 }
 0x115   : > { %v902_v53 = vpop.permute.xlu0 %901  ;;  %v908_v21 = vadd.f32 %v904_v58, %v887_v42  ;;  %v1698_v39 = vsel %vm1575_vm4, %v1695_v32, %v1697_v48  ;;  %v1696_v11 = vsel %vm1575_vm4, %v1694_v40, %v1695_v32  ;;  %v1792_v32 = vstv %s3318_s19  ;;  %s232_s19 = scalar_lea.vmem %s3603_s4, %s2349_s13 }
 0x116   : > { %1617 = vrot.lane.b32.xlu1 %v1614_v8, %s2424_s9  ;;  %v907_v8 = vadd.f32 %v902_v53, %v886_v49  ;;  %v1004_v50 = vsel %vm1001_vm2, %v1002_v2, %v1003_v15  ;;  %v1758_v49 = vrot.slane %v1752_v16, 5  ;;  %v1794_v3 = vmul.f32 %v2887_v6, %v1792_v32 }
 0x117   : > { %1615 = vrot.lane.b32.xlu0 %v1612_v20, %s2424_s9  ;;  %v1731_v20 = vmul.f32 %v2896_v13, %v1729_v12  ;;  %v1795_v43 = vmul.f32 %v3002_v1, %v1792_v32  ;;  %v1813_v40 = vstv %s3330_s21 }
 0x118   : > { %v925_v37 = vpop.permute.xlu1 %924  ;;  %v1815_v55 = vmul.f32 %v2896_v13, %v1813_v40 }
 0x119   : > { %v923_v7 = vpop.permute.xlu0 %922  ;;  %v929_v26 = vadd.f32 %v925_v37, %v908_v21  ;;  %v1730_v37 = vmul.f32 %v2880_v56, %v1729_v12  ;;  %v1737_v0 = vrot.slane %v1731_v20, 5  ;;  %v1772_v12 = vmul.f32 %v2880_v56, %v1771_v31 }
 0x11a   : > { %1638 = vrot.lane.b32.xlu1 %v1635_v5, %s2424_s9  ;;  %v928_v58 = vadd.f32 %v923_v7, %v907_v8  ;;  %v1753_v7 = vmul.f32 %v3002_v1, %v1750_v38  ;;  %v1793_v20 = vmul.f32 %v2918_v24, %v1792_v32  ;;  %v1821_v16 = vrot.slane %v1815_v55, 5 }
 0x11b   : > { %1636 = vrot.lane.b32.xlu0 %v1633_v57, %s2424_s9  ;;  %v1736_v61 = vrot.slane %v1730_v37, 5  ;;  %v1740_v45 = vsel %vm1575_vm4, %v1737_v0, %v1739_v52 }
 0x11c   : > { %v946_v9 = vpop.permute.xlu1 %945  ;;  %v1760_v21 = vrot.slane %v1753_v7, 5 }
 0x11d   : > { %v944_v29 = vpop.permute.xlu0 %943  ;;  %v950_v33 = vadd.f32 %v946_v9, %v929_v26  ;;  %v1738_v27 = vsel %vm1575_vm4, %v1736_v61, %v1737_v0 }
 0x11e   : > { %1659 = vrot.lane.b32.xlu1 %v1656_v4, %s2425_s12  ;;  %v949_v53 = vadd.f32 %v944_v29, %v928_v58  ;;  %v1761_v58 = vsel %vm1575_vm4, %v1758_v49, %v1760_v21 }
 0x11f   : > { %1657 = vrot.lane.b32.xlu0 %v1654_v10, %s2425_s12 }
 0x120   : > { %v967_v34 = vpop.permute.xlu1 %966 }
 0x121   : > { %v965_v44 = vpop.permute.xlu0 %964  ;;  %v971_v5 = vadd.f32 %v967_v34, %v950_v33  ;;  %v1781_v33 = vrot.slane %v1774_v30, 5 }
 0x122   : > { %1680 = vrot.lane.b32.xlu1 %v1677_v22, %s2425_s12  ;;  %v970_v57 = vadd.f32 %v965_v44, %v949_v53  ;;  %v1717_v22 = vsel %vm1575_vm4, %v1715_v54, %v1716_v51  ;;  %v1778_v51 = vrot.slane %v1772_v12, 5  ;;  %v1800_v53 = vrot.slane %v1794_v3, 5 }
 0x123   : > { %1678 = vrot.lane.b32.xlu0 %v1675_v35, %s2425_s12  ;;  %v1773_v35 = vmul.f32 %v2896_v13, %v1771_v31 }
 0x124   : > { %v988_v25 = vpop.permute.xlu1 %987 }
 0x125   : > { %v992_v4 = vadd.f32 %v988_v25, %v971_v5  ;;  %v986_v59 = vpop.permute.xlu0 %985  ;;  %v1802_v5 = vrot.slane %v1795_v43, 5  ;;  %v1816_v25 = vmul.f32 %v2979_v36, %v1813_v40 }
 0x126   : > { %1701 = vrot.lane.b32.xlu1 %v1698_v39, %s2426_s15  ;;  %v991_v15 = vadd.f32 %v986_v59, %v970_v57  ;;  %v1759_v39 = vsel %vm1575_vm4, %v1757_v19, %v1758_v49 }
 0x127   : > { %v1010_v10 = vadd.f32 %v1006_v47, %v992_v4  ;;  %1699 = vrot.lane.b32.xlu0 %v1696_v11, %s2426_s15  ;;  %v1779_v47 = vrot.slane %v1773_v35, 5  ;;  %v1799_v4 = vrot.slane %v1793_v20, 5  ;;  %v1814_v11 = vmul.f32 %v2880_v56, %v1813_v40 }
 0x128   : > { %v1044_v42 = vpop.permute.xlu1 %1043  ;;  %v1009_v9 = vadd.f32 %v1004_v50, %v991_v15  ;;  %v1834_v50 = vstv %s3341_s3  ;;  %v1803_v13 = vsel %vm1575_vm4, %v1800_v53, %v1802_v5  ;;  %v1823_v7 = vrot.slane %v1816_v25, 5 }
 0x129   : > { %v1027_v60 = vadd.f32 %v1023_v14, %v1010_v10  ;;  %v1042_v62 = vpop.permute.xlu0 %1041  ;;  %v1782_v14 = vsel %vm1575_vm4, %v1779_v47, %v1781_v33  ;;  %v1780_v57 = vsel %vm1575_vm4, %v1778_v51, %v1779_v47  ;;  %v1836_v59 = vmul.f32 %v2887_v6, %v1834_v50 }
 0x12a   : > { %1722 = vrot.lane.b32.xlu1 %v1719_v28, %s2426_s15  ;;  %v1026_v63 = vadd.f32 %v1021_v18, %v1009_v9  ;;  %v1837_v0 = vmul.f32 %v3002_v1, %v1834_v50  ;;  %v1890_v10 = vstv %s3351_s22  ;;  %v1801_v28 = vsel %vm1575_vm4, %v1799_v4, %v1800_v53 }
 0x12b   : > { %v1048_v29 = vadd.f32 %v1044_v42, %v1027_v60  ;;  %1720 = vrot.lane.b32.xlu0 %v1717_v22, %s2426_s15  ;;  %v1820_v31 = vrot.slane %v1814_v11, 5  ;;  %v1835_v18 = vmul.f32 %v2918_v24, %v1834_v50  ;;  %v1842_v42 = vrot.slane %v1836_v59, 5  ;;  %v3378_v60 = vld [vmem:[%s2491_s7 + $0x8] sm:$0xff] }
 0x12c   : > { %v1065_v48 = vpop.permute.xlu1 %1064  ;;  %v1047_v8 = vadd.f32 %v1042_v62, %v1026_v63  ;;  %v1844_v61 = vrot.slane %v1837_v0, 5  ;;  %v1892_v9 = vmul.f32 %v3378_v60, %v1890_v10  ;;  %v1893_v22 = vmul.f32 %v2979_v36, %v1890_v10  ;;  %v3389_v63 = vld [vmem:[%s2491_s7] sm:$0xff] }
 0x12d   : > { %v1069_v26 = vadd.f32 %v1065_v48, %v1048_v29  ;;  %v1063_v34 = vpop.permute.xlu0 %1062  ;;  %v1824_v62 = vsel %vm1575_vm4, %v1821_v16, %v1823_v7  ;;  %v1822_v21 = vsel %vm1575_vm4, %v1820_v31, %v1821_v16  ;;  %v1841_v35 = vrot.slane %v1835_v18, 5  ;;  %v3432_v31 = vld [vmem:[%s2491_s7 + $0x10] sm:$0x3f]  ;;  %s2343_s7 = sld [smem:[#allocation3 + $0x2f]] }
 0x12e   : > { %1743 = vrot.lane.b32.xlu1 %v1740_v45, %s2427_s20  ;;  %v1068_v2 = vadd.f32 %v1063_v34, %v1047_v8  ;;  %v1911_v45 = vstv %s3362_s23  ;;  %v1891_v29 = vmul.f32 %v3389_v63, %v1890_v10  ;;  %v1845_v32 = vsel %vm1575_vm4, %v1842_v42, %v1844_v61 }
 0x12f   : > { %1741 = vrot.lane.b32.xlu0 %v1738_v27, %s2427_s20  ;;  %v1898_v48 = vrot.slane %v1892_v9, 6  ;;  %v1900_v27 = vrot.slane %v1893_v22, 6  ;;  %v1914_v12 = vmul.f32 %v3002_v1, %v1911_v45  ;;  %v1932_v34 = vstv %s3371_s25 }
 0x130   : > { %v1086_v41 = vpop.permute.xlu1 %1085  ;;  %v1843_v43 = vsel %vm1575_vm4, %v1841_v35, %v1842_v42  ;;  %v1953_v53 = vstv %s3383_s26  ;;  %v1933_v25 = vmul.f32 %v3389_v63, %v1932_v34 }
 0x131   : > { %v1090_v44 = vadd.f32 %v1086_v41, %v1069_v26  ;;  %v1084_v23 = vpop.permute.xlu0 %1083  ;;  %v3395_v26 = vld [vmem:[%s2486_s30 + $0x8] sm:$0xff]  ;;  %v1901_v41 = vsel %vm1862_vm5, %v1898_v48, %v1900_v27 }
 0x132   : > { %1764 = vrot.lane.b32.xlu1 %v1761_v58, %s2427_s20  ;;  %v1089_v38 = vadd.f32 %v1084_v23, %v1068_v2  ;;  %v1913_v19 = vmul.f32 %v3395_v26, %v1911_v45  ;;  %v1897_v2 = vrot.slane %v1891_v29, 6  ;;  %v3405_v58 = vld [vmem:[%s2486_s30] sm:$0xff]  ;;  %v1921_v23 = vrot.slane %v1914_v12, 6 }
 0x133   : > { %1762 = vrot.lane.b32.xlu0 %v1759_v39, %s2427_s20  ;;  %v1912_v33 = vmul.f32 %v3405_v58, %v1911_v45  ;;  %v1935_v39 = vmul.f32 %v2979_v36, %v1932_v34  ;;  %v1954_v16 = vmul.f32 %v3405_v58, %v1953_v53  ;;  %v3444_v45 = vld [vmem:[%s2486_s30 + $0x10] sm:$0x3f]  ;;  %s2344_s30 = sld [smem:[#allocation3 + $0xaf]] }
 0x134   : > { %v1107_v17 = vpop.permute.xlu1 %1106  ;;  %v1919_v20 = vrot.slane %v1913_v19, 6 }
 0x135   : > { %v1111_v37 = vadd.f32 %v1107_v17, %v1090_v44  ;;  %v1105_v54 = vpop.permute.xlu0 %1104  ;;  %v1934_v44 = vmul.f32 %v3378_v60, %v1932_v34  ;;  %v1942_v17 = vrot.slane %v1935_v39, 6  ;;  %v1960_v22 = vrot.slane %v1954_v16, 6 }
 0x136   : > { %1785 = vrot.lane.b32.xlu1 %v1782_v14, %s2428_s24  ;;  %v1110_v52 = vadd.f32 %v1105_v54, %v1089_v38  ;;  %v1899_v38 = vsel %vm1862_vm5, %v1897_v2, %v1898_v48  ;;  %v1918_v14 = vrot.slane %v1912_v33, 6  ;;  %v1922_v11 = vsel %vm1862_vm5, %v1919_v20, %v1921_v23 }
 0x137   : > { %1783 = vrot.lane.b32.xlu0 %v1780_v57, %s2428_s24  ;;  %v1940_v36 = vrot.slane %v1934_v44, 6  ;;  %v1956_v57 = vmul.f32 %v3002_v1, %v1953_v53  ;;  %v2016_v48 = vstv %s3424_s5  ;;  %v2037_v33 = vstv %s2342_s6 }
 0x138   : > { %v1128_v15 = vpop.permute.xlu1 %1127  ;;  %v1920_v0 = vsel %vm1862_vm5, %v1918_v14, %v1919_v20  ;;  %v2019_v2 = vmul.f32 %v3432_v31, %v2016_v48  ;;  %v2017_v39 = vmul.f32 %v3389_v63, %v2016_v48  ;;  %v2039_v20 = vmul.f32 %v3395_v26, %v2037_v33 }
 0x139   : > { %v1132_v56 = vadd.f32 %v1128_v15, %v1111_v37  ;;  %v1126_v6 = vpop.permute.xlu0 %1125  ;;  %v1955_v37 = vmul.f32 %v3395_v26, %v1953_v53  ;;  %v1943_v1 = vsel %vm1862_vm5, %v1940_v36, %v1942_v17  ;;  %v1963_v15 = vrot.slane %v1956_v57, 6 }
 0x13a   : > { %1806 = vrot.lane.b32.xlu1 %v1803_v13, %s2428_s24  ;;  %v1131_v46 = vadd.f32 %v1126_v6, %v1110_v52  ;;  %v1974_v13 = vstv %s3401_s28  ;;  %v1939_v52 = vrot.slane %v1933_v25, 6  ;;  %v1995_v6 = vstv %s3413_s29 }
 0x13b   : > { %1804 = vrot.lane.b32.xlu0 %v1801_v28, %s2428_s24  ;;  %v1961_v10 = vrot.slane %v1955_v37, 6  ;;  %v1976_v28 = vmul.f32 %v3378_v60, %v1974_v13  ;;  %v1977_v18 = vmul.f32 %v3432_v31, %v1974_v13  ;;  %v1996_v19 = vmul.f32 %v3405_v58, %v1995_v6 }
 0x13c   : > { %v1149_v24 = vpop.permute.xlu1 %1148  ;;  %v1941_v9 = vsel %vm1862_vm5, %v1939_v52, %v1940_v36  ;;  %v2040_v23 = vmul.f32 %v3444_v45, %v2037_v33  ;;  %v2038_v36 = vmul.f32 %v3405_v58, %v2037_v33  ;;  %v2045_v37 = vrot.slane %v2039_v20, 6 }
 0x13d   : > { %v1153_v49 = vadd.f32 %v1149_v24, %v1132_v56  ;;  %v1147_v30 = vpop.permute.xlu0 %1146  ;;  %v1997_v24 = vmul.f32 %v3395_v26, %v1995_v6  ;;  %v1964_v35 = vsel %vm1862_vm5, %v1961_v10, %v1963_v15  ;;  %v1982_v29 = vrot.slane %v1976_v28, 6 }
 0x13e   : > { %1827 = vrot.lane.b32.xlu1 %v1824_v62, %s2429_s27  ;;  %v1152_v8 = vadd.f32 %v1147_v30, %v1131_v46  ;;  %v1975_v46 = vmul.f32 %v3389_v63, %v1974_v13  ;;  %v1984_v30 = vrot.slane %v1977_v18, 6  ;;  %v1962_v27 = vsel %vm1862_vm5, %v1960_v22, %v1961_v10 }
 0x13f   : > { %1825 = vrot.lane.b32.xlu0 %v1822_v21, %s2429_s27  ;;  %v2003_v34 = vrot.slane %v1997_v24, 6  ;;  %v2002_v44 = vrot.slane %v1996_v19, 6  ;;  %v2047_v57 = vrot.slane %v2040_v23, 6  ;;  %v2044_v52 = vrot.slane %v2038_v36, 6 }
 0x140   : > { %v1170_v47 = vpop.permute.xlu1 %1169 }
 0x141   : > { %v1174_v3 = vadd.f32 %v1170_v47, %v1153_v49  ;;  %v1168_v40 = vpop.permute.xlu0 %1167  ;;  %v1998_v49 = vmul.f32 %v3444_v45, %v1995_v6  ;;  %v2004_v25 = vsel %vm1862_vm5, %v2002_v44, %v2003_v34 }
 0x142   : > { %1848 = vrot.lane.b32.xlu1 %v1845_v32, %s2429_s27  ;;  %v1173_v51 = vadd.f32 %v1168_v40, %v1152_v8  ;;  %v1981_v8 = vrot.slane %v1975_v46, 6 }
 0x143   : > { %1846 = vrot.lane.b32.xlu0 %v1843_v43, %s2429_s27  ;;  %v2005_v47 = vrot.slane %v1998_v49, 6  ;;  %v2018_v43 = vmul.f32 %v3378_v60, %v2016_v48 }
 0x144   : > { %v1191_v5 = vpop.permute.xlu1 %1190 }
 0x145   : > { %v1195_v55 = vadd.f32 %v1191_v5, %v1174_v3  ;;  %v1189_v50 = vpop.permute.xlu0 %1188  ;;  %v1985_v3 = vsel %vm1862_vm5, %v1982_v29, %v1984_v30  ;;  %v2006_v53 = vsel %vm1862_vm5, %v2003_v34, %v2005_v47  ;;  %v2024_v5 = vrot.slane %v2018_v43, 6 }
 0x146   : > { %1904 = vrot.lane.b32.xlu1 %v1901_v41, %s2424_s9  ;;  %v1194_v4 = vadd.f32 %v1189_v50, %v1173_v51  ;;  %v1983_v41 = vsel %vm1862_vm5, %v1981_v8, %v1982_v29  ;;  %v2023_v50 = vrot.slane %v2017_v39, 6 }
 0x147   : > { %1902 = vrot.lane.b32.xlu0 %v1899_v38, %s2424_s9  ;;  %v2058_v38 = vstv %s2343_s7 }
 0x148   : > { %v1212_v54 = vpop.permute.xlu1 %1211  ;;  %v2059_v16 = vmul.f32 %v3389_v63, %v2058_v38 }
 0x149   : > { %v1216_v59 = vadd.f32 %v1212_v54, %v1195_v55  ;;  %v1210_v7 = vpop.permute.xlu0 %1209  ;;  %v2026_v55 = vrot.slane %v2019_v2, 6  ;;  %v2061_v54 = vmul.f32 %v3432_v31, %v2058_v38 }
 0x14a   : > { %1925 = vrot.lane.b32.xlu1 %v1922_v11, %s2424_s9  ;;  %v1215_v56 = vadd.f32 %v1210_v7, %v1194_v4  ;;  %v2060_v4 = vmul.f32 %v3378_v60, %v2058_v38 }
 0x14b   : > { %1923 = vrot.lane.b32.xlu0 %v1920_v0, %s2424_s9  ;;  %s2345_s9 = sld [smem:[#allocation3 + $0x30]]  ;;  %v2027_v11 = vsel %vm1862_vm5, %v2024_v5, %v2026_v55  ;;  %v2025_v0 = vsel %vm1862_vm5, %v2023_v50, %v2024_v5  ;;  %v2068_v15 = vrot.slane %v2061_v54, 6 }
 0x14c   : > { %v1233_v42 = vpop.permute.xlu1 %1232  ;;  %v2066_v10 = vrot.slane %v2060_v4, 6 }
 0x14d   : > { %v3437_v61 = vadd.f32 %v1233_v42, %v1216_v59  ;;  %v1231_v62 = vpop.permute.xlu0 %1230  ;;  %v2079_v59 = vstv %s2344_s30  ;;  %v2046_v42 = vsel %vm1862_vm5, %v2044_v52, %v2045_v37 }
 0x14e   : > { %1946 = vrot.lane.b32.xlu1 %v1943_v1, %s2425_s12  ;;  %v3447_v21 = vadd.f32 %v1231_v62, %v1215_v56  ;;  %v2048_v1 = vsel %vm1862_vm5, %v2045_v37, %v2047_v57  ;;  %v2081_v56 = vmul.f32 %v3395_v26, %v2079_v59  ;;  %v2082_v28 = vmul.f32 %v3444_v45, %v2079_v59 }
 0x14f   : > { %1944 = vrot.lane.b32.xlu0 %v1941_v9, %s2425_s12  ;;  %v2065_v9 = vrot.slane %v2059_v16, 6  ;;  %v2080_v22 = vmul.f32 %v3405_v58, %v2079_v59  ;;  %v2069_v24 = vsel %vm1862_vm5, %v2066_v10, %v2068_v15 }
 0x150   : > { %v3451_v32 = vpop.permute.xlu1 %1253  ;;  %v2087_v49 = vrot.slane %v2081_v56, 6 }
 0x151   : > { %v3456_v12 = vpop.permute.xlu0 %1251  ;;  %v2100_v18 = vstv %s2345_s9  ;;  %v2086_v8 = vrot.slane %v2080_v22, 6 }
 0x152   : > { %1967 = vrot.lane.b32.xlu1 %v1964_v35, %s2425_s12  ;;  %v2102_v62 = vmul.f32 %v3378_v60, %v2100_v18  ;;  %v2089_v35 = vrot.slane %v2082_v28, 6  ;;  %v2103_v29 = vmul.f32 %v3432_v31, %v2100_v18  ;;  %v2101_v19 = vmul.f32 %v3389_v63, %v2100_v18 }
 0x153   : > { %1965 = vrot.lane.b32.xlu0 %v1962_v27, %s2425_s12  ;;  %s2346_s12 = sld [smem:[#allocation3 + $0xb0]]  ;;  %v2067_v27 = vsel %vm1862_vm5, %v2065_v9, %v2066_v10  ;;  %v2088_v44 = vsel %vm1862_vm5, %v2086_v8, %v2087_v49 }
 0x154   : > { %v3463_v40 = vpop.permute.xlu1 %1274  ;;  %v2108_v47 = vrot.slane %v2102_v62, 6  ;;  %v2110_v43 = vrot.slane %v2103_v29, 6  ;;  %v2107_v39 = vrot.slane %v2101_v19, 6 }
 0x155   : > { %v3467_v51 = vpop.permute.xlu0 %1272 }
 0x156   : > { %1988 = vrot.lane.b32.xlu1 %v1985_v3, %s2426_s15  ;;  %v2090_v3 = vsel %vm1862_vm5, %v2087_v49, %v2089_v35 }
 0x157   : > { %1986 = vrot.lane.b32.xlu0 %v1983_v41, %s2426_s15 }
 0x158   : > { %v3474_v14 = vpop.permute.xlu1 %1330 }
 0x159   : > { %v3478_v17 = vpop.permute.xlu0 %1328  ;;  %v2121_v48 = vstv %s2346_s12 }
 0x15a   : > { %2009 = vrot.lane.b32.xlu1 %v2006_v53, %s2426_s15  ;;  %v2123_v2 = vmul.f32 %v3395_v26, %v2121_v48  ;;  %v2124_v33 = vmul.f32 %v3444_v45, %v2121_v48  ;;  %v2122_v20 = vmul.f32 %v3405_v58, %v2121_v48  ;;  %v2111_v53 = vsel %vm1862_vm5, %v2108_v47, %v2110_v43 }
 0x15b   : > { %2007 = vrot.lane.b32.xlu0 %v2004_v25, %s2426_s15  ;;  %s2305_s15 = sld [smem:[#allocation3 + $0x1c]]  ;;  %v2109_v25 = vsel %vm1862_vm5, %v2107_v39, %v2108_v47 }
 0x15c   : > { %v3485_v13 = vpop.permute.xlu1 %1351  ;;  %v2129_v5 = vrot.slane %v2123_v2, 6  ;;  %v2131_v55 = vrot.slane %v2124_v33, 6  ;;  %v2128_v50 = vrot.slane %v2122_v20, 6 }
 0x15d   : > { %v3489_v7 = vpop.permute.xlu0 %1349 }
 0x15e   : > { %2030 = vrot.lane.b32.xlu1 %v2027_v11, %s2427_s20  ;;  %v2132_v57 = vsel %vm1862_vm5, %v2129_v5, %v2131_v55  ;;  %v2130_v11 = vsel %vm1862_vm5, %v2128_v50, %v2129_v5 }
 0x15f   : > { %2028 = vrot.lane.b32.xlu0 %v2025_v0, %s2427_s20 }
 0x160   : > { %v3496_v6 = vpop.permute.xlu1 %1372 }
 0x161   : > { %v3500_v46 = vpop.permute.xlu0 %1370  ;;  %v1281_v37 = vstv %s2305_s15 }
 0x162   : > { %2051 = vrot.lane.b32.xlu1 %v2048_v1, %s2427_s20  ;;  %v1283_v54 = vmul.f32 %v3378_v60, %v1281_v37  ;;  %v1284_v59 = vmul.f32 %v3432_v31, %v1281_v37  ;;  %v1282_v16 = vmul.f32 %v3389_v63, %v1281_v37 }
 0x163   : > { %2049 = vrot.lane.b32.xlu0 %v2046_v42, %s2427_s20  ;;  %s2306_s20 = sld [smem:[#allocation3 + $0x9c]]  ;;  %v1258_v42 = vadd.f32 %v3451_v32, %v3437_v61 }
 0x164   : > { %v3507_v30 = vpop.permute.xlu1 %1393  ;;  %v1290_v10 = vrot.slane %v1283_v54, 4  ;;  %v1292_v15 = vrot.slane %v1284_v59, 4  ;;  %v1289_v9 = vrot.slane %v1282_v16, 4 }
 0x165   : > { %v3511_v34 = vpop.permute.xlu0 %1391  ;;  %v1279_v49 = vadd.f32 %v3463_v40, %v1258_v42 }
 0x166   : > { %2072 = vrot.lane.b32.xlu1 %v2069_v24, %s2428_s24  ;;  %v1257_v24 = vadd.f32 %v3456_v12, %v3447_v21  ;;  %v1293_v35 = vsel %vm1288_vm3, %v1290_v10, %v1292_v15  ;;  %v1291_v19 = vsel %vm1288_vm3, %v1289_v9, %v1290_v10 }
 0x167   : > { %2070 = vrot.lane.b32.xlu0 %v2067_v27, %s2428_s24  ;;  %v1297_v32 = vadd.f32 %v1293_v35, %v1279_v49 }
 0x168   : > { %v3518_v41 = vpop.permute.xlu1 %1414  ;;  %v1278_v8 = vadd.f32 %v3467_v51, %v1257_v24 }
 0x169   : > { %v3522_v23 = vpop.permute.xlu0 %1412  ;;  %v1299_v52 = vstv %s2306_s20 }
 0x16a   : > { %2093 = vrot.lane.b32.xlu1 %v2090_v3, %s2428_s24  ;;  %v1301_v56 = vmul.f32 %v3395_v26, %v1299_v52  ;;  %v1302_v28 = vmul.f32 %v3444_v45, %v1299_v52  ;;  %v1300_v22 = vmul.f32 %v3405_v58, %v1299_v52  ;;  %v1296_v2 = vadd.f32 %v1291_v19, %v1278_v8 }
 0x16b   : > { %2091 = vrot.lane.b32.xlu0 %v2088_v44, %s2428_s24  ;;  %s2319_s24 = sld [smem:[#allocation3 + $0x23]] }
 0x16c   : > { %v3527_v38 = vpop.permute.xlu1 %1435  ;;  %v1307_v29 = vrot.slane %v1301_v56, 4  ;;  %v1309_v48 = vrot.slane %v1302_v28, 4  ;;  %v1306_v47 = vrot.slane %v1300_v22, 4 }
 0x16d   : > { %v3530_v36 = vpop.permute.xlu0 %1433 }
 0x16e   : > { %2114 = vrot.lane.b32.xlu1 %v2111_v53, %s2429_s27  ;;  %v1310_v3 = vsel %vm1288_vm3, %v1307_v29, %v1309_v48  ;;  %v1308_v21 = vsel %vm1288_vm3, %v1306_v47, %v1307_v29 }
 0x16f   : > { %2112 = vrot.lane.b32.xlu0 %v2109_v25, %s2429_s27  ;;  %v1314_v40 = vadd.f32 %v1310_v3, %v1297_v32  ;;  %v1313_v44 = vadd.f32 %v1308_v21, %v1296_v2 }
 0x170   : > { %v1457_v4 = vpop.permute.xlu1 %1456 }
 0x171   : > { %v1455_v0 = vpop.permute.xlu0 %1454  ;;  %v1335_v20 = vadd.f32 %v3474_v14, %v1314_v40  ;;  %v1334_v51 = vadd.f32 %v3478_v17, %v1313_v44  ;;  %v1568_v15 = vstv %s2319_s24 }
 0x172   : > { %2135 = vrot.lane.b32.xlu1 %v2132_v57, %s2429_s27 }
 0x173   : > { %2133 = vrot.lane.b32.xlu0 %v2130_v11, %s2429_s27  ;;  %v1356_v55 = vadd.f32 %v3485_v13, %v1335_v20  ;;  %v1355_v50 = vadd.f32 %v3489_v7, %v1334_v51  ;;  %s2320_s27 = sld [smem:[#allocation3 + $0xa3]] }
 0x174   : > { %v1478_v1 = vpop.permute.xlu1 %1477 }
 0x175   : > { %v1476_v18 = vpop.permute.xlu0 %1475  ;;  %v1377_v37 = vadd.f32 %v3496_v6, %v1356_v55  ;;  %v1376_v11 = vadd.f32 %v3500_v46, %v1355_v50 }
 0x177   : > { %v1398_v54 = vadd.f32 %v3507_v30, %v1377_v37  ;;  %v1397_v59 = vadd.f32 %v3511_v34, %v1376_v11  ;;  %v1570_v30 = vmul.f32 %v3378_v60, %v1568_v15  ;;  %v1571_v34 = vmul.f32 %v3432_v31, %v1568_v15 }
 0x178   : > { %v1499_v62 = vpop.permute.xlu1 %1498 }
 0x179   : > { %v1497_v27 = vpop.permute.xlu0 %1496  ;;  %v1419_v17 = vadd.f32 %v3518_v41, %v1398_v54  ;;  %v1418_v13 = vadd.f32 %v3522_v23, %v1397_v59  ;;  %v1586_v22 = vstv %s2320_s27  ;;  %v1569_v23 = vmul.f32 %v3389_v63, %v1568_v15 }
 0x17a   : > { %v1577_v35 = vrot.slane %v1570_v30, 5  ;;  %v1587_v19 = vmul.f32 %v3405_v58, %v1586_v22 }
 0x17b   : > { %v1440_v16 = vadd.f32 %v3527_v38, %v1419_v17  ;;  %v1439_v6 = vadd.f32 %v3530_v36, %v1418_v13  ;;  %v1579_v36 = vrot.slane %v1571_v34, 5  ;;  %v1576_v8 = vrot.slane %v1569_v23, 5 }
 0x17c   : > { %v1520_v61 = vpop.permute.xlu1 %1519  ;;  %v1593_v40 = vrot.slane %v1587_v19, 5 }
 0x17d   : > { %v1518_v43 = vpop.permute.xlu0 %1517  ;;  %v1461_v10 = vadd.f32 %v1457_v4, %v1440_v16  ;;  %v1460_v46 = vadd.f32 %v1455_v0, %v1439_v6  ;;  %v1588_v4 = vmul.f32 %v3395_v26, %v1586_v22  ;;  %v1589_v0 = vmul.f32 %v3444_v45, %v1586_v22 }
 0x17e   : > { %v1580_v32 = vsel %vm1575_vm4, %v1577_v35, %v1579_v36  ;;  %v1578_v21 = vsel %vm1575_vm4, %v1576_v8, %v1577_v35 }
 0x17f   : > { %v1482_v28 = vadd.f32 %v1478_v1, %v1461_v10  ;;  %v1481_v41 = vadd.f32 %v1476_v18, %v1460_v46  ;;  %v1594_v3 = vrot.slane %v1588_v4, 5 }
 0x180   : > { %v1541_v12 = vpop.permute.xlu1 %1540 }
 0x181   : > { %v1539_v33 = vpop.permute.xlu0 %1538  ;;  %v1503_v9 = vadd.f32 %v1499_v62, %v1482_v28  ;;  %v1502_v38 = vadd.f32 %v1497_v27, %v1481_v41  ;;  %v1596_v27 = vrot.slane %v1589_v0, 5  ;;  %v1595_v55 = vsel %vm1575_vm4, %v1593_v40, %v1594_v3 }
 0x183   : > { %v1524_v49 = vadd.f32 %v1520_v61, %v1503_v9  ;;  %v1523_v29 = vadd.f32 %v1518_v43, %v1502_v38  ;;  %v1597_v43 = vsel %vm1575_vm4, %v1594_v3, %v1596_v27 }
 0x184   : > { %v1562_v39 = vpop.permute.xlu1 %1561 }
 0x185   : > { %v1560_v53 = vpop.permute.xlu0 %1559  ;;  %v1545_v48 = vadd.f32 %v1541_v12, %v1524_v49  ;;  %v1544_v62 = vadd.f32 %v1539_v33, %v1523_v29 }
 0x187   : > { %v1566_v47 = vadd.f32 %v1562_v39, %v1545_v48  ;;  %v1565_v2 = vadd.f32 %v1560_v53, %v1544_v62 }
 0x188   : > { %v3556_v5 = vpop.permute.xlu1 %1617 }
 0x189   : > { %v3559_v25 = vpop.permute.xlu0 %1615  ;;  %v1584_v20 = vadd.f32 %v1580_v32, %v1566_v47  ;;  %v1583_v51 = vadd.f32 %v1578_v21, %v1565_v2 }
 0x18b   : > { %v1601_v33 = vadd.f32 %v1597_v43, %v1584_v20  ;;  %v1600_v37 = vadd.f32 %v1595_v55, %v1583_v51 }
 0x18c   : > { %v1639_v57 = vpop.permute.xlu1 %1638 }
 0x18d   : > { %v1637_v14 = vpop.permute.xlu0 %1636  ;;  %v1622_v54 = vadd.f32 %v3556_v5, %v1601_v33  ;;  %v1621_v53 = vadd.f32 %v3559_v25, %v1600_v37  ;;  %v1855_v25 = vstv %s2333_s8 }
 0x18f   : > { %v1643_v13 = vadd.f32 %v1639_v57, %v1622_v54  ;;  %v1642_v6 = vadd.f32 %v1637_v14, %v1621_v53  ;;  %v1857_v14 = vmul.f32 %v3378_v60, %v1855_v25 }
 0x190   : > { %v1660_v52 = vpop.permute.xlu1 %1659 }
 0x191   : > { %v1658_v7 = vpop.permute.xlu0 %1657  ;;  %v1664_v10 = vadd.f32 %v1660_v52, %v1643_v13  ;;  %v1858_v52 = vmul.f32 %v3432_v31, %v1855_v25  ;;  %v1864_v48 = vrot.slane %v1857_v14, 6 }
 0x192   : > { %v1663_v46 = vadd.f32 %v1658_v7, %v1642_v6 }
 0x193   : > { %v1866_v8 = vrot.slane %v1858_v52, 6 }
 0x194   : > { %v1681_v56 = vpop.permute.xlu1 %1680 }
 0x195   : > { %v1679_v42 = vpop.permute.xlu0 %1678  ;;  %v1685_v28 = vadd.f32 %v1681_v56, %v1664_v10 }
 0x196   : > { %v1684_v34 = vadd.f32 %v1679_v42, %v1663_v46  ;;  %v1873_v42 = vstv %s2334_s10 }
 0x197   : > { %v1875_v19 = vmul.f32 %v3395_v26, %v1873_v42  ;;  %v1874_v31 = vmul.f32 %v3405_v58, %v1873_v42 }
 0x198   : > { %v1702_v24 = vpop.permute.xlu1 %1701 }
 0x199   : > { %v1700_v1 = vpop.permute.xlu0 %1699  ;;  %v1706_v41 = vadd.f32 %v1702_v24, %v1685_v28  ;;  %v1856_v24 = vmul.f32 %v3389_v63, %v1855_v25  ;;  %v1867_v63 = vsel %vm1862_vm5, %v1864_v48, %v1866_v8  ;;  %v1881_v2 = vrot.slane %v1875_v19, 6 }
 0x19a   : > { %v1705_v22 = vadd.f32 %v1700_v1, %v1684_v34  ;;  %v1880_v26 = vrot.slane %v1874_v31, 6 }
 0x19b   : > { %v1863_v32 = vrot.slane %v1856_v24, 6 }
 0x19c   : > { %v1723_v18 = vpop.permute.xlu1 %1722  ;;  %v1882_v58 = vsel %vm1862_vm5, %v1880_v26, %v1881_v2 }
 0x19d   : > { %v1721_v61 = vpop.permute.xlu0 %1720  ;;  %v1727_v23 = vadd.f32 %v1723_v18, %v1706_v41  ;;  %v1876_v18 = vmul.f32 %v3444_v45, %v1873_v42  ;;  %v1865_v20 = vsel %vm1862_vm5, %v1863_v32, %v1864_v48 }
 0x19e   : > { %v1726_v38 = vadd.f32 %v1721_v61, %v1705_v22 }
 0x19f   : > { %v1883_v21 = vrot.slane %v1876_v18, 6 }
 0x1a0   : > { %v1744_v44 = vpop.permute.xlu1 %1743 }
 0x1a1   : > { %v1742_v12 = vpop.permute.xlu0 %1741  ;;  %v1748_v49 = vadd.f32 %v1744_v44, %v1727_v23 }
 0x1a2   : > { %v1747_v57 = vadd.f32 %v1742_v12, %v1726_v38  ;;  %v1884_v12 = vsel %vm1862_vm5, %v1881_v2, %v1883_v21 }
 0x1a4   : > { %v1765_v50 = vpop.permute.xlu1 %1764 }
 0x1a5   : > { %v1763_v39 = vpop.permute.xlu0 %1762  ;;  %v1769_v36 = vadd.f32 %v1765_v50, %v1748_v49 }
 0x1a6   : > { %v1768_v56 = vadd.f32 %v1763_v39, %v1747_v57 }
 0x1a8   : > { %v1786_v11 = vpop.permute.xlu1 %1785 }
 0x1a9   : > { %v1784_v59 = vpop.permute.xlu0 %1783  ;;  %v1790_v4 = vadd.f32 %v1786_v11, %v1769_v36 }
 0x1aa   : > { %v1789_v1 = vadd.f32 %v1784_v59, %v1768_v56 }
 0x1ac   : > { %v1807_v17 = vpop.permute.xlu1 %1806 }
 0x1ad   : > { %v1805_v16 = vpop.permute.xlu0 %1804  ;;  %v1811_v29 = vadd.f32 %v1807_v17, %v1790_v4 }
 0x1ae   : > { %v1810_v47 = vadd.f32 %v1805_v16, %v1789_v1  ;;  %v2142_v1 = vstv %s2141_s11 }
 0x1b0   : > { %v1828_v15 = vpop.permute.xlu1 %1827 }
 0x1b1   : > { %v1826_v30 = vpop.permute.xlu0 %1825  ;;  %v1832_v60 = vadd.f32 %v1828_v15, %v1811_v29 }
 0x1b2   : > { %v1831_v27 = vadd.f32 %v1826_v30, %v1810_v47 }
 0x1b4   : > { %v1849_v9 = vpop.permute.xlu1 %1848 }
 0x1b5   : > { %v1847_v5 = vpop.permute.xlu0 %1846  ;;  %v1853_v61 = vadd.f32 %v1849_v9, %v1832_v60 }
 0x1b6   : > { %v1852_v44 = vadd.f32 %v1847_v5, %v1831_v27 }
 0x1b7   : > { %v1871_v45 = vadd.f32 %v1867_v63, %v1853_v61 }
 0x1b8   : > { %v1905_v35 = vpop.permute.xlu1 %1904  ;;  %v1870_v55 = vadd.f32 %v1865_v20, %v1852_v44 }
 0x1b9   : > { %v1903_v7 = vpop.permute.xlu0 %1902  ;;  %v1888_v33 = vadd.f32 %v1884_v12, %v1871_v45 }
 0x1ba   : > { %v1887_v37 = vadd.f32 %v1882_v58, %v1870_v55 }
 0x1bb   : > { %v1909_v54 = vadd.f32 %v1905_v35, %v1888_v33 }
 0x1bc   : > { %v1926_v0 = vpop.permute.xlu1 %1925  ;;  %v1908_v53 = vadd.f32 %v1903_v7, %v1887_v37 }
 0x1bd   : > { %v1924_v62 = vpop.permute.xlu0 %1923  ;;  %v1930_v13 = vadd.f32 %v1926_v0, %v1909_v54 }
 0x1be   : > { %v1929_v6 = vadd.f32 %v1924_v62, %v1908_v53 }
 0x1c0   : > { %v1947_v3 = vpop.permute.xlu1 %1946 }
 0x1c1   : > { %v1945_v40 = vpop.permute.xlu0 %1944  ;;  %v1951_v10 = vadd.f32 %v1947_v3, %v1930_v13 }
 0x1c2   : > { %v1950_v46 = vadd.f32 %v1945_v40, %v1929_v6 }
 0x1c4   : > { %v1968_v43 = vpop.permute.xlu1 %1967 }
 0x1c5   : > { %v1966_v51 = vpop.permute.xlu0 %1965  ;;  %v1972_v28 = vadd.f32 %v1968_v43, %v1951_v10 }
 0x1c6   : > { %v1971_v34 = vadd.f32 %v1966_v51, %v1950_v46 }
 0x1c8   : > { %v1989_v50 = vpop.permute.xlu1 %1988 }
 0x1c9   : > { %v1987_v39 = vpop.permute.xlu0 %1986  ;;  %v1993_v41 = vadd.f32 %v1989_v50, %v1972_v28 }
 0x1ca   : > { %v1992_v22 = vadd.f32 %v1987_v39, %v1971_v34 }
 0x1cc   : > { %v2010_v11 = vpop.permute.xlu1 %2009 }
 0x1cd   : > { %v2008_v59 = vpop.permute.xlu0 %2007  ;;  %v2014_v23 = vadd.f32 %v2010_v11, %v1993_v41 }
 0x1ce   : > { %v2013_v38 = vadd.f32 %v2008_v59, %v1992_v22 }
 0x1d0   : > { %v2031_v17 = vpop.permute.xlu1 %2030 }
 0x1d1   : > { %v2029_v16 = vpop.permute.xlu0 %2028  ;;  %v2035_v49 = vadd.f32 %v2031_v17, %v2014_v23 }
 0x1d2   : > { %v2034_v35 = vadd.f32 %v2029_v16, %v2013_v38 }
 0x1d4   : > { %v2052_v15 = vpop.permute.xlu1 %2051 }
 0x1d5   : > { %v2050_v30 = vpop.permute.xlu0 %2049  ;;  %v2056_v57 = vadd.f32 %v2052_v15, %v2035_v49 }
 0x1d6   : > { %v2055_v14 = vadd.f32 %v2050_v30, %v2034_v35 }
 0x1d8   : > { %v2073_v9 = vpop.permute.xlu1 %2072 }
 0x1d9   : > { %v2071_v5 = vpop.permute.xlu0 %2070  ;;  %v2077_v52 = vadd.f32 %v2073_v9, %v2056_v57 }
 0x1da   : > { %v2076_v56 = vadd.f32 %v2071_v5, %v2055_v14 }
 0x1dc   : > { %v2094_v25 = vpop.permute.xlu1 %2093 }
 0x1dd   : > { %v2092_v36 = vpop.permute.xlu0 %2091  ;;  %v2098_v4 = vadd.f32 %v2094_v25, %v2077_v52 }
 0x1de   : > { %v2097_v24 = vadd.f32 %v2092_v36, %v2076_v56 }
 0x1e0   : > { %v2115_v7 = vpop.permute.xlu1 %2114 }
 0x1e1   : > { %v2113_v42 = vpop.permute.xlu0 %2112  ;;  %v2119_v0 = vadd.f32 %v2115_v7, %v2098_v4 }
 0x1e2   : > { %v2118_v48 = vadd.f32 %v2113_v42, %v2097_v24 }
 0x1e4   : > { %v2136_v29 = vpop.permute.xlu1 %2135 }
 0x1e5   : > { %v2140_v8 = vadd.f32 %v2136_v29, %v2119_v0  ;;  %v2134_v19 = vpop.permute.xlu0 %2133 }
 0x1e6   : > { %v2139_v62 = vadd.f32 %v2134_v19, %v2118_v48 }
 0x1e7   : > { %v2144_v18 = vadd.f32 %v2142_v1, %v2140_v8 }
 0x1e8   : > { %v2143_v60 = vadd.f32 %v2142_v1, %v2139_v62 }
 0x1e9   : > { %v2146_v47 = vsub.f32 0.0, %v2144_v18 }
 0x1ea   : > { %v2145_v31 = vsub.f32 0.0, %v2143_v60 }
 0x1eb   : > { %v2149_v32 = vmul.f32 1.442695, %v2146_v47 }
 0x1ec   : > { %v2147_v3 = vmul.f32 1.442695, %v2145_v31 }
 0x1ed   : > { %2376 = vpow2.f32 %v2149_v32 }
 0x1ee   : > { %2378 = vpow2.f32 %v2147_v3 }
 0x1fa   : > { %v2377_v27 = vpop.eup %2376 }
 0x1fb   : > { %v2152_v61 = vadd.f32 1.0, %v2377_v27  ;;  %v2379_v63 = vpop.eup %2378 }
 0x1fc   : > { %v2151_v2 = vadd.f32 1.0, %v2379_v63 }
 0x1fd   : > { %2380 = vrcp.f32 %v2152_v61 }
 0x1fe   : > { %2382 = vrcp.f32 %v2151_v2 }
 0x20a   : > { %v2381_v21 = vpop.eup %2380 }
 0x20b   : > { %2159 = vst.msk [vmem:[%s232_s19 + $0x8] sm:$0xff] %vm2157_vm6, %v2381_v21  ;;  %v2383_v40 = vpop.eup %2382 }
 0x20c   : > { %2158 = vst.msk [vmem:[%s232_s19] sm:$0xff] %vm2157_vm6, %v2383_v40 }
 0x20d PF: > { %s16_s17 = sadd.s32 1, %s2421_s17  }
 0x20e   : > { %p13_p1 = scmp.ge.s32.totalorder %s16_s17, 4  }
 0x210   :  { %15 = sbr.rel (!%p13_p1) target bundleno = 3 (0x3), region = 74 }
 0x215   :  { %2181 = vsyncpa [#allocation4], 1 }
 0x216   :  { %2183 = vsyncpa [#allocation4 + $0x1], 1 }

</bundles_post_ra>
